<compile_context>
chip_gen: v7x
topology: tpu7x:2x2x1
jax: 0.10.0
libtpu: 0.0.40
codegen_flags: <defaults>
</compile_context>

<pallas_src>
import functools
import math

import jax
import jax.numpy as jnp
from jax import lax
from jax.experimental import pallas as pl
from jax.experimental.pallas import tpu as pltpu

INI = 0.01
_HIGHEST = jax.lax.Precision.HIGHEST


# ---------------------------------------------------------------------------
# Pallas kernel: one LSTM layer, both directions fused, TT timesteps per grid
# step.  grid = (T // TT,) -- strictly sequential recurrence ("arbitrary").
# h/c carries live in VMEM scratch and persist across grid steps.
# ---------------------------------------------------------------------------
def _bilstm_seq_kernel(*refs, num_dirs, tt_block, hidden):
    n_in = num_dirs + 3
    gx_refs = refs[:num_dirs]                       # (TT, B, 4H) per direction
    whh_ref, h0_ref, c0_ref = refs[num_dirs:n_in]   # (dirs,H,4H), (dirs,B,H) x2
    out_refs = refs[n_in:n_in + num_dirs]           # (TT, B, H) per direction
    hf_ref = refs[n_in + num_dirs]                  # (dirs, B, H)
    cf_ref = refs[n_in + num_dirs + 1]              # (dirs, B, H)
    h_scr = refs[n_in + num_dirs + 2]               # (dirs, B, H) scratch
    c_scr = refs[n_in + num_dirs + 3]               # (dirs, B, H) scratch

    H = hidden
    g = pl.program_id(0)
    last = pl.num_programs(0) - 1

    @pl.when(g == 0)
    def _():
        h_scr[...] = h0_ref[...]
        c_scr[...] = c0_ref[...]

    for d in range(num_dirs):
        reverse = (d == 1)                          # backward direction
        gx_ref = gx_refs[d]
        out_ref = out_refs[d]
        whh = whh_ref[d]                            # (H, 4H), VMEM resident

        def body(i, carry):
            h, c = carry
            t = (tt_block - 1 - i) if reverse else i
            gates = gx_ref[t] + jnp.dot(h, whh,
                                        preferred_element_type=jnp.float32)
            i_g = jax.nn.sigmoid(gates[:, 0 * H:1 * H])
            f_g = jax.nn.sigmoid(gates[:, 1 * H:2 * H])
            g_g = jnp.tanh(gates[:, 2 * H:3 * H])
            o_g = jax.nn.sigmoid(gates[:, 3 * H:4 * H])
            c = f_g * c + i_g * g_g
            h = o_g * jnp.tanh(c)
            out_ref[t] = h.astype(out_ref.dtype)
            return h, c

        h_d, c_d = lax.fori_loop(0, tt_block, body, (h_scr[d], c_scr[d]),
                                 unroll=min(tt_block, 8))
        h_scr[d] = h_d
        c_scr[d] = c_d

        @pl.when(g == last)
        def _():
            hf_ref[d] = h_d
            cf_ref[d] = c_d


def _pick_time_block(T, B, H, num_dirs, budget_bytes=32 * 1024 * 1024):
    """Largest divisor of T whose double-buffered in/out blocks fit ~half of a
    v7x-safe (32 MiB scoped) VMEM budget."""
    per_step = 4 * 2 * num_dirs * (B * 4 * H + B * H)   # f32, x2 double buffer
    cap = max(1, (budget_bytes // 2) // per_step)
    cap = min(cap, 64)                                   # bound the unrolled body
    tt = 1
    for cand in range(1, T + 1):
        if T % cand == 0 and cand <= cap:
            tt = cand
    return tt


def _lstm_layer(x_tm, layer_params, h0, c0, *, hidden, num_dirs, time_block=None):
    """One (possibly bidirectional) LSTM layer over a full time-major sequence.

    x_tm         : (T, B, D) time-major input
    layer_params : list over directions of {w_ih (4H,D), w_hh (4H,H), b_ih, b_hh}
    h0, c0       : (num_dirs, B, H)
    Returns (y (T, B, num_dirs*H), h_final (num_dirs,B,H), c_final (num_dirs,B,H)).
    """
    T, B, D = x_tm.shape
    H = hidden
    G = 4 * H

    # ---- hoisted input projection: one big GEMM for all T and both dirs ----
    w_cat = jnp.concatenate([p["w_ih"].T for p in layer_params], axis=1)   # (D, dirs*4H)
    b_cat = jnp.concatenate([p["b_ih"] + p["b_hh"] for p in layer_params]) # (dirs*4H,)
    gx = jnp.einsum("tbd,dg->tbg", x_tm, w_cat, precision=_HIGHEST) + b_cat
    gx = gx.astype(jnp.float32)                                            # (T, B, dirs*4H)

    whh = jnp.stack([p["w_hh"].T for p in layer_params], axis=0)           # (dirs, H, 4H)

    tt = time_block if time_block is not None else _pick_time_block(T, B, H, num_dirs)
    assert T % tt == 0, "time_block must divide T"
    nblk = T // tt

    # Forward direction consumes blocks in natural order; backward direction
    # consumes the *other half* of gx in reversed block order (no [::-1] copy).
    gx_specs = [pl.BlockSpec((tt, B, G), lambda g: (g, 0, 0))]
    out_specs = [pl.BlockSpec((tt, B, H), lambda g: (g, 0, 0))]
    if num_dirs == 2:
        gx_specs.append(pl.BlockSpec((tt, B, G),
                                     lambda g, _n=nblk: (_n - 1 - g, 0, 1)))
        out_specs.append(pl.BlockSpec((tt, B, H),
                                      lambda g, _n=nblk: (_n - 1 - g, 0, 0)))

    # Grid-invariant operands: whole-array, single-buffered VMEM residents.
    vmem_specs = [pl.BlockSpec(memory_space=pltpu.MemorySpace.VMEM)] * 3   # whh, h0, c0
    final_specs = [pl.BlockSpec((num_dirs, B, H), lambda g: (0, 0, 0))] * 2

    out_shape = tuple(
        [jax.ShapeDtypeStruct((T, B, H), jnp.float32)] * num_dirs
        + [jax.ShapeDtypeStruct((num_dirs, B, H), jnp.float32)] * 2)

    # Explicit VMEM budget (sized for v7x's 64 MiB / 32 MiB scoped default).
    est_bytes = 4 * (2 * num_dirs * tt * B * (G + H)     # double-buffered gx/out blocks
                     + num_dirs * H * G                  # W_hh, single-buffered
                     + 8 * num_dirs * B * H)             # h0/c0/hf/cf + h/c scratch
    vmem_limit = int(min(max(2 * est_bytes, 16 * 1024 * 1024), 48 * 1024 * 1024))

    kernel = functools.partial(_bilstm_seq_kernel,
                               num_dirs=num_dirs, tt_block=tt, hidden=H)

    outs = pl.pallas_call(
        kernel,
        out_shape=out_shape,
        grid_spec=pltpu.PrefetchScalarGridSpec(
            num_scalar_prefetch=0,
            grid=(nblk,),
            in_specs=gx_specs + vmem_specs,
            out_specs=tuple(out_specs + final_specs),
            scratch_shapes=[pltpu.VMEM((num_dirs, B, H), jnp.float32),   # h carry
                            pltpu.VMEM((num_dirs, B, H), jnp.float32)],  # c carry
        ),
        compiler_params=pltpu.CompilerParams(
            dimension_semantics=("arbitrary",),
            vmem_limit_bytes=vmem_limit),
    )(*([gx] * num_dirs), whh, h0, c0)

    out_dirs = outs[:num_dirs]
    hf, cf = outs[num_dirs], outs[num_dirs + 1]
    y = out_dirs[0] if num_dirs == 1 else jnp.concatenate(out_dirs, axis=-1)
    return y, hf, cf


# ---------------------------------------------------------------------------
# LSTMEncoder: parameters + forward (stacked, bidirectional).
# ---------------------------------------------------------------------------
class LSTMEncoderPallas:
    def __init__(self, input_dim, n_hidden, n_layer, dropout, bidirectional, key):
        self.input_dim = input_dim
        self.n_hidden = n_hidden
        self.n_layer = n_layer
        self.dropout = dropout              # inter-layer dropout: inference no-op
        self.bidirectional = bidirectional
        self.num_dirs = 2 if bidirectional else 1

        keys = jax.random.split(key, 2 + 4 * n_layer * self.num_dirs)
        self.init_h = jax.random.uniform(
            keys[0], (n_layer * self.num_dirs, n_hidden),
            minval=-INI, maxval=INI, dtype=jnp.float32)
        self.init_c = jax.random.uniform(
            keys[1], (n_layer * self.num_dirs, n_hidden),
            minval=-INI, maxval=INI, dtype=jnp.float32)

        k = 1.0 / math.sqrt(n_hidden)       # nn.LSTM default init
        self.weights = []                   # weights[layer][dir] -> dict
        ki = 2
        for layer in range(n_layer):
            d_in = input_dim if layer == 0 else n_hidden * self.num_dirs
            per_dir = []
            for _ in range(self.num_dirs):
                w_ih = jax.random.uniform(keys[ki + 0], (4 * n_hidden, d_in),
                                          minval=-k, maxval=k, dtype=jnp.float32)
                w_hh = jax.random.uniform(keys[ki + 1], (4 * n_hidden, n_hidden),
                                          minval=-k, maxval=k, dtype=jnp.float32)
                b_ih = jax.random.uniform(keys[ki + 2], (4 * n_hidden,),
                                          minval=-k, maxval=k, dtype=jnp.float32)
                b_hh = jax.random.uniform(keys[ki + 3], (4 * n_hidden,),
                                          minval=-k, maxval=k, dtype=jnp.float32)
                ki += 4
                per_dir.append(dict(w_ih=w_ih, w_hh=w_hh, b_ih=b_ih, b_hh=b_hh))
            self.weights.append(per_dir)

    def __call__(self, input_, in_lens=None, return_states=False, time_block=None):
        """input_: [batch_size, max_num_sent, input_dim]"""
        # TODO(synk): in_lens / pack_padded_sequence variable-length handling is
        # not implemented; padded timesteps are processed like real ones.
        B = input_.shape[0]
        x = jnp.transpose(input_, (1, 0, 2)).astype(jnp.float32)   # (T, B, D)

        finals_h, finals_c = [], []
        for layer in range(self.n_layer):
            base = layer * self.num_dirs
            h0 = jnp.broadcast_to(self.init_h[base:base + self.num_dirs, None, :],
                                  (self.num_dirs, B, self.n_hidden))
            c0 = jnp.broadcast_to(self.init_c[base:base + self.num_dirs, None, :],
                                  (self.num_dirs, B, self.n_hidden))
            x, hf, cf = _lstm_layer(x, self.weights[layer], h0, c0,
                                    hidden=self.n_hidden, num_dirs=self.num_dirs,
                                    time_block=time_block)
            finals_h.append(hf)
            finals_c.append(cf)

        lstm_out = jnp.transpose(x, (1, 0, 2))                     # (B, T, dirs*H)
        if return_states:
            return lstm_out, (jnp.concatenate(finals_h, axis=0),
                              jnp.concatenate(finals_c, axis=0))
        return lstm_out


# ---------------------------------------------------------------------------
# ConvSentEncoder (plain XLA glue: embedding + im2col GEMM convs + max-pool).
# ---------------------------------------------------------------------------
class ConvSentEncoderJAX:
    def __init__(self, vocab_size, emb_dim, n_hidden, dropout, key):
        ks = jax.random.split(key, 7)
        emb = jax.random.normal(ks[0], (vocab_size, emb_dim), dtype=jnp.float32) * 0.1
        self.embedding = emb.at[0].set(0.0)          # padding_idx = 0
        self.n_hidden = n_hidden
        self.dropout = dropout                        # inference no-op
        self.convs = []
        for i, ksz in enumerate((3, 4, 5)):
            bound = 1.0 / math.sqrt(emb_dim * ksz)
            w = jax.random.uniform(ks[1 + 2 * i], (n_hidden, emb_dim, ksz),
                                   minval=-bound, maxval=bound, dtype=jnp.float32)
            b = jax.random.uniform(ks[2 + 2 * i], (n_hidden,),
                                   minval=-bound, maxval=bound, dtype=jnp.float32)
            self.convs.append((w, b))
        # TODO(synk): position-encoding branch (pe=True) not implemented.

    def __call__(self, ids):                          # ids: (N, L) int32
        emb = jnp.take(self.embedding, ids, axis=0)   # (N, L, E)
        N, L, E = emb.shape
        outs = []
        for (w, b) in self.convs:
            ksz = w.shape[-1]
            win = jnp.stack([emb[:, j:L - ksz + 1 + j, :] for j in range(ksz)],
                            axis=2).reshape(N, L - ksz + 1, ksz * E)
            w_mat = jnp.transpose(w, (0, 2, 1)).reshape(w.shape[0], ksz * E)
            conv = win @ w_mat.T + b                  # (N, L-k+1, H)
            outs.append(jnp.max(jax.nn.relu(conv), axis=1))
        return jnp.concatenate(outs, axis=1)          # (N, 3H)


def _sequence_mean(x, nums):
    if nums is None:
        return jnp.mean(x, axis=1)
    n = jnp.asarray(nums)
    mask = (jnp.arange(x.shape[1])[None, :] < n[:, None]).astype(x.dtype)
    return jnp.einsum("btd,bt->bd", x, mask) / n.astype(x.dtype)[:, None]


# ---------------------------------------------------------------------------
# ExtractSumm (ff-ext) forward.
# ---------------------------------------------------------------------------
class ExtractSummPallas:
    def __init__(self, vocab_size, emb_dim, conv_hidden, lstm_hidden, lstm_layer,
                 bidirectional, dropout=0.0, key=None):
        if key is None:
            key = jax.random.PRNGKey(0)
        ks = jax.random.split(key, 6)
        self._sent_enc = ConvSentEncoderJAX(vocab_size, emb_dim, conv_hidden,
                                            dropout, ks[0])
        self._art_enc = LSTMEncoderPallas(3 * conv_hidden, lstm_hidden, lstm_layer,
                                          dropout, bidirectional, ks[1])
        d = lstm_hidden * (2 if bidirectional else 1)
        bound = 1.0 / math.sqrt(d)
        self._w_sent = jax.random.uniform(ks[2], (1, d), minval=-bound, maxval=bound,
                                          dtype=jnp.float32)
        self._b_sent = jax.random.uniform(ks[3], (1,), minval=-bound, maxval=bound,
                                          dtype=jnp.float32)
        self._w_art = jax.random.uniform(ks[4], (d, d), minval=-bound, maxval=bound,
                                         dtype=jnp.float32)
        self._b_art = jax.random.uniform(ks[5], (d,), minval=-bound, maxval=bound,
                                         dtype=jnp.float32)

    def _encode_sents(self, article_sents, sent_nums):
        if sent_nums is None:
            return self._sent_enc(article_sents[0])[None]
        max_n = max(sent_nums)
        feats = []
        for ids, n in zip(article_sents, sent_nums):
            f = self._sent_enc(ids)                               # (n, 3C)
            if n != max_n:
                f = jnp.concatenate(
                    [f, jnp.zeros((max_n - n, f.shape[1]), f.dtype)], axis=0)
            feats.append(f)
        return jnp.stack(feats, axis=0)                           # (B, max_n, 3C)

    def _head(self, lstm_out, sent_nums):
        mean = _sequence_mean(lstm_out, sent_nums)                # (B, D)
        enc_art = jnp.tanh(mean @ self._w_art.T + self._b_art)    # (B, D)
        saliency = jnp.einsum("btd,bd->bt", lstm_out, enc_art)    # (B, T)
        sal = jnp.concatenate([s[:n] for s, n in zip(saliency, sent_nums)], axis=0)
        sents = jnp.concatenate([s[:n] for s, n in zip(lstm_out, sent_nums)], axis=0)
        content = sents @ self._w_sent.T + self._b_sent           # (sum_n, 1)
        return content[:, 0] + sal                                # (sum_n,)

    def __call__(self, article_sents, sent_nums):
        enc_sent = self._encode_sents(article_sents, sent_nums)
        lstm_out = self._art_enc(enc_sent, sent_nums)
        return self._head(lstm_out, sent_nums)


# ---------------------------------------------------------------------------
# Pure-JAX reference (lax.scan LSTM) for correctness checks.
# ---------------------------------------------------------------------------
def _ref_lstm_layer_dir(x_tm, w_ih, w_hh, b_ih, b_hh, h0, c0):
    H = h0.shape[-1]
    b = b_ih + b_hh

    def step(carry, x_t):
        h, c = carry
        gates = (jnp.dot(x_t, w_ih.T, precision=_HIGHEST)
                 + jnp.dot(h, w_hh.T, precision=_HIGHEST) + b)
        i = jax.nn.sigmoid(gates[:, 0 * H:1 * H])
        f = jax.nn.sigmoid(gates[:, 1 * H:2 * H])
        g = jnp.tanh(gates[:, 2 * H:3 * H])
        o = jax.nn.sigmoid(gates[:, 3 * H:4 * H])
        c = f * c + i * g
        h = o * jnp.tanh(c)
        return (h, c), h

    (_, _), outs = lax.scan(step, (h0, c0), x_tm)
    return outs


def _ref_lstm_encoder(enc, input_):
    B = input_.shape[0]
    x = jnp.transpose(input_, (1, 0, 2)).astype(jnp.float32)
    for layer in range(enc.n_layer):
        outs = []
        for d in range(enc.num_dirs):
            p = enc.weights[layer][d]
            idx = layer * enc.num_dirs + d
            h0 = jnp.broadcast_to(enc.init_h[idx][None, :], (B, enc.n_hidden))
            c0 = jnp.broadcast_to(enc.init_c[idx][None, :], (B, enc.n_hidden))
            xd = x if d == 0 else x[::-1]
            o = _ref_lstm_layer_dir(xd, p["w_ih"], p["w_hh"], p["b_ih"], p["b_hh"],
                                    h0, c0)
            if d == 1:
                o = o[::-1]
            outs.append(o)
        x = outs[0] if enc.num_dirs == 1 else jnp.concatenate(outs, axis=-1)
    return jnp.transpose(x, (1, 0, 2))


if __name__ == "__main__":
    key = jax.random.PRNGKey(0)
    k_model, k_art0, k_art1 = jax.random.split(key, 3)

    vocab_size, emb_dim, conv_hidden = 100, 64, 64
    lstm_hidden, lstm_layer, bidirectional = 128, 2, True
    max_word_len = 16
    sent_nums = [8, 6]

    model = ExtractSummPallas(vocab_size, emb_dim, conv_hidden, lstm_hidden,
                              lstm_layer, bidirectional, dropout=0.0, key=k_model)

    art0 = jax.random.randint(k_art0, (sent_nums[0], max_word_len), 1, vocab_size,
                              dtype=jnp.int32)
    art1 = jax.random.randint(k_art1, (sent_nums[1], max_word_len), 1, vocab_size,
                              dtype=jnp.int32)
    art0 = art0.at[:, -3:].set(0)          # some word-level padding (id 0)
    article_sents = [art0, art1]

    # Full forward pass through the Pallas-backed model.
    logit = model(article_sents, sent_nums)
    jax.block_until_ready(logit)
    assert logit.shape == (sum(sent_nums),)

    # Correctness: Pallas LSTM vs pure-JAX lax.scan reference.
    enc_sent = model._encode_sents(article_sents, sent_nums)
    lstm_out, (h_n, c_n) = model._art_enc(enc_sent, sent_nums, return_states=True)
    jax.block_until_ready(lstm_out)
    assert lstm_out.shape == (2, max(sent_nums), lstm_hidden * 2)
    assert h_n.shape == (lstm_layer * 2, 2, lstm_hidden)

    lstm_ref = _ref_lstm_encoder(model._art_enc, enc_sent)
    assert jnp.allclose(lstm_out, lstm_ref, atol=2e-3, rtol=2e-3), \
        "LSTM kernel mismatch vs JAX reference"

    # Also exercise the multi-time-block pipeline path (grid > 1).
    lstm_out_tb = model._art_enc(enc_sent, sent_nums, time_block=2)
    assert jnp.allclose(lstm_out_tb, lstm_ref, atol=2e-3, rtol=2e-3), \
        "time-blocked LSTM kernel mismatch vs JAX reference"

    # End-to-end logits vs the reference-LSTM pipeline.
    logit_ref = model._head(lstm_ref, sent_nums)
    assert jnp.allclose(logit, logit_ref, atol=5e-3, rtol=5e-3), \
        "ExtractSumm logit mismatch vs JAX reference"

    print("KERNEL_OK")
</pallas_src>

<mosaic_0001>
module attributes {stable_mosaic.version = 11 : i64} {
  func.func @_bilstm_seq_kernel(%arg0: i32, %arg1: memref<8x2x512xf32, #tpu.memory_space<vmem>>, %arg2: memref<8x2x512xf32, #tpu.memory_space<vmem>>, %arg3: memref<2x128x512xf32, #tpu.memory_space<vmem>>, %arg4: memref<2x2x128xf32, #tpu.memory_space<vmem>>, %arg5: memref<2x2x128xf32, #tpu.memory_space<vmem>>, %arg6: memref<8x2x128xf32, #tpu.memory_space<vmem>>, %arg7: memref<8x2x128xf32, #tpu.memory_space<vmem>>, %arg8: memref<2x2x128xf32, #tpu.memory_space<vmem>>, %arg9: memref<2x2x128xf32, #tpu.memory_space<vmem>>, %arg10: memref<2x2x128xf32, #tpu.memory_space<vmem>>, %arg11: memref<2x2x128xf32, #tpu.memory_space<vmem>>) attributes {dimension_semantics = [#tpu.dimension_semantics<arbitrary>], iteration_bounds = array<i64: 1>, scalar_prefetch = 0 : i64, scratch_operands = 2 : i64, tpu.core_type = #tpu.core_type<tc>, window_params = [{transform_indices = @transform_0, window_bounds = array<i64: 8, 2, 512>}, {transform_indices = @transform_1, window_bounds = array<i64: 8, 2, 512>}, {pipeline_mode = #tpu.pipeline_mode<synchronous>, transform_indices = @transform_2, window_bounds = array<i64: 2, 128, 512>}, {pipeline_mode = #tpu.pipeline_mode<synchronous>, transform_indices = @transform_3, window_bounds = array<i64: 2, 2, 128>}, {pipeline_mode = #tpu.pipeline_mode<synchronous>, transform_indices = @transform_4, window_bounds = array<i64: 2, 2, 128>}, {transform_indices = @transform_5, window_bounds = array<i64: 8, 2, 128>}, {transform_indices = @transform_6, window_bounds = array<i64: 8, 2, 128>}, {pipeline_mode = #tpu.pipeline_mode<synchronous>, transform_indices = @transform_7, window_bounds = array<i64: 2, 2, 128>}, {pipeline_mode = #tpu.pipeline_mode<synchronous>, transform_indices = @transform_8, window_bounds = array<i64: 2, 2, 128>}]} {
    %c0_i32 = arith.constant 0 : i32
    %0 = arith.cmpi eq, %arg0, %c0_i32 : i32
    %1 = arith.extui %0 : i1 to i32
    %c0_i32_0 = arith.constant 0 : i32
    %2 = arith.cmpi ne, %1, %c0_i32_0 : i32
    scf.if %2 {
      %c0_178 = arith.constant 0 : index
      %c0_179 = arith.constant 0 : index
      %c0_180 = arith.constant 0 : index
      %585 = vector.load %arg4[%c0_178, %c0_179, %c0_180] : memref<2x2x128xf32, #tpu.memory_space<vmem>>, vector<2x2x128xf32>
      %c0_181 = arith.constant 0 : index
      %c0_182 = arith.constant 0 : index
      %c0_183 = arith.constant 0 : index
      %586 = vector.load %arg10[%c0_181, %c0_182, %c0_183] : memref<2x2x128xf32, #tpu.memory_space<vmem>>, vector<2x2x128xf32>
      tpu.vector_store %arg10[%c0_181, %c0_182, %c0_183], %585 {strides = array<i32>} : memref<2x2x128xf32, #tpu.memory_space<vmem>>, vector<2x2x128xf32>,
      %c0_184 = arith.constant 0 : index
      %c0_185 = arith.constant 0 : index
      %c0_186 = arith.constant 0 : index
      %587 = vector.load %arg5[%c0_184, %c0_185, %c0_186] : memref<2x2x128xf32, #tpu.memory_space<vmem>>, vector<2x2x128xf32>
      %c0_187 = arith.constant 0 : index
      %c0_188 = arith.constant 0 : index
      %c0_189 = arith.constant 0 : index
      %588 = vector.load %arg11[%c0_187, %c0_188, %c0_189] : memref<2x2x128xf32, #tpu.memory_space<vmem>>, vector<2x2x128xf32>
      tpu.vector_store %arg11[%c0_187, %c0_188, %c0_189], %587 {strides = array<i32>} : memref<2x2x128xf32, #tpu.memory_space<vmem>>, vector<2x2x128xf32>,
    } else {
    }
    %c0 = arith.constant 0 : index
    %c0_1 = arith.constant 0 : index
    %c0_2 = arith.constant 0 : index
    %3 = vector.load %arg3[%c0, %c0_1, %c0_2] : memref<2x128x512xf32, #tpu.memory_space<vmem>>, vector<1x128x512xf32>
    %4 = vector.shape_cast %3 : vector<1x128x512xf32> to vector<128x512xf32>
    %c0_3 = arith.constant 0 : index
    %c0_4 = arith.constant 0 : index
    %c0_5 = arith.constant 0 : index
    %5 = vector.load %arg10[%c0_3, %c0_4, %c0_5] : memref<2x2x128xf32, #tpu.memory_space<vmem>>, vector<1x2x128xf32>
    %6 = vector.shape_cast %5 : vector<1x2x128xf32> to vector<2x128xf32>
    %c0_6 = arith.constant 0 : index
    %c0_7 = arith.constant 0 : index
    %c0_8 = arith.constant 0 : index
    %7 = vector.load %arg11[%c0_6, %c0_7, %c0_8] : memref<2x2x128xf32, #tpu.memory_space<vmem>>, vector<1x2x128xf32>
    %8 = vector.shape_cast %7 : vector<1x2x128xf32> to vector<2x128xf32>
    %c0_i32_9 = arith.constant 0 : i32
    %9 = arith.index_cast %c0_i32_9 : i32 to index
    %c0_10 = arith.constant 0 : index
    %c0_11 = arith.constant 0 : index
    %10 = vector.load %arg1[%9, %c0_10, %c0_11] : memref<8x2x512xf32, #tpu.memory_space<vmem>>, vector<1x2x512xf32>
    %11 = vector.shape_cast %10 : vector<1x2x512xf32> to vector<2x512xf32>
    %cst = arith.constant dense<0.000000e+00> : vector<2x512xf32>
    %12 = tpu.matmul %6, %4, %cst {dimension_numbers = #tpu.dot_dimension_numbers<[1], [0], [0], [1], [0, 0, 1, 1], [], []>} : vector<2x128xf32>, vector<128x512xf32>, vector<2x512xf32> -> vector<2x512xf32>
    %13 = arith.addf %11, %12 : vector<2x512xf32>
    %14 = vector.extract_strided_slice %13 {offsets = [0, 0], sizes = [2, 128], strides = [1, 1]} : vector<2x512xf32> to vector<2x128xf32>
    %15 = arith.negf %14 : vector<2x128xf32>
    %16 = math.exp %15 : vector<2x128xf32>
    %cst_12 = arith.constant 1.000000e+00 : f32
    %17 = vector.broadcast %cst_12 : f32 to vector<2x128xf32>
    %18 = arith.addf %17, %16 : vector<2x128xf32>
    %19 = arith.divf %17, %18 : vector<2x128xf32>
    %20 = vector.extract_strided_slice %13 {offsets = [0, 128], sizes = [2, 128], strides = [1, 1]} : vector<2x512xf32> to vector<2x128xf32>
    %21 = arith.negf %20 : vector<2x128xf32>
    %22 = math.exp %21 : vector<2x128xf32>
    %cst_13 = arith.constant 1.000000e+00 : f32
    %23 = vector.broadcast %cst_13 : f32 to vector<2x128xf32>
    %24 = arith.addf %23, %22 : vector<2x128xf32>
    %25 = arith.divf %23, %24 : vector<2x128xf32>
    %26 = vector.extract_strided_slice %13 {offsets = [0, 256], sizes = [2, 128], strides = [1, 1]} : vector<2x512xf32> to vector<2x128xf32>
    %27 = math.tanh %26 : vector<2x128xf32>
    %28 = vector.extract_strided_slice %13 {offsets = [0, 384], sizes = [2, 128], strides = [1, 1]} : vector<2x512xf32> to vector<2x128xf32>
    %29 = arith.negf %28 : vector<2x128xf32>
    %30 = math.exp %29 : vector<2x128xf32>
    %cst_14 = arith.constant 1.000000e+00 : f32
    %31 = vector.broadcast %cst_14 : f32 to vector<2x128xf32>
    %32 = arith.addf %31, %30 : vector<2x128xf32>
    %33 = arith.divf %31, %32 : vector<2x128xf32>
    %34 = arith.mulf %25, %8 : vector<2x128xf32>
    %35 = arith.mulf %19, %27 : vector<2x128xf32>
    %36 = arith.addf %34, %35 : vector<2x128xf32>
    %37 = math.tanh %36 : vector<2x128xf32>
    %38 = arith.mulf %33, %37 : vector<2x128xf32>
    %39 = arith.index_cast %c0_i32_9 : i32 to index
    %c0_15 = arith.constant 0 : index
    %c0_16 = arith.constant 0 : index
    %40 = vector.load %arg6[%39, %c0_15, %c0_16] : memref<8x2x128xf32, #tpu.memory_space<vmem>>, vector<1x2x128xf32>
    %41 = vector.shape_cast %40 : vector<1x2x128xf32> to vector<2x128xf32>
    %42 = vector.shape_cast %38 : vector<2x128xf32> to vector<1x2x128xf32>
    tpu.vector_store %arg6[%39, %c0_15, %c0_16], %42 {strides = array<i32>} : memref<8x2x128xf32, #tpu.memory_space<vmem>>, vector<1x2x128xf32>,
    %c1_i32 = arith.constant 1 : i32
    %43 = arith.index_cast %c1_i32 : i32 to index
    %c0_17 = arith.constant 0 : index
    %c0_18 = arith.constant 0 : index
    %44 = vector.load %arg1[%43, %c0_17, %c0_18] : memref<8x2x512xf32, #tpu.memory_space<vmem>>, vector<1x2x512xf32>
    %45 = vector.shape_cast %44 : vector<1x2x512xf32> to vector<2x512xf32>
    %cst_19 = arith.constant dense<0.000000e+00> : vector<2x512xf32>
    %46 = tpu.matmul %38, %4, %cst_19 {dimension_numbers = #tpu.dot_dimension_numbers<[1], [0], [0], [1], [0, 0, 1, 1], [], []>} : vector<2x128xf32>, vector<128x512xf32>, vector<2x512xf32> -> vector<2x512xf32>
    %47 = arith.addf %45, %46 : vector<2x512xf32>
    %48 = vector.extract_strided_slice %47 {offsets = [0, 0], sizes = [2, 128], strides = [1, 1]} : vector<2x512xf32> to vector<2x128xf32>
    %49 = arith.negf %48 : vector<2x128xf32>
    %50 = math.exp %49 : vector<2x128xf32>
    %cst_20 = arith.constant 1.000000e+00 : f32
    %51 = vector.broadcast %cst_20 : f32 to vector<2x128xf32>
    %52 = arith.addf %51, %50 : vector<2x128xf32>
    %53 = arith.divf %51, %52 : vector<2x128xf32>
    %54 = vector.extract_strided_slice %47 {offsets = [0, 128], sizes = [2, 128], strides = [1, 1]} : vector<2x512xf32> to vector<2x128xf32>
    %55 = arith.negf %54 : vector<2x128xf32>
    %56 = math.exp %55 : vector<2x128xf32>
    %cst_21 = arith.constant 1.000000e+00 : f32
    %57 = vector.broadcast %cst_21 : f32 to vector<2x128xf32>
    %58 = arith.addf %57, %56 : vector<2x128xf32>
    %59 = arith.divf %57, %58 : vector<2x128xf32>
    %60 = vector.extract_strided_slice %47 {offsets = [0, 256], sizes = [2, 128], strides = [1, 1]} : vector<2x512xf32> to vector<2x128xf32>
    %61 = math.tanh %60 : vector<2x128xf32>
    %62 = vector.extract_strided_slice %47 {offsets = [0, 384], sizes = [2, 128], strides = [1, 1]} : vector<2x512xf32> to vector<2x128xf32>
    %63 = arith.negf %62 : vector<2x128xf32>
    %64 = math.exp %63 : vector<2x128xf32>
    %cst_22 = arith.constant 1.000000e+00 : f32
    %65 = vector.broadcast %cst_22 : f32 to vector<2x128xf32>
    %66 = arith.addf %65, %64 : vector<2x128xf32>
    %67 = arith.divf %65, %66 : vector<2x128xf32>
    %68 = arith.mulf %59, %36 : vector<2x128xf32>
    %69 = arith.mulf %53, %61 : vector<2x128xf32>
    %70 = arith.addf %68, %69 : vector<2x128xf32>
    %71 = math.tanh %70 : vector<2x128xf32>
    %72 = arith.mulf %67, %71 : vector<2x128xf32>
    %73 = arith.index_cast %c1_i32 : i32 to index
    %c0_23 = arith.constant 0 : index
    %c0_24 = arith.constant 0 : index
    %74 = vector.load %arg6[%73, %c0_23, %c0_24] : memref<8x2x128xf32, #tpu.memory_space<vmem>>, vector<1x2x128xf32>
    %75 = vector.shape_cast %74 : vector<1x2x128xf32> to vector<2x128xf32>
    %76 = vector.shape_cast %72 : vector<2x128xf32> to vector<1x2x128xf32>
    tpu.vector_store %arg6[%73, %c0_23, %c0_24], %76 {strides = array<i32>} : memref<8x2x128xf32, #tpu.memory_space<vmem>>, vector<1x2x128xf32>,
    %c2_i32 = arith.constant 2 : i32
    %77 = arith.index_cast %c2_i32 : i32 to index
    %c0_25 = arith.constant 0 : index
    %c0_26 = arith.constant 0 : index
    %78 = vector.load %arg1[%77, %c0_25, %c0_26] : memref<8x2x512xf32, #tpu.memory_space<vmem>>, vector<1x2x512xf32>
    %79 = vector.shape_cast %78 : vector<1x2x512xf32> to vector<2x512xf32>
    %cst_27 = arith.constant dense<0.000000e+00> : vector<2x512xf32>
    %80 = tpu.matmul %72, %4, %cst_27 {dimension_numbers = #tpu.dot_dimension_numbers<[1], [0], [0], [1], [0, 0, 1, 1], [], []>} : vector<2x128xf32>, vector<128x512xf32>, vector<2x512xf32> -> vector<2x512xf32>
    %81 = arith.addf %79, %80 : vector<2x512xf32>
    %82 = vector.extract_strided_slice %81 {offsets = [0, 0], sizes = [2, 128], strides = [1, 1]} : vector<2x512xf32> to vector<2x128xf32>
    %83 = arith.negf %82 : vector<2x128xf32>
    %84 = math.exp %83 : vector<2x128xf32>
    %cst_28 = arith.constant 1.000000e+00 : f32
    %85 = vector.broadcast %cst_28 : f32 to vector<2x128xf32>
    %86 = arith.addf %85, %84 : vector<2x128xf32>
    %87 = arith.divf %85, %86 : vector<2x128xf32>
    %88 = vector.extract_strided_slice %81 {offsets = [0, 128], sizes = [2, 128], strides = [1, 1]} : vector<2x512xf32> to vector<2x128xf32>
    %89 = arith.negf %88 : vector<2x128xf32>
    %90 = math.exp %89 : vector<2x128xf32>
    %cst_29 = arith.constant 1.000000e+00 : f32
    %91 = vector.broadcast %cst_29 : f32 to vector<2x128xf32>
    %92 = arith.addf %91, %90 : vector<2x128xf32>
    %93 = arith.divf %91, %92 : vector<2x128xf32>
    %94 = vector.extract_strided_slice %81 {offsets = [0, 256], sizes = [2, 128], strides = [1, 1]} : vector<2x512xf32> to vector<2x128xf32>
    %95 = math.tanh %94 : vector<2x128xf32>
    %96 = vector.extract_strided_slice %81 {offsets = [0, 384], sizes = [2, 128], strides = [1, 1]} : vector<2x512xf32> to vector<2x128xf32>
    %97 = arith.negf %96 : vector<2x128xf32>
    %98 = math.exp %97 : vector<2x128xf32>
    %cst_30 = arith.constant 1.000000e+00 : f32
    %99 = vector.broadcast %cst_30 : f32 to vector<2x128xf32>
    %100 = arith.addf %99, %98 : vector<2x128xf32>
    %101 = arith.divf %99, %100 : vector<2x128xf32>
    %102 = arith.mulf %93, %70 : vector<2x128xf32>
    %103 = arith.mulf %87, %95 : vector<2x128xf32>
    %104 = arith.addf %102, %103 : vector<2x128xf32>
    %105 = math.tanh %104 : vector<2x128xf32>
    %106 = arith.mulf %101, %105 : vector<2x128xf32>
    %107 = arith.index_cast %c2_i32 : i32 to index
    %c0_31 = arith.constant 0 : index
    %c0_32 = arith.constant 0 : index
    %108 = vector.load %arg6[%107, %c0_31, %c0_32] : memref<8x2x128xf32, #tpu.memory_space<vmem>>, vector<1x2x128xf32>
    %109 = vector.shape_cast %108 : vector<1x2x128xf32> to vector<2x128xf32>
    %110 = vector.shape_cast %106 : vector<2x128xf32> to vector<1x2x128xf32>
    tpu.vector_store %arg6[%107, %c0_31, %c0_32], %110 {strides = array<i32>} : memref<8x2x128xf32, #tpu.memory_space<vmem>>, vector<1x2x128xf32>,
    %c3_i32 = arith.constant 3 : i32
    %111 = arith.index_cast %c3_i32 : i32 to index
    %c0_33 = arith.constant 0 : index
    %c0_34 = arith.constant 0 : index
    %112 = vector.load %arg1[%111, %c0_33, %c0_34] : memref<8x2x512xf32, #tpu.memory_space<vmem>>, vector<1x2x512xf32>
    %113 = vector.shape_cast %112 : vector<1x2x512xf32> to vector<2x512xf32>
    %cst_35 = arith.constant dense<0.000000e+00> : vector<2x512xf32>
    %114 = tpu.matmul %106, %4, %cst_35 {dimension_numbers = #tpu.dot_dimension_numbers<[1], [0], [0], [1], [0, 0, 1, 1], [], []>} : vector<2x128xf32>, vector<128x512xf32>, vector<2x512xf32> -> vector<2x512xf32>
    %115 = arith.addf %113, %114 : vector<2x512xf32>
    %116 = vector.extract_strided_slice %115 {offsets = [0, 0], sizes = [2, 128], strides = [1, 1]} : vector<2x512xf32> to vector<2x128xf32>
    %117 = arith.negf %116 : vector<2x128xf32>
    %118 = math.exp %117 : vector<2x128xf32>
    %cst_36 = arith.constant 1.000000e+00 : f32
    %119 = vector.broadcast %cst_36 : f32 to vector<2x128xf32>
    %120 = arith.addf %119, %118 : vector<2x128xf32>
    %121 = arith.divf %119, %120 : vector<2x128xf32>
    %122 = vector.extract_strided_slice %115 {offsets = [0, 128], sizes = [2, 128], strides = [1, 1]} : vector<2x512xf32> to vector<2x128xf32>
    %123 = arith.negf %122 : vector<2x128xf32>
    %124 = math.exp %123 : vector<2x128xf32>
    %cst_37 = arith.constant 1.000000e+00 : f32
    %125 = vector.broadcast %cst_37 : f32 to vector<2x128xf32>
    %126 = arith.addf %125, %124 : vector<2x128xf32>
    %127 = arith.divf %125, %126 : vector<2x128xf32>
    %128 = vector.extract_strided_slice %115 {offsets = [0, 256], sizes = [2, 128], strides = [1, 1]} : vector<2x512xf32> to vector<2x128xf32>
    %129 = math.tanh %128 : vector<2x128xf32>
    %130 = vector.extract_strided_slice %115 {offsets = [0, 384], sizes = [2, 128], strides = [1, 1]} : vector<2x512xf32> to vector<2x128xf32>
    %131 = arith.negf %130 : vector<2x128xf32>
    %132 = math.exp %131 : vector<2x128xf32>
    %cst_38 = arith.constant 1.000000e+00 : f32
    %133 = vector.broadcast %cst_38 : f32 to vector<2x128xf32>
    %134 = arith.addf %133, %132 : vector<2x128xf32>
    %135 = arith.divf %133, %134 : vector<2x128xf32>
    %136 = arith.mulf %127, %104 : vector<2x128xf32>
    %137 = arith.mulf %121, %129 : vector<2x128xf32>
    %138 = arith.addf %136, %137 : vector<2x128xf32>
    %139 = math.tanh %138 : vector<2x128xf32>
    %140 = arith.mulf %135, %139 : vector<2x128xf32>
    %141 = arith.index_cast %c3_i32 : i32 to index
    %c0_39 = arith.constant 0 : index
    %c0_40 = arith.constant 0 : index
    %142 = vector.load %arg6[%141, %c0_39, %c0_40] : memref<8x2x128xf32, #tpu.memory_space<vmem>>, vector<1x2x128xf32>
    %143 = vector.shape_cast %142 : vector<1x2x128xf32> to vector<2x128xf32>
    %144 = vector.shape_cast %140 : vector<2x128xf32> to vector<1x2x128xf32>
    tpu.vector_store %arg6[%141, %c0_39, %c0_40], %144 {strides = array<i32>} : memref<8x2x128xf32, #tpu.memory_space<vmem>>, vector<1x2x128xf32>,
    %c4_i32 = arith.constant 4 : i32
    %145 = arith.index_cast %c4_i32 : i32 to index
    %c0_41 = arith.constant 0 : index
    %c0_42 = arith.constant 0 : index
    %146 = vector.load %arg1[%145, %c0_41, %c0_42] : memref<8x2x512xf32, #tpu.memory_space<vmem>>, vector<1x2x512xf32>
    %147 = vector.shape_cast %146 : vector<1x2x512xf32> to vector<2x512xf32>
    %cst_43 = arith.constant dense<0.000000e+00> : vector<2x512xf32>
    %148 = tpu.matmul %140, %4, %cst_43 {dimension_numbers = #tpu.dot_dimension_numbers<[1], [0], [0], [1], [0, 0, 1, 1], [], []>} : vector<2x128xf32>, vector<128x512xf32>, vector<2x512xf32> -> vector<2x512xf32>
    %149 = arith.addf %147, %148 : vector<2x512xf32>
    %150 = vector.extract_strided_slice %149 {offsets = [0, 0], sizes = [2, 128], strides = [1, 1]} : vector<2x512xf32> to vector<2x128xf32>
    %151 = arith.negf %150 : vector<2x128xf32>
    %152 = math.exp %151 : vector<2x128xf32>
    %cst_44 = arith.constant 1.000000e+00 : f32
    %153 = vector.broadcast %cst_44 : f32 to vector<2x128xf32>
    %154 = arith.addf %153, %152 : vector<2x128xf32>
    %155 = arith.divf %153, %154 : vector<2x128xf32>
    %156 = vector.extract_strided_slice %149 {offsets = [0, 128], sizes = [2, 128], strides = [1, 1]} : vector<2x512xf32> to vector<2x128xf32>
    %157 = arith.negf %156 : vector<2x128xf32>
    %158 = math.exp %157 : vector<2x128xf32>
    %cst_45 = arith.constant 1.000000e+00 : f32
    %159 = vector.broadcast %cst_45 : f32 to vector<2x128xf32>
    %160 = arith.addf %159, %158 : vector<2x128xf32>
    %161 = arith.divf %159, %160 : vector<2x128xf32>
    %162 = vector.extract_strided_slice %149 {offsets = [0, 256], sizes = [2, 128], strides = [1, 1]} : vector<2x512xf32> to vector<2x128xf32>
    %163 = math.tanh %162 : vector<2x128xf32>
    %164 = vector.extract_strided_slice %149 {offsets = [0, 384], sizes = [2, 128], strides = [1, 1]} : vector<2x512xf32> to vector<2x128xf32>
    %165 = arith.negf %164 : vector<2x128xf32>
    %166 = math.exp %165 : vector<2x128xf32>
    %cst_46 = arith.constant 1.000000e+00 : f32
    %167 = vector.broadcast %cst_46 : f32 to vector<2x128xf32>
    %168 = arith.addf %167, %166 : vector<2x128xf32>
    %169 = arith.divf %167, %168 : vector<2x128xf32>
    %170 = arith.mulf %161, %138 : vector<2x128xf32>
    %171 = arith.mulf %155, %163 : vector<2x128xf32>
    %172 = arith.addf %170, %171 : vector<2x128xf32>
    %173 = math.tanh %172 : vector<2x128xf32>
    %174 = arith.mulf %169, %173 : vector<2x128xf32>
    %175 = arith.index_cast %c4_i32 : i32 to index
    %c0_47 = arith.constant 0 : index
    %c0_48 = arith.constant 0 : index
    %176 = vector.load %arg6[%175, %c0_47, %c0_48] : memref<8x2x128xf32, #tpu.memory_space<vmem>>, vector<1x2x128xf32>
    %177 = vector.shape_cast %176 : vector<1x2x128xf32> to vector<2x128xf32>
    %178 = vector.shape_cast %174 : vector<2x128xf32> to vector<1x2x128xf32>
    tpu.vector_store %arg6[%175, %c0_47, %c0_48], %178 {strides = array<i32>} : memref<8x2x128xf32, #tpu.memory_space<vmem>>, vector<1x2x128xf32>,
    %c5_i32 = arith.constant 5 : i32
    %179 = arith.index_cast %c5_i32 : i32 to index
    %c0_49 = arith.constant 0 : index
    %c0_50 = arith.constant 0 : index
    %180 = vector.load %arg1[%179, %c0_49, %c0_50] : memref<8x2x512xf32, #tpu.memory_space<vmem>>, vector<1x2x512xf32>
    %181 = vector.shape_cast %180 : vector<1x2x512xf32> to vector<2x512xf32>
    %cst_51 = arith.constant dense<0.000000e+00> : vector<2x512xf32>
    %182 = tpu.matmul %174, %4, %cst_51 {dimension_numbers = #tpu.dot_dimension_numbers<[1], [0], [0], [1], [0, 0, 1, 1], [], []>} : vector<2x128xf32>, vector<128x512xf32>, vector<2x512xf32> -> vector<2x512xf32>
    %183 = arith.addf %181, %182 : vector<2x512xf32>
    %184 = vector.extract_strided_slice %183 {offsets = [0, 0], sizes = [2, 128], strides = [1, 1]} : vector<2x512xf32> to vector<2x128xf32>
    %185 = arith.negf %184 : vector<2x128xf32>
    %186 = math.exp %185 : vector<2x128xf32>
    %cst_52 = arith.constant 1.000000e+00 : f32
    %187 = vector.broadcast %cst_52 : f32 to vector<2x128xf32>
    %188 = arith.addf %187, %186 : vector<2x128xf32>
    %189 = arith.divf %187, %188 : vector<2x128xf32>
    %190 = vector.extract_strided_slice %183 {offsets = [0, 128], sizes = [2, 128], strides = [1, 1]} : vector<2x512xf32> to vector<2x128xf32>
    %191 = arith.negf %190 : vector<2x128xf32>
    %192 = math.exp %191 : vector<2x128xf32>
    %cst_53 = arith.constant 1.000000e+00 : f32
    %193 = vector.broadcast %cst_53 : f32 to vector<2x128xf32>
    %194 = arith.addf %193, %192 : vector<2x128xf32>
    %195 = arith.divf %193, %194 : vector<2x128xf32>
    %196 = vector.extract_strided_slice %183 {offsets = [0, 256], sizes = [2, 128], strides = [1, 1]} : vector<2x512xf32> to vector<2x128xf32>
    %197 = math.tanh %196 : vector<2x128xf32>
    %198 = vector.extract_strided_slice %183 {offsets = [0, 384], sizes = [2, 128], strides = [1, 1]} : vector<2x512xf32> to vector<2x128xf32>
    %199 = arith.negf %198 : vector<2x128xf32>
    %200 = math.exp %199 : vector<2x128xf32>
    %cst_54 = arith.constant 1.000000e+00 : f32
    %201 = vector.broadcast %cst_54 : f32 to vector<2x128xf32>
    %202 = arith.addf %201, %200 : vector<2x128xf32>
    %203 = arith.divf %201, %202 : vector<2x128xf32>
    %204 = arith.mulf %195, %172 : vector<2x128xf32>
    %205 = arith.mulf %189, %197 : vector<2x128xf32>
    %206 = arith.addf %204, %205 : vector<2x128xf32>
    %207 = math.tanh %206 : vector<2x128xf32>
    %208 = arith.mulf %203, %207 : vector<2x128xf32>
    %209 = arith.index_cast %c5_i32 : i32 to index
    %c0_55 = arith.constant 0 : index
    %c0_56 = arith.constant 0 : index
    %210 = vector.load %arg6[%209, %c0_55, %c0_56] : memref<8x2x128xf32, #tpu.memory_space<vmem>>, vector<1x2x128xf32>
    %211 = vector.shape_cast %210 : vector<1x2x128xf32> to vector<2x128xf32>
    %212 = vector.shape_cast %208 : vector<2x128xf32> to vector<1x2x128xf32>
    tpu.vector_store %arg6[%209, %c0_55, %c0_56], %212 {strides = array<i32>} : memref<8x2x128xf32, #tpu.memory_space<vmem>>, vector<1x2x128xf32>,
    %c6_i32 = arith.constant 6 : i32
    %213 = arith.index_cast %c6_i32 : i32 to index
    %c0_57 = arith.constant 0 : index
    %c0_58 = arith.constant 0 : index
    %214 = vector.load %arg1[%213, %c0_57, %c0_58] : memref<8x2x512xf32, #tpu.memory_space<vmem>>, vector<1x2x512xf32>
    %215 = vector.shape_cast %214 : vector<1x2x512xf32> to vector<2x512xf32>
    %cst_59 = arith.constant dense<0.000000e+00> : vector<2x512xf32>
    %216 = tpu.matmul %208, %4, %cst_59 {dimension_numbers = #tpu.dot_dimension_numbers<[1], [0], [0], [1], [0, 0, 1, 1], [], []>} : vector<2x128xf32>, vector<128x512xf32>, vector<2x512xf32> -> vector<2x512xf32>
    %217 = arith.addf %215, %216 : vector<2x512xf32>
    %218 = vector.extract_strided_slice %217 {offsets = [0, 0], sizes = [2, 128], strides = [1, 1]} : vector<2x512xf32> to vector<2x128xf32>
    %219 = arith.negf %218 : vector<2x128xf32>
    %220 = math.exp %219 : vector<2x128xf32>
    %cst_60 = arith.constant 1.000000e+00 : f32
    %221 = vector.broadcast %cst_60 : f32 to vector<2x128xf32>
    %222 = arith.addf %221, %220 : vector<2x128xf32>
    %223 = arith.divf %221, %222 : vector<2x128xf32>
    %224 = vector.extract_strided_slice %217 {offsets = [0, 128], sizes = [2, 128], strides = [1, 1]} : vector<2x512xf32> to vector<2x128xf32>
    %225 = arith.negf %224 : vector<2x128xf32>
    %226 = math.exp %225 : vector<2x128xf32>
    %cst_61 = arith.constant 1.000000e+00 : f32
    %227 = vector.broadcast %cst_61 : f32 to vector<2x128xf32>
    %228 = arith.addf %227, %226 : vector<2x128xf32>
    %229 = arith.divf %227, %228 : vector<2x128xf32>
    %230 = vector.extract_strided_slice %217 {offsets = [0, 256], sizes = [2, 128], strides = [1, 1]} : vector<2x512xf32> to vector<2x128xf32>
    %231 = math.tanh %230 : vector<2x128xf32>
    %232 = vector.extract_strided_slice %217 {offsets = [0, 384], sizes = [2, 128], strides = [1, 1]} : vector<2x512xf32> to vector<2x128xf32>
    %233 = arith.negf %232 : vector<2x128xf32>
    %234 = math.exp %233 : vector<2x128xf32>
    %cst_62 = arith.constant 1.000000e+00 : f32
    %235 = vector.broadcast %cst_62 : f32 to vector<2x128xf32>
    %236 = arith.addf %235, %234 : vector<2x128xf32>
    %237 = arith.divf %235, %236 : vector<2x128xf32>
    %238 = arith.mulf %229, %206 : vector<2x128xf32>
    %239 = arith.mulf %223, %231 : vector<2x128xf32>
    %240 = arith.addf %238, %239 : vector<2x128xf32>
    %241 = math.tanh %240 : vector<2x128xf32>
    %242 = arith.mulf %237, %241 : vector<2x128xf32>
    %243 = arith.index_cast %c6_i32 : i32 to index
    %c0_63 = arith.constant 0 : index
    %c0_64 = arith.constant 0 : index
    %244 = vector.load %arg6[%243, %c0_63, %c0_64] : memref<8x2x128xf32, #tpu.memory_space<vmem>>, vector<1x2x128xf32>
    %245 = vector.shape_cast %244 : vector<1x2x128xf32> to vector<2x128xf32>
    %246 = vector.shape_cast %242 : vector<2x128xf32> to vector<1x2x128xf32>
    tpu.vector_store %arg6[%243, %c0_63, %c0_64], %246 {strides = array<i32>} : memref<8x2x128xf32, #tpu.memory_space<vmem>>, vector<1x2x128xf32>,
    %c7_i32 = arith.constant 7 : i32
    %247 = arith.index_cast %c7_i32 : i32 to index
    %c0_65 = arith.constant 0 : index
    %c0_66 = arith.constant 0 : index
    %248 = vector.load %arg1[%247, %c0_65, %c0_66] : memref<8x2x512xf32, #tpu.memory_space<vmem>>, vector<1x2x512xf32>
    %249 = vector.shape_cast %248 : vector<1x2x512xf32> to vector<2x512xf32>
    %cst_67 = arith.constant dense<0.000000e+00> : vector<2x512xf32>
    %250 = tpu.matmul %242, %4, %cst_67 {dimension_numbers = #tpu.dot_dimension_numbers<[1], [0], [0], [1], [0, 0, 1, 1], [], []>} : vector<2x128xf32>, vector<128x512xf32>, vector<2x512xf32> -> vector<2x512xf32>
    %251 = arith.addf %249, %250 : vector<2x512xf32>
    %252 = vector.extract_strided_slice %251 {offsets = [0, 0], sizes = [2, 128], strides = [1, 1]} : vector<2x512xf32> to vector<2x128xf32>
    %253 = arith.negf %252 : vector<2x128xf32>
    %254 = math.exp %253 : vector<2x128xf32>
    %cst_68 = arith.constant 1.000000e+00 : f32
    %255 = vector.broadcast %cst_68 : f32 to vector<2x128xf32>
    %256 = arith.addf %255, %254 : vector<2x128xf32>
    %257 = arith.divf %255, %256 : vector<2x128xf32>
    %258 = vector.extract_strided_slice %251 {offsets = [0, 128], sizes = [2, 128], strides = [1, 1]} : vector<2x512xf32> to vector<2x128xf32>
    %259 = arith.negf %258 : vector<2x128xf32>
    %260 = math.exp %259 : vector<2x128xf32>
    %cst_69 = arith.constant 1.000000e+00 : f32
    %261 = vector.broadcast %cst_69 : f32 to vector<2x128xf32>
    %262 = arith.addf %261, %260 : vector<2x128xf32>
    %263 = arith.divf %261, %262 : vector<2x128xf32>
    %264 = vector.extract_strided_slice %251 {offsets = [0, 256], sizes = [2, 128], strides = [1, 1]} : vector<2x512xf32> to vector<2x128xf32>
    %265 = math.tanh %264 : vector<2x128xf32>
    %266 = vector.extract_strided_slice %251 {offsets = [0, 384], sizes = [2, 128], strides = [1, 1]} : vector<2x512xf32> to vector<2x128xf32>
    %267 = arith.negf %266 : vector<2x128xf32>
    %268 = math.exp %267 : vector<2x128xf32>
    %cst_70 = arith.constant 1.000000e+00 : f32
    %269 = vector.broadcast %cst_70 : f32 to vector<2x128xf32>
    %270 = arith.addf %269, %268 : vector<2x128xf32>
    %271 = arith.divf %269, %270 : vector<2x128xf32>
    %272 = arith.mulf %263, %240 : vector<2x128xf32>
    %273 = arith.mulf %257, %265 : vector<2x128xf32>
    %274 = arith.addf %272, %273 : vector<2x128xf32>
    %275 = math.tanh %274 : vector<2x128xf32>
    %276 = arith.mulf %271, %275 : vector<2x128xf32>
    %277 = arith.index_cast %c7_i32 : i32 to index
    %c0_71 = arith.constant 0 : index
    %c0_72 = arith.constant 0 : index
    %278 = vector.load %arg6[%277, %c0_71, %c0_72] : memref<8x2x128xf32, #tpu.memory_space<vmem>>, vector<1x2x128xf32>
    %279 = vector.shape_cast %278 : vector<1x2x128xf32> to vector<2x128xf32>
    %280 = vector.shape_cast %276 : vector<2x128xf32> to vector<1x2x128xf32>
    tpu.vector_store %arg6[%277, %c0_71, %c0_72], %280 {strides = array<i32>} : memref<8x2x128xf32, #tpu.memory_space<vmem>>, vector<1x2x128xf32>,
    %c8_i32 = arith.constant 8 : i32
    %c0_73 = arith.constant 0 : index
    %c0_74 = arith.constant 0 : index
    %c0_75 = arith.constant 0 : index
    %281 = vector.load %arg10[%c0_73, %c0_74, %c0_75] : memref<2x2x128xf32, #tpu.memory_space<vmem>>, vector<1x2x128xf32>
    %282 = vector.shape_cast %281 : vector<1x2x128xf32> to vector<2x128xf32>
    %283 = vector.shape_cast %276 : vector<2x128xf32> to vector<1x2x128xf32>
    tpu.vector_store %arg10[%c0_73, %c0_74, %c0_75], %283 {strides = array<i32>} : memref<2x2x128xf32, #tpu.memory_space<vmem>>, vector<1x2x128xf32>,
    %c0_76 = arith.constant 0 : index
    %c0_77 = arith.constant 0 : index
    %c0_78 = arith.constant 0 : index
    %284 = vector.load %arg11[%c0_76, %c0_77, %c0_78] : memref<2x2x128xf32, #tpu.memory_space<vmem>>, vector<1x2x128xf32>
    %285 = vector.shape_cast %284 : vector<1x2x128xf32> to vector<2x128xf32>
    %286 = vector.shape_cast %274 : vector<2x128xf32> to vector<1x2x128xf32>
    tpu.vector_store %arg11[%c0_76, %c0_77, %c0_78], %286 {strides = array<i32>} : memref<2x2x128xf32, #tpu.memory_space<vmem>>, vector<1x2x128xf32>,
    %c0_i32_79 = arith.constant 0 : i32
    %287 = arith.cmpi eq, %arg0, %c0_i32_79 : i32
    %288 = arith.extui %287 : i1 to i32
    %c0_i32_80 = arith.constant 0 : i32
    %289 = arith.cmpi ne, %288, %c0_i32_80 : i32
    scf.if %289 {
      %c0_178 = arith.constant 0 : index
      %c0_179 = arith.constant 0 : index
      %c0_180 = arith.constant 0 : index
      %585 = vector.load %arg8[%c0_178, %c0_179, %c0_180] : memref<2x2x128xf32, #tpu.memory_space<vmem>>, vector<1x2x128xf32>
      %586 = vector.shape_cast %585 : vector<1x2x128xf32> to vector<2x128xf32>
      %587 = vector.shape_cast %276 : vector<2x128xf32> to vector<1x2x128xf32>
      tpu.vector_store %arg8[%c0_178, %c0_179, %c0_180], %587 {strides = array<i32>} : memref<2x2x128xf32, #tpu.memory_space<vmem>>, vector<1x2x128xf32>,
      %c0_181 = arith.constant 0 : index
      %c0_182 = arith.constant 0 : index
      %c0_183 = arith.constant 0 : index
      %588 = vector.load %arg9[%c0_181, %c0_182, %c0_183] : memref<2x2x128xf32, #tpu.memory_space<vmem>>, vector<1x2x128xf32>
      %589 = vector.shape_cast %588 : vector<1x2x128xf32> to vector<2x128xf32>
      %590 = vector.shape_cast %274 : vector<2x128xf32> to vector<1x2x128xf32>
      tpu.vector_store %arg9[%c0_181, %c0_182, %c0_183], %590 {strides = array<i32>} : memref<2x2x128xf32, #tpu.memory_space<vmem>>, vector<1x2x128xf32>,
    } else {
    }
    %c1 = arith.constant 1 : index
    %c0_81 = arith.constant 0 : index
    %c0_82 = arith.constant 0 : index
    %290 = vector.load %arg3[%c1, %c0_81, %c0_82] : memref<2x128x512xf32, #tpu.memory_space<vmem>>, vector<1x128x512xf32>
    %291 = vector.shape_cast %290 : vector<1x128x512xf32> to vector<128x512xf32>
    %c1_83 = arith.constant 1 : index
    %c0_84 = arith.constant 0 : index
    %c0_85 = arith.constant 0 : index
    %292 = vector.load %arg10[%c1_83, %c0_84, %c0_85] : memref<2x2x128xf32, #tpu.memory_space<vmem>>, vector<1x2x128xf32>
    %293 = vector.shape_cast %292 : vector<1x2x128xf32> to vector<2x128xf32>
    %c1_86 = arith.constant 1 : index
    %c0_87 = arith.constant 0 : index
    %c0_88 = arith.constant 0 : index
    %294 = vector.load %arg11[%c1_86, %c0_87, %c0_88] : memref<2x2x128xf32, #tpu.memory_space<vmem>>, vector<1x2x128xf32>
    %295 = vector.shape_cast %294 : vector<1x2x128xf32> to vector<2x128xf32>
    %c0_i32_89 = arith.constant 0 : i32
    %c7_i32_90 = arith.constant 7 : i32
    %296 = arith.subi %c7_i32_90, %c0_i32_89 : i32
    %297 = arith.index_cast %296 : i32 to index
    %c0_91 = arith.constant 0 : index
    %c0_92 = arith.constant 0 : index
    %298 = vector.load %arg2[%297, %c0_91, %c0_92] : memref<8x2x512xf32, #tpu.memory_space<vmem>>, vector<1x2x512xf32>
    %299 = vector.shape_cast %298 : vector<1x2x512xf32> to vector<2x512xf32>
    %cst_93 = arith.constant dense<0.000000e+00> : vector<2x512xf32>
    %300 = tpu.matmul %293, %291, %cst_93 {dimension_numbers = #tpu.dot_dimension_numbers<[1], [0], [0], [1], [0, 0, 1, 1], [], []>} : vector<2x128xf32>, vector<128x512xf32>, vector<2x512xf32> -> vector<2x512xf32>
    %301 = arith.addf %299, %300 : vector<2x512xf32>
    %302 = vector.extract_strided_slice %301 {offsets = [0, 0], sizes = [2, 128], strides = [1, 1]} : vector<2x512xf32> to vector<2x128xf32>
    %303 = arith.negf %302 : vector<2x128xf32>
    %304 = math.exp %303 : vector<2x128xf32>
    %cst_94 = arith.constant 1.000000e+00 : f32
    %305 = vector.broadcast %cst_94 : f32 to vector<2x128xf32>
    %306 = arith.addf %305, %304 : vector<2x128xf32>
    %307 = arith.divf %305, %306 : vector<2x128xf32>
    %308 = vector.extract_strided_slice %301 {offsets = [0, 128], sizes = [2, 128], strides = [1, 1]} : vector<2x512xf32> to vector<2x128xf32>
    %309 = arith.negf %308 : vector<2x128xf32>
    %310 = math.exp %309 : vector<2x128xf32>
    %cst_95 = arith.constant 1.000000e+00 : f32
    %311 = vector.broadcast %cst_95 : f32 to vector<2x128xf32>
    %312 = arith.addf %311, %310 : vector<2x128xf32>
    %313 = arith.divf %311, %312 : vector<2x128xf32>
    %314 = vector.extract_strided_slice %301 {offsets = [0, 256], sizes = [2, 128], strides = [1, 1]} : vector<2x512xf32> to vector<2x128xf32>
    %315 = math.tanh %314 : vector<2x128xf32>
    %316 = vector.extract_strided_slice %301 {offsets = [0, 384], sizes = [2, 128], strides = [1, 1]} : vector<2x512xf32> to vector<2x128xf32>
    %317 = arith.negf %316 : vector<2x128xf32>
    %318 = math.exp %317 : vector<2x128xf32>
    %cst_96 = arith.constant 1.000000e+00 : f32
    %319 = vector.broadcast %cst_96 : f32 to vector<2x128xf32>
    %320 = arith.addf %319, %318 : vector<2x128xf32>
    %321 = arith.divf %319, %320 : vector<2x128xf32>
    %322 = arith.mulf %313, %295 : vector<2x128xf32>
    %323 = arith.mulf %307, %315 : vector<2x128xf32>
    %324 = arith.addf %322, %323 : vector<2x128xf32>
    %325 = math.tanh %324 : vector<2x128xf32>
    %326 = arith.mulf %321, %325 : vector<2x128xf32>
    %327 = arith.index_cast %296 : i32 to index
    %c0_97 = arith.constant 0 : index
    %c0_98 = arith.constant 0 : index
    %328 = vector.load %arg7[%327, %c0_97, %c0_98] : memref<8x2x128xf32, #tpu.memory_space<vmem>>, vector<1x2x128xf32>
    %329 = vector.shape_cast %328 : vector<1x2x128xf32> to vector<2x128xf32>
    %330 = vector.shape_cast %326 : vector<2x128xf32> to vector<1x2x128xf32>
    tpu.vector_store %arg7[%327, %c0_97, %c0_98], %330 {strides = array<i32>} : memref<8x2x128xf32, #tpu.memory_space<vmem>>, vector<1x2x128xf32>,
    %c1_i32_99 = arith.constant 1 : i32
    %c7_i32_100 = arith.constant 7 : i32
    %331 = arith.subi %c7_i32_100, %c1_i32_99 : i32
    %332 = arith.index_cast %331 : i32 to index
    %c0_101 = arith.constant 0 : index
    %c0_102 = arith.constant 0 : index
    %333 = vector.load %arg2[%332, %c0_101, %c0_102] : memref<8x2x512xf32, #tpu.memory_space<vmem>>, vector<1x2x512xf32>
    %334 = vector.shape_cast %333 : vector<1x2x512xf32> to vector<2x512xf32>
    %cst_103 = arith.constant dense<0.000000e+00> : vector<2x512xf32>
    %335 = tpu.matmul %326, %291, %cst_103 {dimension_numbers = #tpu.dot_dimension_numbers<[1], [0], [0], [1], [0, 0, 1, 1], [], []>} : vector<2x128xf32>, vector<128x512xf32>, vector<2x512xf32> -> vector<2x512xf32>
    %336 = arith.addf %334, %335 : vector<2x512xf32>
    %337 = vector.extract_strided_slice %336 {offsets = [0, 0], sizes = [2, 128], strides = [1, 1]} : vector<2x512xf32> to vector<2x128xf32>
    %338 = arith.negf %337 : vector<2x128xf32>
    %339 = math.exp %338 : vector<2x128xf32>
    %cst_104 = arith.constant 1.000000e+00 : f32
    %340 = vector.broadcast %cst_104 : f32 to vector<2x128xf32>
    %341 = arith.addf %340, %339 : vector<2x128xf32>
    %342 = arith.divf %340, %341 : vector<2x128xf32>
    %343 = vector.extract_strided_slice %336 {offsets = [0, 128], sizes = [2, 128], strides = [1, 1]} : vector<2x512xf32> to vector<2x128xf32>
    %344 = arith.negf %343 : vector<2x128xf32>
    %345 = math.exp %344 : vector<2x128xf32>
    %cst_105 = arith.constant 1.000000e+00 : f32
    %346 = vector.broadcast %cst_105 : f32 to vector<2x128xf32>
    %347 = arith.addf %346, %345 : vector<2x128xf32>
    %348 = arith.divf %346, %347 : vector<2x128xf32>
    %349 = vector.extract_strided_slice %336 {offsets = [0, 256], sizes = [2, 128], strides = [1, 1]} : vector<2x512xf32> to vector<2x128xf32>
    %350 = math.tanh %349 : vector<2x128xf32>
    %351 = vector.extract_strided_slice %336 {offsets = [0, 384], sizes = [2, 128], strides = [1, 1]} : vector<2x512xf32> to vector<2x128xf32>
    %352 = arith.negf %351 : vector<2x128xf32>
    %353 = math.exp %352 : vector<2x128xf32>
    %cst_106 = arith.constant 1.000000e+00 : f32
    %354 = vector.broadcast %cst_106 : f32 to vector<2x128xf32>
    %355 = arith.addf %354, %353 : vector<2x128xf32>
    %356 = arith.divf %354, %355 : vector<2x128xf32>
    %357 = arith.mulf %348, %324 : vector<2x128xf32>
    %358 = arith.mulf %342, %350 : vector<2x128xf32>
    %359 = arith.addf %357, %358 : vector<2x128xf32>
    %360 = math.tanh %359 : vector<2x128xf32>
    %361 = arith.mulf %356, %360 : vector<2x128xf32>
    %362 = arith.index_cast %331 : i32 to index
    %c0_107 = arith.constant 0 : index
    %c0_108 = arith.constant 0 : index
    %363 = vector.load %arg7[%362, %c0_107, %c0_108] : memref<8x2x128xf32, #tpu.memory_space<vmem>>, vector<1x2x128xf32>
    %364 = vector.shape_cast %363 : vector<1x2x128xf32> to vector<2x128xf32>
    %365 = vector.shape_cast %361 : vector<2x128xf32> to vector<1x2x128xf32>
    tpu.vector_store %arg7[%362, %c0_107, %c0_108], %365 {strides = array<i32>} : memref<8x2x128xf32, #tpu.memory_space<vmem>>, vector<1x2x128xf32>,
    %c2_i32_109 = arith.constant 2 : i32
    %c7_i32_110 = arith.constant 7 : i32
    %366 = arith.subi %c7_i32_110, %c2_i32_109 : i32
    %367 = arith.index_cast %366 : i32 to index
    %c0_111 = arith.constant 0 : index
    %c0_112 = arith.constant 0 : index
    %368 = vector.load %arg2[%367, %c0_111, %c0_112] : memref<8x2x512xf32, #tpu.memory_space<vmem>>, vector<1x2x512xf32>
    %369 = vector.shape_cast %368 : vector<1x2x512xf32> to vector<2x512xf32>
    %cst_113 = arith.constant dense<0.000000e+00> : vector<2x512xf32>
    %370 = tpu.matmul %361, %291, %cst_113 {dimension_numbers = #tpu.dot_dimension_numbers<[1], [0], [0], [1], [0, 0, 1, 1], [], []>} : vector<2x128xf32>, vector<128x512xf32>, vector<2x512xf32> -> vector<2x512xf32>
    %371 = arith.addf %369, %370 : vector<2x512xf32>
    %372 = vector.extract_strided_slice %371 {offsets = [0, 0], sizes = [2, 128], strides = [1, 1]} : vector<2x512xf32> to vector<2x128xf32>
    %373 = arith.negf %372 : vector<2x128xf32>
    %374 = math.exp %373 : vector<2x128xf32>
    %cst_114 = arith.constant 1.000000e+00 : f32
    %375 = vector.broadcast %cst_114 : f32 to vector<2x128xf32>
    %376 = arith.addf %375, %374 : vector<2x128xf32>
    %377 = arith.divf %375, %376 : vector<2x128xf32>
    %378 = vector.extract_strided_slice %371 {offsets = [0, 128], sizes = [2, 128], strides = [1, 1]} : vector<2x512xf32> to vector<2x128xf32>
    %379 = arith.negf %378 : vector<2x128xf32>
    %380 = math.exp %379 : vector<2x128xf32>
    %cst_115 = arith.constant 1.000000e+00 : f32
    %381 = vector.broadcast %cst_115 : f32 to vector<2x128xf32>
    %382 = arith.addf %381, %380 : vector<2x128xf32>
    %383 = arith.divf %381, %382 : vector<2x128xf32>
    %384 = vector.extract_strided_slice %371 {offsets = [0, 256], sizes = [2, 128], strides = [1, 1]} : vector<2x512xf32> to vector<2x128xf32>
    %385 = math.tanh %384 : vector<2x128xf32>
    %386 = vector.extract_strided_slice %371 {offsets = [0, 384], sizes = [2, 128], strides = [1, 1]} : vector<2x512xf32> to vector<2x128xf32>
    %387 = arith.negf %386 : vector<2x128xf32>
    %388 = math.exp %387 : vector<2x128xf32>
    %cst_116 = arith.constant 1.000000e+00 : f32
    %389 = vector.broadcast %cst_116 : f32 to vector<2x128xf32>
    %390 = arith.addf %389, %388 : vector<2x128xf32>
    %391 = arith.divf %389, %390 : vector<2x128xf32>
    %392 = arith.mulf %383, %359 : vector<2x128xf32>
    %393 = arith.mulf %377, %385 : vector<2x128xf32>
    %394 = arith.addf %392, %393 : vector<2x128xf32>
    %395 = math.tanh %394 : vector<2x128xf32>
    %396 = arith.mulf %391, %395 : vector<2x128xf32>
    %397 = arith.index_cast %366 : i32 to index
    %c0_117 = arith.constant 0 : index
    %c0_118 = arith.constant 0 : index
    %398 = vector.load %arg7[%397, %c0_117, %c0_118] : memref<8x2x128xf32, #tpu.memory_space<vmem>>, vector<1x2x128xf32>
    %399 = vector.shape_cast %398 : vector<1x2x128xf32> to vector<2x128xf32>
    %400 = vector.shape_cast %396 : vector<2x128xf32> to vector<1x2x128xf32>
    tpu.vector_store %arg7[%397, %c0_117, %c0_118], %400 {strides = array<i32>} : memref<8x2x128xf32, #tpu.memory_space<vmem>>, vector<1x2x128xf32>,
    %c3_i32_119 = arith.constant 3 : i32
    %c7_i32_120 = arith.constant 7 : i32
    %401 = arith.subi %c7_i32_120, %c3_i32_119 : i32
    %402 = arith.index_cast %401 : i32 to index
    %c0_121 = arith.constant 0 : index
    %c0_122 = arith.constant 0 : index
    %403 = vector.load %arg2[%402, %c0_121, %c0_122] : memref<8x2x512xf32, #tpu.memory_space<vmem>>, vector<1x2x512xf32>
    %404 = vector.shape_cast %403 : vector<1x2x512xf32> to vector<2x512xf32>
    %cst_123 = arith.constant dense<0.000000e+00> : vector<2x512xf32>
    %405 = tpu.matmul %396, %291, %cst_123 {dimension_numbers = #tpu.dot_dimension_numbers<[1], [0], [0], [1], [0, 0, 1, 1], [], []>} : vector<2x128xf32>, vector<128x512xf32>, vector<2x512xf32> -> vector<2x512xf32>
    %406 = arith.addf %404, %405 : vector<2x512xf32>
    %407 = vector.extract_strided_slice %406 {offsets = [0, 0], sizes = [2, 128], strides = [1, 1]} : vector<2x512xf32> to vector<2x128xf32>
    %408 = arith.negf %407 : vector<2x128xf32>
    %409 = math.exp %408 : vector<2x128xf32>
    %cst_124 = arith.constant 1.000000e+00 : f32
    %410 = vector.broadcast %cst_124 : f32 to vector<2x128xf32>
    %411 = arith.addf %410, %409 : vector<2x128xf32>
    %412 = arith.divf %410, %411 : vector<2x128xf32>
    %413 = vector.extract_strided_slice %406 {offsets = [0, 128], sizes = [2, 128], strides = [1, 1]} : vector<2x512xf32> to vector<2x128xf32>
    %414 = arith.negf %413 : vector<2x128xf32>
    %415 = math.exp %414 : vector<2x128xf32>
    %cst_125 = arith.constant 1.000000e+00 : f32
    %416 = vector.broadcast %cst_125 : f32 to vector<2x128xf32>
    %417 = arith.addf %416, %415 : vector<2x128xf32>
    %418 = arith.divf %416, %417 : vector<2x128xf32>
    %419 = vector.extract_strided_slice %406 {offsets = [0, 256], sizes = [2, 128], strides = [1, 1]} : vector<2x512xf32> to vector<2x128xf32>
    %420 = math.tanh %419 : vector<2x128xf32>
    %421 = vector.extract_strided_slice %406 {offsets = [0, 384], sizes = [2, 128], strides = [1, 1]} : vector<2x512xf32> to vector<2x128xf32>
    %422 = arith.negf %421 : vector<2x128xf32>
    %423 = math.exp %422 : vector<2x128xf32>
    %cst_126 = arith.constant 1.000000e+00 : f32
    %424 = vector.broadcast %cst_126 : f32 to vector<2x128xf32>
    %425 = arith.addf %424, %423 : vector<2x128xf32>
    %426 = arith.divf %424, %425 : vector<2x128xf32>
    %427 = arith.mulf %418, %394 : vector<2x128xf32>
    %428 = arith.mulf %412, %420 : vector<2x128xf32>
    %429 = arith.addf %427, %428 : vector<2x128xf32>
    %430 = math.tanh %429 : vector<2x128xf32>
    %431 = arith.mulf %426, %430 : vector<2x128xf32>
    %432 = arith.index_cast %401 : i32 to index
    %c0_127 = arith.constant 0 : index
    %c0_128 = arith.constant 0 : index
    %433 = vector.load %arg7[%432, %c0_127, %c0_128] : memref<8x2x128xf32, #tpu.memory_space<vmem>>, vector<1x2x128xf32>
    %434 = vector.shape_cast %433 : vector<1x2x128xf32> to vector<2x128xf32>
    %435 = vector.shape_cast %431 : vector<2x128xf32> to vector<1x2x128xf32>
    tpu.vector_store %arg7[%432, %c0_127, %c0_128], %435 {strides = array<i32>} : memref<8x2x128xf32, #tpu.memory_space<vmem>>, vector<1x2x128xf32>,
    %c4_i32_129 = arith.constant 4 : i32
    %c7_i32_130 = arith.constant 7 : i32
    %436 = arith.subi %c7_i32_130, %c4_i32_129 : i32
    %437 = arith.index_cast %436 : i32 to index
    %c0_131 = arith.constant 0 : index
    %c0_132 = arith.constant 0 : index
    %438 = vector.load %arg2[%437, %c0_131, %c0_132] : memref<8x2x512xf32, #tpu.memory_space<vmem>>, vector<1x2x512xf32>
    %439 = vector.shape_cast %438 : vector<1x2x512xf32> to vector<2x512xf32>
    %cst_133 = arith.constant dense<0.000000e+00> : vector<2x512xf32>
    %440 = tpu.matmul %431, %291, %cst_133 {dimension_numbers = #tpu.dot_dimension_numbers<[1], [0], [0], [1], [0, 0, 1, 1], [], []>} : vector<2x128xf32>, vector<128x512xf32>, vector<2x512xf32> -> vector<2x512xf32>
    %441 = arith.addf %439, %440 : vector<2x512xf32>
    %442 = vector.extract_strided_slice %441 {offsets = [0, 0], sizes = [2, 128], strides = [1, 1]} : vector<2x512xf32> to vector<2x128xf32>
    %443 = arith.negf %442 : vector<2x128xf32>
    %444 = math.exp %443 : vector<2x128xf32>
    %cst_134 = arith.constant 1.000000e+00 : f32
    %445 = vector.broadcast %cst_134 : f32 to vector<2x128xf32>
    %446 = arith.addf %445, %444 : vector<2x128xf32>
    %447 = arith.divf %445, %446 : vector<2x128xf32>
    %448 = vector.extract_strided_slice %441 {offsets = [0, 128], sizes = [2, 128], strides = [1, 1]} : vector<2x512xf32> to vector<2x128xf32>
    %449 = arith.negf %448 : vector<2x128xf32>
    %450 = math.exp %449 : vector<2x128xf32>
    %cst_135 = arith.constant 1.000000e+00 : f32
    %451 = vector.broadcast %cst_135 : f32 to vector<2x128xf32>
    %452 = arith.addf %451, %450 : vector<2x128xf32>
    %453 = arith.divf %451, %452 : vector<2x128xf32>
    %454 = vector.extract_strided_slice %441 {offsets = [0, 256], sizes = [2, 128], strides = [1, 1]} : vector<2x512xf32> to vector<2x128xf32>
    %455 = math.tanh %454 : vector<2x128xf32>
    %456 = vector.extract_strided_slice %441 {offsets = [0, 384], sizes = [2, 128], strides = [1, 1]} : vector<2x512xf32> to vector<2x128xf32>
    %457 = arith.negf %456 : vector<2x128xf32>
    %458 = math.exp %457 : vector<2x128xf32>
    %cst_136 = arith.constant 1.000000e+00 : f32
    %459 = vector.broadcast %cst_136 : f32 to vector<2x128xf32>
    %460 = arith.addf %459, %458 : vector<2x128xf32>
    %461 = arith.divf %459, %460 : vector<2x128xf32>
    %462 = arith.mulf %453, %429 : vector<2x128xf32>
    %463 = arith.mulf %447, %455 : vector<2x128xf32>
    %464 = arith.addf %462, %463 : vector<2x128xf32>
    %465 = math.tanh %464 : vector<2x128xf32>
    %466 = arith.mulf %461, %465 : vector<2x128xf32>
    %467 = arith.index_cast %436 : i32 to index
    %c0_137 = arith.constant 0 : index
    %c0_138 = arith.constant 0 : index
    %468 = vector.load %arg7[%467, %c0_137, %c0_138] : memref<8x2x128xf32, #tpu.memory_space<vmem>>, vector<1x2x128xf32>
    %469 = vector.shape_cast %468 : vector<1x2x128xf32> to vector<2x128xf32>
    %470 = vector.shape_cast %466 : vector<2x128xf32> to vector<1x2x128xf32>
    tpu.vector_store %arg7[%467, %c0_137, %c0_138], %470 {strides = array<i32>} : memref<8x2x128xf32, #tpu.memory_space<vmem>>, vector<1x2x128xf32>,
    %c5_i32_139 = arith.constant 5 : i32
    %c7_i32_140 = arith.constant 7 : i32
    %471 = arith.subi %c7_i32_140, %c5_i32_139 : i32
    %472 = arith.index_cast %471 : i32 to index
    %c0_141 = arith.constant 0 : index
    %c0_142 = arith.constant 0 : index
    %473 = vector.load %arg2[%472, %c0_141, %c0_142] : memref<8x2x512xf32, #tpu.memory_space<vmem>>, vector<1x2x512xf32>
    %474 = vector.shape_cast %473 : vector<1x2x512xf32> to vector<2x512xf32>
    %cst_143 = arith.constant dense<0.000000e+00> : vector<2x512xf32>
    %475 = tpu.matmul %466, %291, %cst_143 {dimension_numbers = #tpu.dot_dimension_numbers<[1], [0], [0], [1], [0, 0, 1, 1], [], []>} : vector<2x128xf32>, vector<128x512xf32>, vector<2x512xf32> -> vector<2x512xf32>
    %476 = arith.addf %474, %475 : vector<2x512xf32>
    %477 = vector.extract_strided_slice %476 {offsets = [0, 0], sizes = [2, 128], strides = [1, 1]} : vector<2x512xf32> to vector<2x128xf32>
    %478 = arith.negf %477 : vector<2x128xf32>
    %479 = math.exp %478 : vector<2x128xf32>
    %cst_144 = arith.constant 1.000000e+00 : f32
    %480 = vector.broadcast %cst_144 : f32 to vector<2x128xf32>
    %481 = arith.addf %480, %479 : vector<2x128xf32>
    %482 = arith.divf %480, %481 : vector<2x128xf32>
    %483 = vector.extract_strided_slice %476 {offsets = [0, 128], sizes = [2, 128], strides = [1, 1]} : vector<2x512xf32> to vector<2x128xf32>
    %484 = arith.negf %483 : vector<2x128xf32>
    %485 = math.exp %484 : vector<2x128xf32>
    %cst_145 = arith.constant 1.000000e+00 : f32
    %486 = vector.broadcast %cst_145 : f32 to vector<2x128xf32>
    %487 = arith.addf %486, %485 : vector<2x128xf32>
    %488 = arith.divf %486, %487 : vector<2x128xf32>
    %489 = vector.extract_strided_slice %476 {offsets = [0, 256], sizes = [2, 128], strides = [1, 1]} : vector<2x512xf32> to vector<2x128xf32>
    %490 = math.tanh %489 : vector<2x128xf32>
    %491 = vector.extract_strided_slice %476 {offsets = [0, 384], sizes = [2, 128], strides = [1, 1]} : vector<2x512xf32> to vector<2x128xf32>
    %492 = arith.negf %491 : vector<2x128xf32>
    %493 = math.exp %492 : vector<2x128xf32>
    %cst_146 = arith.constant 1.000000e+00 : f32
    %494 = vector.broadcast %cst_146 : f32 to vector<2x128xf32>
    %495 = arith.addf %494, %493 : vector<2x128xf32>
    %496 = arith.divf %494, %495 : vector<2x128xf32>
    %497 = arith.mulf %488, %464 : vector<2x128xf32>
    %498 = arith.mulf %482, %490 : vector<2x128xf32>
    %499 = arith.addf %497, %498 : vector<2x128xf32>
    %500 = math.tanh %499 : vector<2x128xf32>
    %501 = arith.mulf %496, %500 : vector<2x128xf32>
    %502 = arith.index_cast %471 : i32 to index
    %c0_147 = arith.constant 0 : index
    %c0_148 = arith.constant 0 : index
    %503 = vector.load %arg7[%502, %c0_147, %c0_148] : memref<8x2x128xf32, #tpu.memory_space<vmem>>, vector<1x2x128xf32>
    %504 = vector.shape_cast %503 : vector<1x2x128xf32> to vector<2x128xf32>
    %505 = vector.shape_cast %501 : vector<2x128xf32> to vector<1x2x128xf32>
    tpu.vector_store %arg7[%502, %c0_147, %c0_148], %505 {strides = array<i32>} : memref<8x2x128xf32, #tpu.memory_space<vmem>>, vector<1x2x128xf32>,
    %c6_i32_149 = arith.constant 6 : i32
    %c7_i32_150 = arith.constant 7 : i32
    %506 = arith.subi %c7_i32_150, %c6_i32_149 : i32
    %507 = arith.index_cast %506 : i32 to index
    %c0_151 = arith.constant 0 : index
    %c0_152 = arith.constant 0 : index
    %508 = vector.load %arg2[%507, %c0_151, %c0_152] : memref<8x2x512xf32, #tpu.memory_space<vmem>>, vector<1x2x512xf32>
    %509 = vector.shape_cast %508 : vector<1x2x512xf32> to vector<2x512xf32>
    %cst_153 = arith.constant dense<0.000000e+00> : vector<2x512xf32>
    %510 = tpu.matmul %501, %291, %cst_153 {dimension_numbers = #tpu.dot_dimension_numbers<[1], [0], [0], [1], [0, 0, 1, 1], [], []>} : vector<2x128xf32>, vector<128x512xf32>, vector<2x512xf32> -> vector<2x512xf32>
    %511 = arith.addf %509, %510 : vector<2x512xf32>
    %512 = vector.extract_strided_slice %511 {offsets = [0, 0], sizes = [2, 128], strides = [1, 1]} : vector<2x512xf32> to vector<2x128xf32>
    %513 = arith.negf %512 : vector<2x128xf32>
    %514 = math.exp %513 : vector<2x128xf32>
    %cst_154 = arith.constant 1.000000e+00 : f32
    %515 = vector.broadcast %cst_154 : f32 to vector<2x128xf32>
    %516 = arith.addf %515, %514 : vector<2x128xf32>
    %517 = arith.divf %515, %516 : vector<2x128xf32>
    %518 = vector.extract_strided_slice %511 {offsets = [0, 128], sizes = [2, 128], strides = [1, 1]} : vector<2x512xf32> to vector<2x128xf32>
    %519 = arith.negf %518 : vector<2x128xf32>
    %520 = math.exp %519 : vector<2x128xf32>
    %cst_155 = arith.constant 1.000000e+00 : f32
    %521 = vector.broadcast %cst_155 : f32 to vector<2x128xf32>
    %522 = arith.addf %521, %520 : vector<2x128xf32>
    %523 = arith.divf %521, %522 : vector<2x128xf32>
    %524 = vector.extract_strided_slice %511 {offsets = [0, 256], sizes = [2, 128], strides = [1, 1]} : vector<2x512xf32> to vector<2x128xf32>
    %525 = math.tanh %524 : vector<2x128xf32>
    %526 = vector.extract_strided_slice %511 {offsets = [0, 384], sizes = [2, 128], strides = [1, 1]} : vector<2x512xf32> to vector<2x128xf32>
    %527 = arith.negf %526 : vector<2x128xf32>
    %528 = math.exp %527 : vector<2x128xf32>
    %cst_156 = arith.constant 1.000000e+00 : f32
    %529 = vector.broadcast %cst_156 : f32 to vector<2x128xf32>
    %530 = arith.addf %529, %528 : vector<2x128xf32>
    %531 = arith.divf %529, %530 : vector<2x128xf32>
    %532 = arith.mulf %523, %499 : vector<2x128xf32>
    %533 = arith.mulf %517, %525 : vector<2x128xf32>
    %534 = arith.addf %532, %533 : vector<2x128xf32>
    %535 = math.tanh %534 : vector<2x128xf32>
    %536 = arith.mulf %531, %535 : vector<2x128xf32>
    %537 = arith.index_cast %506 : i32 to index
    %c0_157 = arith.constant 0 : index
    %c0_158 = arith.constant 0 : index
    %538 = vector.load %arg7[%537, %c0_157, %c0_158] : memref<8x2x128xf32, #tpu.memory_space<vmem>>, vector<1x2x128xf32>
    %539 = vector.shape_cast %538 : vector<1x2x128xf32> to vector<2x128xf32>
    %540 = vector.shape_cast %536 : vector<2x128xf32> to vector<1x2x128xf32>
    tpu.vector_store %arg7[%537, %c0_157, %c0_158], %540 {strides = array<i32>} : memref<8x2x128xf32, #tpu.memory_space<vmem>>, vector<1x2x128xf32>,
    %c7_i32_159 = arith.constant 7 : i32
    %c7_i32_160 = arith.constant 7 : i32
    %541 = arith.subi %c7_i32_160, %c7_i32_159 : i32
    %542 = arith.index_cast %541 : i32 to index
    %c0_161 = arith.constant 0 : index
    %c0_162 = arith.constant 0 : index
    %543 = vector.load %arg2[%542, %c0_161, %c0_162] : memref<8x2x512xf32, #tpu.memory_space<vmem>>, vector<1x2x512xf32>
    %544 = vector.shape_cast %543 : vector<1x2x512xf32> to vector<2x512xf32>
    %cst_163 = arith.constant dense<0.000000e+00> : vector<2x512xf32>
    %545 = tpu.matmul %536, %291, %cst_163 {dimension_numbers = #tpu.dot_dimension_numbers<[1], [0], [0], [1], [0, 0, 1, 1], [], []>} : vector<2x128xf32>, vector<128x512xf32>, vector<2x512xf32> -> vector<2x512xf32>
    %546 = arith.addf %544, %545 : vector<2x512xf32>
    %547 = vector.extract_strided_slice %546 {offsets = [0, 0], sizes = [2, 128], strides = [1, 1]} : vector<2x512xf32> to vector<2x128xf32>
    %548 = arith.negf %547 : vector<2x128xf32>
    %549 = math.exp %548 : vector<2x128xf32>
    %cst_164 = arith.constant 1.000000e+00 : f32
    %550 = vector.broadcast %cst_164 : f32 to vector<2x128xf32>
    %551 = arith.addf %550, %549 : vector<2x128xf32>
    %552 = arith.divf %550, %551 : vector<2x128xf32>
    %553 = vector.extract_strided_slice %546 {offsets = [0, 128], sizes = [2, 128], strides = [1, 1]} : vector<2x512xf32> to vector<2x128xf32>
    %554 = arith.negf %553 : vector<2x128xf32>
    %555 = math.exp %554 : vector<2x128xf32>
    %cst_165 = arith.constant 1.000000e+00 : f32
    %556 = vector.broadcast %cst_165 : f32 to vector<2x128xf32>
    %557 = arith.addf %556, %555 : vector<2x128xf32>
    %558 = arith.divf %556, %557 : vector<2x128xf32>
    %559 = vector.extract_strided_slice %546 {offsets = [0, 256], sizes = [2, 128], strides = [1, 1]} : vector<2x512xf32> to vector<2x128xf32>
    %560 = math.tanh %559 : vector<2x128xf32>
    %561 = vector.extract_strided_slice %546 {offsets = [0, 384], sizes = [2, 128], strides = [1, 1]} : vector<2x512xf32> to vector<2x128xf32>
    %562 = arith.negf %561 : vector<2x128xf32>
    %563 = math.exp %562 : vector<2x128xf32>
    %cst_166 = arith.constant 1.000000e+00 : f32
    %564 = vector.broadcast %cst_166 : f32 to vector<2x128xf32>
    %565 = arith.addf %564, %563 : vector<2x128xf32>
    %566 = arith.divf %564, %565 : vector<2x128xf32>
    %567 = arith.mulf %558, %534 : vector<2x128xf32>
    %568 = arith.mulf %552, %560 : vector<2x128xf32>
    %569 = arith.addf %567, %568 : vector<2x128xf32>
    %570 = math.tanh %569 : vector<2x128xf32>
    %571 = arith.mulf %566, %570 : vector<2x128xf32>
    %572 = arith.index_cast %541 : i32 to index
    %c0_167 = arith.constant 0 : index
    %c0_168 = arith.constant 0 : index
    %573 = vector.load %arg7[%572, %c0_167, %c0_168] : memref<8x2x128xf32, #tpu.memory_space<vmem>>, vector<1x2x128xf32>
    %574 = vector.shape_cast %573 : vector<1x2x128xf32> to vector<2x128xf32>
    %575 = vector.shape_cast %571 : vector<2x128xf32> to vector<1x2x128xf32>
    tpu.vector_store %arg7[%572, %c0_167, %c0_168], %575 {strides = array<i32>} : memref<8x2x128xf32, #tpu.memory_space<vmem>>, vector<1x2x128xf32>,
    %c8_i32_169 = arith.constant 8 : i32
    %c1_170 = arith.constant 1 : index
    %c0_171 = arith.constant 0 : index
    %c0_172 = arith.constant 0 : index
    %576 = vector.load %arg10[%c1_170, %c0_171, %c0_172] : memref<2x2x128xf32, #tpu.memory_space<vmem>>, vector<1x2x128xf32>
    %577 = vector.shape_cast %576 : vector<1x2x128xf32> to vector<2x128xf32>
    %578 = vector.shape_cast %571 : vector<2x128xf32> to vector<1x2x128xf32>
    tpu.vector_store %arg10[%c1_170, %c0_171, %c0_172], %578 {strides = array<i32>} : memref<2x2x128xf32, #tpu.memory_space<vmem>>, vector<1x2x128xf32>,
    %c1_173 = arith.constant 1 : index
    %c0_174 = arith.constant 0 : index
    %c0_175 = arith.constant 0 : index
    %579 = vector.load %arg11[%c1_173, %c0_174, %c0_175] : memref<2x2x128xf32, #tpu.memory_space<vmem>>, vector<1x2x128xf32>
    %580 = vector.shape_cast %579 : vector<1x2x128xf32> to vector<2x128xf32>
    %581 = vector.shape_cast %569 : vector<2x128xf32> to vector<1x2x128xf32>
    tpu.vector_store %arg11[%c1_173, %c0_174, %c0_175], %581 {strides = array<i32>} : memref<2x2x128xf32, #tpu.memory_space<vmem>>, vector<1x2x128xf32>,
    %c0_i32_176 = arith.constant 0 : i32
    %582 = arith.cmpi eq, %arg0, %c0_i32_176 : i32
    %583 = arith.extui %582 : i1 to i32
    %c0_i32_177 = arith.constant 0 : i32
    %584 = arith.cmpi ne, %583, %c0_i32_177 : i32
    scf.if %584 {
      %c1_178 = arith.constant 1 : index
      %c0_179 = arith.constant 0 : index
      %c0_180 = arith.constant 0 : index
      %585 = vector.load %arg8[%c1_178, %c0_179, %c0_180] : memref<2x2x128xf32, #tpu.memory_space<vmem>>, vector<1x2x128xf32>
      %586 = vector.shape_cast %585 : vector<1x2x128xf32> to vector<2x128xf32>
      %587 = vector.shape_cast %571 : vector<2x128xf32> to vector<1x2x128xf32>
      tpu.vector_store %arg8[%c1_178, %c0_179, %c0_180], %587 {strides = array<i32>} : memref<2x2x128xf32, #tpu.memory_space<vmem>>, vector<1x2x128xf32>,
      %c1_181 = arith.constant 1 : index
      %c0_182 = arith.constant 0 : index
      %c0_183 = arith.constant 0 : index
      %588 = vector.load %arg9[%c1_181, %c0_182, %c0_183] : memref<2x2x128xf32, #tpu.memory_space<vmem>>, vector<1x2x128xf32>
      %589 = vector.shape_cast %588 : vector<1x2x128xf32> to vector<2x128xf32>
      %590 = vector.shape_cast %569 : vector<2x128xf32> to vector<1x2x128xf32>
      tpu.vector_store %arg9[%c1_181, %c0_182, %c0_183], %590 {strides = array<i32>} : memref<2x2x128xf32, #tpu.memory_space<vmem>>, vector<1x2x128xf32>,
    } else {
    }
    return
  }
  func.func @transform_0(%arg0: i32) -> (i32, i32, i32) {
    %c0_i32 = arith.constant 0 : i32
    %c0_i32_0 = arith.constant 0 : i32
    %c0_i32_1 = arith.constant 0 : i32
    return %arg0, %c0_i32, %c0_i32_0 : i32, i32, i32
  }
  func.func @transform_1(%arg0: i32) -> (i32, i32, i32) {
    %c0_i32 = arith.constant 0 : i32
    %0 = arith.subi %c0_i32, %arg0 : i32
    %c0_i32_0 = arith.constant 0 : i32
    %c1_i32 = arith.constant 1 : i32
    %c0_i32_1 = arith.constant 0 : i32
    return %0, %c0_i32_0, %c1_i32 : i32, i32, i32
  }
  func.func @transform_2(%arg0: i32) -> (i32, i32, i32) {
    %c0_i32 = arith.constant 0 : i32
    %c0_i32_0 = arith.constant 0 : i32
    %c0_i32_1 = arith.constant 0 : i32
    %c0_i32_2 = arith.constant 0 : i32
    return %c0_i32, %c0_i32_0, %c0_i32_1 : i32, i32, i32
  }
  func.func @transform_3(%arg0: i32) -> (i32, i32, i32) {
    %c0_i32 = arith.constant 0 : i32
    %c0_i32_0 = arith.constant 0 : i32
    %c0_i32_1 = arith.constant 0 : i32
    %c0_i32_2 = arith.constant 0 : i32
    return %c0_i32, %c0_i32_0, %c0_i32_1 : i32, i32, i32
  }
  func.func @transform_4(%arg0: i32) -> (i32, i32, i32) {
    %c0_i32 = arith.constant 0 : i32
    %c0_i32_0 = arith.constant 0 : i32
    %c0_i32_1 = arith.constant 0 : i32
    %c0_i32_2 = arith.constant 0 : i32
    return %c0_i32, %c0_i32_0, %c0_i32_1 : i32, i32, i32
  }
  func.func @transform_5(%arg0: i32) -> (i32, i32, i32) {
    %c0_i32 = arith.constant 0 : i32
    %c0_i32_0 = arith.constant 0 : i32
    %c0_i32_1 = arith.constant 0 : i32
    return %arg0, %c0_i32, %c0_i32_0 : i32, i32, i32
  }
  func.func @transform_6(%arg0: i32) -> (i32, i32, i32) {
    %c0_i32 = arith.constant 0 : i32
    %0 = arith.subi %c0_i32, %arg0 : i32
    %c0_i32_0 = arith.constant 0 : i32
    %c0_i32_1 = arith.constant 0 : i32
    %c0_i32_2 = arith.constant 0 : i32
    return %0, %c0_i32_0, %c0_i32_1 : i32, i32, i32
  }
  func.func @transform_7(%arg0: i32) -> (i32, i32, i32) {
    %c0_i32 = arith.constant 0 : i32
    %c0_i32_0 = arith.constant 0 : i32
    %c0_i32_1 = arith.constant 0 : i32
    %c0_i32_2 = arith.constant 0 : i32
    return %c0_i32, %c0_i32_0, %c0_i32_1 : i32, i32, i32
  }
  func.func @transform_8(%arg0: i32) -> (i32, i32, i32) {
    %c0_i32 = arith.constant 0 : i32
    %c0_i32_0 = arith.constant 0 : i32
    %c0_i32_1 = arith.constant 0 : i32
    %c0_i32_2 = arith.constant 0 : i32
    return %c0_i32, %c0_i32_0, %c0_i32_1 : i32, i32, i32
  }
}

</mosaic_0001>

<bundles_post_ra>
// kernel: tpu_custom_call.1
= control target key start
LH: loop header
LB: loop body
LE: loop exit
PB: predicated region body
PF: predicated region fallthrough
CT: control target
= control target key end

     0   :  { %14 = vsyncpa [#allocation5], 0  ;;  %s5972_s0 = inlined_call_operand.hbm [shape: f32[8,2,1024], index: 0, kind: input, shape index: {}]   ;;  %s5973_s1 = inlined_call_operand.hbm [shape: f32[8,2,1024], index: 1, kind: input, shape index: {}]   ;;  %s5974_s2 = inlined_call_operand.hbm [shape: f32[2,128,512], index: 2, kind: input, shape index: {}]   ;;  %s5975_s3 = inlined_call_operand.vmem [shape: f32[2,2,128], index: 3, kind: input, shape index: {}]   ;;  %s5976_s4 = inlined_call_operand.vmem [shape: f32[2,2,128], index: 4, kind: input, shape index: {}]   ;;  %s5977_s5 = inlined_call_operand.hbm [shape: f32[8,2,128], index: 5, kind: output, shape index: {0}]   ;;  %s5978_s6 = inlined_call_operand.hbm [shape: f32[8,2,128], index: 6, kind: output, shape index: {1}]   ;;  %s5979_s7 = inlined_call_operand.hbm [shape: f32[2,2,128], index: 7, kind: output, shape index: {2}]   ;;  %s5980_s8 = inlined_call_operand.hbm [shape: f32[2,2,128], index: 8, kind: output, shape index: {3}]  }
   0x1   :  { %15 = vsyncpa [#allocation8], 0 }
   0x2   :  { %16 = vsyncpa [#allocation6], 0 }
   0x3   :  { %17 = vsyncpa [#allocation12], 0 }
   0x4   :  { %18 = vsyncpa [#allocation15], 0  ;;  %s5085_s29 = scalar_lea.hbm %s5973_s1, 128  ;;  %s5022_s30 = smov [#allocation7]  }
   0x5   :  { %s42_s9 = sshll.u32 %s5022_s30, 4  ;;  %s5023_s10 = smov [#allocation4]   ;;  %s43_s9 = int_to_ptr.vmem [resolvable:$true] %s42_s9 }
   0x6   :  { %s24_s11 = sshll.u32 %s5023_s10, 4  ;;  %s4879_s14 = scalar_lea.hbm %s5973_s1, 1152  ;;  %s5087_s11 = int_to_ptr.vmem [resolvable:$true] %s24_s11 }
   0x7   :  { %p4856_p0 = scmp.ne.s32.totalorder %s5085_s29, %s4879_s14  ;;  %s4857_s17 = scalar_lea.hbm %s5973_s1, 2048 }
   0x8   :  { %p4858_p1 = scmp.lt.u32.totalorder %s5085_s29, %s5973_s1  ;;  %p4859_p2 = scmp.lt.u32.totalorder %s4857_s17, %s4879_s14 }
   0x9   :  { %p4861_p4 = scmp.lt.u32.totalorder %s4879_s14, %s5085_s29 }
   0xa   :  { %p4860_p3 = por %p4859_p2, %p4858_p1 }
   0xc   :  { %p4862_p5 = por %p4861_p4, %p4860_p3 }
   0xe   :  { %p4863_p6 = pnand %p4862_p5, %p4856_p0 }
  0x10   :  { %4866 = shalt.err (!%p4863_p6)
}
  0x11   :  { %s4867_s20 = scalar_lea.vmem %s43_s9, 1024  ;;  %p4872_p8 = scmp.lt.s32.totalorder %s43_s9, %s43_s9 }
  0x12   :  { %p4868_p7 = scmp.ne.s32.totalorder %s43_s9, %s4867_s20  ;;  %p4873_p9 = scmp.lt.s32.totalorder %s4867_s20, %s4867_s20 }
  0x14   :  { %p4874_p10 = por %p4873_p9, %p4872_p8 }
  0x16   :  { %p4875_p11 = pnand %p4874_p10, %p4868_p7 }
  0x18   :  { %4878 = shalt.err (!%p4875_p11)
}
  0x19   :  { %s5024_s21 = smov 256   ;;  %s5025_s22 = smov 128  }
  0x1a   :  { %s5026_s23 = smov 8   ;;  %s4880_s25 = scalar_lea.hbm %s5972_s0, 1024 }
  0x1b   :  { %48 = dma.hbm_to_vmem [thread:$0]  %s5085_s29, 1024, %s43_s9, [#allocation8], %s5024_s21, %s5025_s22, %s5026_s23  }
  0x1c   :  { %p4881_p12 = scmp.ne.s32.totalorder %s5972_s0, %s4880_s25  ;;  %s4882_s10 = scalar_lea.hbm %s5972_s0, 2048 }
  0x1d   :  { %p4883_p13 = scmp.lt.u32.totalorder %s4882_s10, %s4880_s25  ;;  %p4884_p0 = scmp.lt.u32.totalorder %s4880_s25, %s5972_s0 }
  0x1f   :  { %p4885_p1 = por %p4884_p0, %p4883_p13 }
  0x21   :  { %p4886_p2 = pnand %p4885_p1, %p4881_p12 }
  0x23   :  { %4889 = shalt.err (!%p4886_p2)
}
  0x24   :  { %s4890_s29 = scalar_lea.vmem %s5087_s11, 1024  ;;  %p4895_p4 = scmp.lt.s32.totalorder %s5087_s11, %s5087_s11 }
  0x25   :  { %p4891_p3 = scmp.ne.s32.totalorder %s5087_s11, %s4890_s29  ;;  %p4896_p5 = scmp.lt.s32.totalorder %s4890_s29, %s4890_s29 }
  0x27   :  { %p4897_p6 = por %p4896_p5, %p4895_p4 }
  0x29   :  { %p4898_p7 = pnand %p4897_p6, %p4891_p3 }
  0x2b   :  { %4901 = shalt.err (!%p4898_p7)
}
  0x2c   :  { %30 = dma.hbm_to_vmem [thread:$0]  %s5972_s0, 1024, %s5087_s11, [#allocation5], %s5024_s21, %s5025_s22, %s5026_s23  }
  0x2d   :  { %s5027_s15 = smov [#allocation9]   ;;  %s4902_s19 = scalar_lea.hbm %s5974_s2, 16384 }
  0x2e   :  { %s54_s16 = sshll.u32 %s5027_s15, 4  ;;  %p4903_p8 = scmp.ne.s32.totalorder %s5974_s2, %s4902_s19  ;;  %s55_s16 = int_to_ptr.vmem [resolvable:$true] %s54_s16 }
  0x2f   :  { %p4906_p9 = scmp.lt.u32.totalorder %s4902_s19, %s5974_s2 }
  0x31   :  { %p4908_p10 = pnand %p4906_p9, %p4903_p8 }
  0x33   :  { %4911 = shalt.err (!%p4908_p10)
}
  0x34   :  { %s4912_s26 = scalar_lea.vmem %s55_s16, 16384  ;;  %p4917_p12 = scmp.lt.s32.totalorder %s55_s16, %s55_s16 }
  0x35   :  { %p4913_p11 = scmp.ne.s32.totalorder %s55_s16, %s4912_s26  ;;  %p4918_p13 = scmp.lt.s32.totalorder %s4912_s26, %s4912_s26 }
  0x37   :  { %p4919_p0 = por %p4918_p13, %p4917_p12 }
  0x39   :  { %p4920_p1 = pnand %p4919_p0, %p4913_p11 }
  0x3b   :  { %4923 = shalt.err (!%p4920_p1)
}
  0x3c   :  { %s5028_s0 = smov 512   ;;  %s5029_s11 = smov 32  }
  0x3d   :  { %60 = dma.hbm_to_vmem [thread:$0]  %s5974_s2, 16384, %s55_s16, [#allocation8], %s5028_s0, %s5028_s0, %s5029_s11  }
  0x3e   :  { %5012 = dma.done.wait [#allocation5], 1024  }
  0x3f   :  { %5013 = vsyncadd [#allocation5], 4294966272 }
  0x40   :  { %5014 = dma.done.wait [#allocation8], 17408  }
  0x41   :  { %5015 = vsyncadd [#allocation8], 4294949888  ;;  %v5030_v0 = vmov 0.0   ;;  %v91_v1 = vld [vmem:[#allocation9 + $0x8] sm:$0xff]  ;;  %v93_v3 = vld [vmem:[#allocation9 + $0x18] sm:$0xff] }
  0x42   :  { %221 = vmatprep.mubr.f32.mxu0 %v5030_v0  ;;  %292 = vmatprep.mubr.f32.mxu1 %v5030_v0  ;;  %v95_v2 = vld [vmem:[#allocation9 + $0x28] sm:$0xff]  ;;  %v97_v5 = vld [vmem:[#allocation9 + $0x38] sm:$0xff]  ;;  %v90_v6 = vld [vmem:[#allocation9] sm:$0xff] }
  0x43   :  { %v5137_v4 = vpack.c.bf16 %v95_v2, %v91_v1  ;;  %v94_v7 = vld [vmem:[#allocation9 + $0x20] sm:$0xff]  ;;  %v5139_v8 = vpack.c.bf16 %v97_v5, %v93_v3  ;;  %v92_v10 = vld [vmem:[#allocation9 + $0x10] sm:$0xff]  ;;  %v99_v12 = vld [vmem:[#allocation9 + $0x48] sm:$0xff] }
  0x44   :  { %v5141_v9 = vpack.c.bf16 %v94_v7, %v90_v6  ;;  %v96_v11 = vld [vmem:[#allocation9 + $0x30] sm:$0xff]  ;;  %v103_v14 = vld [vmem:[#allocation9 + $0x68] sm:$0xff]  ;;  %v101_v15 = vld [vmem:[#allocation9 + $0x58] sm:$0xff] }
  0x45   :  { %3561 = vmatprep.subr.bf16.mxu0 %v5137_v4  ;;  %v5144_v13 = vpack.c.bf16 %v96_v11, %v92_v10  ;;  %v105_v16 = vld [vmem:[#allocation9 + $0x78] sm:$0xff]  ;;  %3593 = vmatprep.subr.bf16.mxu1 %v5139_v8  ;;  %v5148_v17 = vpack.c.bf16 %v103_v14, %v99_v12  ;;  %v98_v19 = vld [vmem:[#allocation9 + $0x40] sm:$0xff]  ;;  %v100_v21 = vld [vmem:[#allocation9 + $0x50] sm:$0xff] }
  0x46   :  { %3563 = vmatpush1.bf16.msra.mxu0 %v5141_v9  ;;  %v5150_v18 = vpack.c.bf16 %v105_v16, %v101_v15  ;;  %v102_v20 = vld [vmem:[#allocation9 + $0x60] sm:$0xff]  ;;  %v104_v23 = vld [vmem:[#allocation9 + $0x70] sm:$0xff]  ;;  %v107_v24 = vld [vmem:[#allocation9 + $0x88] sm:$0xff] }
  0x47   :  { %3595 = vmatpush1.bf16.msra.mxu1 %v5144_v13  ;;  %v5153_v22 = vpack.c.bf16 %v102_v20, %v98_v19  ;;  %v111_v25 = vld [vmem:[#allocation9 + $0xa8] sm:$0xff]  ;;  %3565 = vmatprep.subr.bf16.mxu0 %v5148_v17  ;;  %v5157_v26 = vpack.c.bf16 %v104_v23, %v100_v21  ;;  %v109_v28 = vld [vmem:[#allocation9 + $0x98] sm:$0xff]  ;;  %v106_v30 = vld [vmem:[#allocation9 + $0x80] sm:$0xff] }
  0x48   :  { %3597 = vmatprep.subr.bf16.mxu1 %v5150_v18  ;;  %v5159_v27 = vpack.c.bf16 %v111_v25, %v107_v24  ;;  %v113_v29 = vld [vmem:[#allocation9 + $0xb8] sm:$0xff]  ;;  %v110_v32 = vld [vmem:[#allocation9 + $0xa0] sm:$0xff]  ;;  %v108_v33 = vld [vmem:[#allocation9 + $0x90] sm:$0xff] }
  0x49   :  { %v5161_v31 = vpack.c.bf16 %v113_v29, %v109_v28  ;;  %v112_v34 = vld [vmem:[#allocation9 + $0xb0] sm:$0xff]  ;;  %v5164_v35 = vpack.c.bf16 %v110_v32, %v106_v30  ;;  %v115_v36 = vld [vmem:[#allocation9 + $0xc8] sm:$0xff]  ;;  %v117_v38 = vld [vmem:[#allocation9 + $0xd8] sm:$0xff] }
  0x4a   :  { %3567 = vmatpush1.bf16.msra.mxu0 %v5153_v22  ;;  %v119_v37 = vld [vmem:[#allocation9 + $0xe8] sm:$0xff]  ;;  %v5168_v39 = vpack.c.bf16 %v112_v34, %v108_v33  ;;  %v121_v41 = vld [vmem:[#allocation9 + $0xf8] sm:$0xff]  ;;  %v114_v42 = vld [vmem:[#allocation9 + $0xc0] sm:$0xff] }
  0x4b   :  { %3599 = vmatpush1.bf16.msra.mxu1 %v5157_v26  ;;  %3569 = vmatprep.subr.bf16.mxu0 %v5159_v27  ;;  %v5170_v40 = vpack.c.bf16 %v119_v37, %v115_v36  ;;  %v118_v43 = vld [vmem:[#allocation9 + $0xe0] sm:$0xff]  ;;  %v5173_v44 = vpack.c.bf16 %v121_v41, %v117_v38  ;;  %v116_v45 = vld [vmem:[#allocation9 + $0xd0] sm:$0xff]  ;;  %v123_v47 = vld [vmem:[#allocation9 + $0x108] sm:$0xff] }
  0x4c   :  { %3601 = vmatprep.subr.bf16.mxu1 %v5161_v31  ;;  %v120_v46 = vld [vmem:[#allocation9 + $0xf0] sm:$0xff]  ;;  %v127_v48 = vld [vmem:[#allocation9 + $0x128] sm:$0xff]  ;;  %v125_v49 = vld [vmem:[#allocation9 + $0x118] sm:$0xff]  ;;  %v5176_v51 = vpack.c.bf16 %v118_v43, %v114_v42 }
  0x4d   :  { %v129_v50 = vld [vmem:[#allocation9 + $0x138] sm:$0xff]  ;;  %v5180_v52 = vpack.c.bf16 %v120_v46, %v116_v45  ;;  %v5182_v53 = vpack.c.bf16 %v127_v48, %v123_v47  ;;  %v122_v54 = vld [vmem:[#allocation9 + $0x100] sm:$0xff]  ;;  %v124_v56 = vld [vmem:[#allocation9 + $0x110] sm:$0xff] }
  0x4e   :  { %3571 = vmatpush1.bf16.msra.mxu0 %v5164_v35  ;;  %v126_v55 = vld [vmem:[#allocation9 + $0x120] sm:$0xff]  ;;  %v5185_v57 = vpack.c.bf16 %v129_v50, %v125_v49  ;;  %v128_v58 = vld [vmem:[#allocation9 + $0x130] sm:$0xff]  ;;  %v131_v59 = vld [vmem:[#allocation9 + $0x148] sm:$0xff] }
  0x4f   :  { %3603 = vmatpush1.bf16.msra.mxu1 %v5168_v39  ;;  %3573 = vmatprep.subr.bf16.mxu0 %v5170_v40  ;;  %v135_v60 = vld [vmem:[#allocation9 + $0x168] sm:$0xff]  ;;  %v133_v61 = vld [vmem:[#allocation9 + $0x158] sm:$0xff]  ;;  %v5188_v63 = vpack.c.bf16 %v126_v55, %v122_v54  ;;  %v5192_v1 = vpack.c.bf16 %v128_v58, %v124_v56  ;;  %v130_v3 = vld [vmem:[#allocation9 + $0x140] sm:$0xff]  ;;  %v5031_v54 = vmov 1983009808   ;;  %v308_v56 = vlaneseq }
  0x50   :  { %3605 = vmatprep.subr.bf16.mxu1 %v5173_v44  ;;  %v137_v62 = vld [vmem:[#allocation9 + $0x178] sm:$0xff]  ;;  %v5194_v2 = vpack.c.bf16 %v135_v60, %v131_v59  ;;  %v134_v5 = vld [vmem:[#allocation9 + $0x160] sm:$0xff]  ;;  %v132_v6 = vld [vmem:[#allocation9 + $0x150] sm:$0xff]  ;;  %v306_v55 = vunpack.c.l.s4 %v5031_v54 }
  0x51   :  { %v5197_v7 = vpack.c.bf16 %v137_v62, %v133_v61  ;;  %v136_v10 = vld [vmem:[#allocation9 + $0x170] sm:$0xff]  ;;  %v139_v11 = vld [vmem:[#allocation9 + $0x188] sm:$0xff]  ;;  %v141_v14 = vld [vmem:[#allocation9 + $0x198] sm:$0xff]  ;;  %v5200_v16 = vpack.c.bf16 %v134_v5, %v130_v3  ;;  %v309_v59 = vshrl.u32 %v308_v56, 7 }
  0x52   :  { %3575 = vmatpush1.bf16.msra.mxu0 %v5176_v51  ;;  %v143_v12 = vld [vmem:[#allocation9 + $0x1a8] sm:$0xff]  ;;  %v145_v15 = vld [vmem:[#allocation9 + $0x1b8] sm:$0xff]  ;;  %v138_v19 = vld [vmem:[#allocation9 + $0x180] sm:$0xff]  ;;  %v5204_v20 = vpack.c.bf16 %v136_v10, %v132_v6  ;;  %v307_v58 = vunpack.c.0.s8 %v306_v55 }
  0x53   :  { %3607 = vmatpush1.bf16.msra.mxu1 %v5180_v52  ;;  %3577 = vmatprep.subr.bf16.mxu0 %v5182_v53  ;;  %v5206_v21 = vpack.c.bf16 %v143_v12, %v139_v11  ;;  %v142_v23 = vld [vmem:[#allocation9 + $0x1a0] sm:$0xff]  ;;  %v140_v24 = vld [vmem:[#allocation9 + $0x190] sm:$0xff]  ;;  %v82_v25 = vld [vmem:[%s5975_s3] sm:$0x3]  ;;  %v5212_v28 = vpack.c.bf16 %v145_v15, %v141_v14 }
  0x54   :  { %3609 = vmatprep.subr.bf16.mxu1 %v5185_v57  ;;  %v144_v29 = vld [vmem:[#allocation9 + $0x1b0] sm:$0xff]  ;;  %v147_v30 = vld [vmem:[#allocation9 + $0x1c8] sm:$0xff]  ;;  %84 = vst [vmem:[#allocation2] sm:$0x3] %v82_v25  ;;  %v149_v33 = vld [vmem:[#allocation9 + $0x1d8] sm:$0xff]  ;;  %v5215_v36 = vpack.c.bf16 %v142_v23, %v138_v19  ;;  %v5275_v61 = vsub.s32 %v307_v58, %v309_v59 }
  0x55   :  { %v151_v32 = vld [vmem:[#allocation9 + $0x1e8] sm:$0xff]  ;;  %v153_v34 = vld [vmem:[#allocation9 + $0x1f8] sm:$0xff]  ;;  %v5219_v37 = vpack.c.bf16 %v144_v29, %v140_v24  ;;  %v146_v41 = vld [vmem:[#allocation9 + $0x1c0] sm:$0xff] }
  0x56   :  { %3579 = vmatpush1.bf16.msra.mxu0 %v5188_v63  ;;  %v5221_v38 = vpack.c.bf16 %v151_v32, %v147_v30  ;;  %v150_v42 = vld [vmem:[#allocation9 + $0x1e0] sm:$0xff]  ;;  %v5224_v43 = vpack.c.bf16 %v153_v34, %v149_v33  ;;  %v148_v45 = vld [vmem:[#allocation9 + $0x1d0] sm:$0xff]  ;;  %v86_v50 = vld [vmem:[%s5976_s4] sm:$0x3] }
  0x57   :  { %3611 = vmatpush1.bf16.msra.mxu1 %v5192_v1  ;;  %3581 = vmatprep.subr.bf16.mxu0 %v5194_v2  ;;  %v152_v46 = vld [vmem:[#allocation9 + $0x1f0] sm:$0xff]  ;;  %v5227_v47 = vpack.c.bf16 %v150_v42, %v146_v41  ;;  %88 = vst [vmem:[#allocation3] sm:$0x3] %v86_v50  ;;  %v156_v14 = vld [vmem:[#allocation4] sm:$0xff] }
  0x58   :  { %3613 = vmatprep.subr.bf16.mxu1 %v5197_v7  ;;  %v5231_v48 = vpack.c.bf16 %v152_v46, %v148_v45 }
  0x5a   :  { %3583 = vmatpush1.bf16.msra.mxu0 %v5200_v16 }
  0x5b   :  { %3615 = vmatpush1.bf16.msra.mxu1 %v5204_v20  ;;  %3585 = vmatprep.subr.bf16.mxu0 %v5206_v21  ;;  %v154_v49 = vld [vmem:[#allocation2] sm:$0x3] }
  0x5c   :  { %3617 = vmatprep.subr.bf16.mxu1 %v5212_v28 }
  0x5e   :  { %3587 = vmatpush1.bf16.msra.mxu0 %v5215_v36 }
  0x5f   :  { %3619 = vmatpush1.bf16.msra.mxu1 %v5219_v37  ;;  %3589 = vmatprep.subr.bf16.mxu0 %v5221_v38 }
  0x60   :  { %3621 = vmatprep.subr.bf16.mxu1 %v5224_v43 }
  0x62   :  { %3591 = vmatpush1.bf16.msra.mxu0 %v5227_v47 }
  0x63   :  { %3623 = vmatpush1.bf16.msra.mxu1 %v5231_v48  ;;  %3625 = vmatprep.subr.bf16.mxu0 %v5137_v4 }
  0x64   :  { %3657 = vmatprep.subr.bf16.mxu1 %v5139_v8 }
  0x65   :  { %222 = vmatmul.mubr.f32.vlgmr.msra.gmra.mrb[0].mxu0 %v154_v49 }
  0x66   :  { %293 = vmatmul.mubr.f32.vlgmr.msra.gmra.mrb[0].mxu1 %v154_v49  ;;  %3627 = vmatpush1.bf16.msra.mxu0 %v5141_v9  ;;  %v155_v49 = vld [vmem:[#allocation3] sm:$0x3] }
  0x67   :  { %3659 = vmatpush1.bf16.msra.mxu1 %v5144_v13  ;;  %3629 = vmatprep.subr.bf16.mxu0 %v5148_v17 }
  0x68   :  { %3661 = vmatprep.subr.bf16.mxu1 %v5150_v18  ;;  %420 = vmatprep.mubr.f32.mxu0 %v5030_v0 }
  0x69   :  { %491 = vmatprep.mubr.f32.mxu1 %v5030_v0 }
  0x6a   :  { %3631 = vmatpush1.bf16.msra.mxu0 %v5153_v22 }
  0x6b   :  { %3663 = vmatpush1.bf16.msra.mxu1 %v5157_v26  ;;  %3633 = vmatprep.subr.bf16.mxu0 %v5159_v27 }
  0x6c   :  { %3665 = vmatprep.subr.bf16.mxu1 %v5161_v31 }
  0x6e   :  { %3635 = vmatpush1.bf16.msra.mxu0 %v5164_v35 }
  0x6f   :  { %3667 = vmatpush1.bf16.msra.mxu1 %v5168_v39  ;;  %3637 = vmatprep.subr.bf16.mxu0 %v5170_v40 }
  0x70   :  { %3669 = vmatprep.subr.bf16.mxu1 %v5173_v44 }
  0x72   :  { %3639 = vmatpush1.bf16.msra.mxu0 %v5176_v51 }
  0x73   :  { %3671 = vmatpush1.bf16.msra.mxu1 %v5180_v52  ;;  %3641 = vmatprep.subr.bf16.mxu0 %v5182_v53 }
  0x74   :  { %3673 = vmatprep.subr.bf16.mxu1 %v5185_v57 }
  0x76   :  { %3643 = vmatpush1.bf16.msra.mxu0 %v5188_v63 }
  0x77   :  { %3675 = vmatpush1.bf16.msra.mxu1 %v5192_v1  ;;  %3645 = vmatprep.subr.bf16.mxu0 %v5194_v2 }
  0x78   :  { %3677 = vmatprep.subr.bf16.mxu1 %v5197_v7 }
  0x7a   :  { %3647 = vmatpush1.bf16.msra.mxu0 %v5200_v16 }
  0x7b   :  { %3679 = vmatpush1.bf16.msra.mxu1 %v5204_v20  ;;  %3649 = vmatprep.subr.bf16.mxu0 %v5206_v21 }
  0x7c   :  { %3681 = vmatprep.subr.bf16.mxu1 %v5212_v28 }
  0x7e   :  { %3651 = vmatpush1.bf16.msra.mxu0 %v5215_v36 }
  0x7f   :  { %3683 = vmatpush1.bf16.msra.mxu1 %v5219_v37  ;;  %3653 = vmatprep.subr.bf16.mxu0 %v5221_v38 }
  0x80   :  { %3685 = vmatprep.subr.bf16.mxu1 %v5224_v43 }
  0x82   :  { %3655 = vmatpush1.bf16.msra.mxu0 %v5227_v47 }
  0x83   :  { %3687 = vmatpush1.bf16.msra.mxu1 %v5231_v48  ;;  %3689 = vmatprep.subr.bf16.mxu0 %v5137_v4 }
  0x84   :  { %3721 = vmatprep.subr.bf16.mxu1 %v5139_v8 }
 0x138   :  { %v223_v60 = vpop.f32.mrb[0].mxu0 }
 0x139   :  { %v294_v62 = vpop.f32.mrb[0].mxu1  ;;  %v225_v3 = vpop.f32.mrb[1].mxu0 }
 0x13a   :  { %v303_v5 = vcombine.low %v223_v60, %v225_v3  ;;  %v296_v6 = vpop.f32.mrb[1].mxu1 }
 0x13b   :  { %v304_v10 = vcombine.low %v294_v62, %v296_v6 }
 0x13c   :  { %v311_v11 = vrot.slane %v303_v5, %v5275_v61 }
 0x13d   :  { %v318_v12 = vrot.slane %v304_v10, %v5275_v61 }
 0x13f   :  { %v319_v15 = vcombine.low %v311_v11, %v318_v12 }
 0x141   :  { %v321_v19 = vadd.f32 %v319_v15, %v156_v14 }
 0x143   :  { %v3512_v23 = vmul.f32 -1.442695, %v321_v19  ;;  %v329_v24 = vrot.slane %v321_v19, 2  ;;  %v340_v29 = vrot.slane %v321_v19, 6  ;;  %v337_v33 = vrot.slane %v321_v19, 4 }
 0x145   :  { %4599 = vpow2.f32 %v3512_v23  ;;  %v3513_v25 = vmul.f32 -1.442695, %v329_v24  ;;  %v3514_v30 = vmul.f32 -1.442695, %v340_v29  ;;  %v355_v23 = vld [vmem:[#allocation4 + $0x8] sm:$0xff] }
 0x147   :  { %4601 = vpow2.f32 %v3513_v25 }
 0x148   :  { %4603 = vpow2.f32 %v3514_v30 }
 0x14f   :  { %v4600_v32 = vpop.eup %4599 }
 0x150   :  { %v325_v34 = vadd.f32 1.0, %v4600_v32 }
 0x151   :  { %v4602_v41 = vpop.eup %4601 }
 0x152   :  { %4605 = vrcp.f32 %v325_v34  ;;  %v334_v42 = vadd.f32 1.0, %v4602_v41  ;;  %v4604_v45 = vpop.eup %4603 }
 0x153   :  { %4607 = vtanh.f32 %v337_v33  ;;  %v345_v55 = vadd.f32 1.0, %v4604_v45 }
 0x154   :  { %4609 = vrcp.f32 %v334_v42 }
 0x155   :  { %4611 = vrcp.f32 %v345_v55 }
 0x15c   :  { %v4606_v46 = vpop.eup %4605 }
 0x15d   :  { %v4608_v50 = vpop.eup %4607 }
 0x15e   :  { %v4610_v54 = vpop.eup %4609  ;;  %v349_v58 = vmul.f32 %v4608_v50, %v4606_v46 }
 0x15f   :  { %v348_v56 = vmul.f32 %v4610_v54, %v155_v49  ;;  %v4612_v60 = vpop.eup %4611 }
 0x161   :  { %v5279_v59 = vadd.f32 %v349_v58, %v348_v56 }
 0x163   :  { %4613 = vtanh.f32 %v5279_v59 }
 0x16d   :  { %v4614_v62 = vpop.eup %4613 }
 0x16e   :  { %v352_v3 = vmul.f32 %v4614_v62, %v4612_v60 }
 0x170   :  { %353 = vst [vmem:[#allocation10] sm:$0x3] %v352_v3  ;;  %421 = vmatmul.mubr.f32.vlgmr.msra.gmra.mrb[2].mxu0 %v352_v3  ;;  %492 = vmatmul.mubr.f32.vlgmr.msra.gmra.mrb[2].mxu1 %v352_v3 }
 0x171   :  { %3691 = vmatpush1.bf16.msra.mxu0 %v5141_v9  ;;  %3723 = vmatpush1.bf16.msra.mxu1 %v5144_v13 }
 0x172   :  { %3693 = vmatprep.subr.bf16.mxu0 %v5148_v17  ;;  %3725 = vmatprep.subr.bf16.mxu1 %v5150_v18 }
 0x173   :  { %620 = vmatprep.mubr.f32.mxu0 %v5030_v0  ;;  %691 = vmatprep.mubr.f32.mxu1 %v5030_v0 }
 0x175   :  { %3695 = vmatpush1.bf16.msra.mxu0 %v5153_v22  ;;  %3727 = vmatpush1.bf16.msra.mxu1 %v5157_v26 }
 0x176   :  { %3697 = vmatprep.subr.bf16.mxu0 %v5159_v27  ;;  %3729 = vmatprep.subr.bf16.mxu1 %v5161_v31 }
 0x179   :  { %3699 = vmatpush1.bf16.msra.mxu0 %v5164_v35  ;;  %3731 = vmatpush1.bf16.msra.mxu1 %v5168_v39 }
 0x17a   :  { %3701 = vmatprep.subr.bf16.mxu0 %v5170_v40  ;;  %3733 = vmatprep.subr.bf16.mxu1 %v5173_v44 }
 0x17d   :  { %3703 = vmatpush1.bf16.msra.mxu0 %v5176_v51  ;;  %3735 = vmatpush1.bf16.msra.mxu1 %v5180_v52 }
 0x17e   :  { %3705 = vmatprep.subr.bf16.mxu0 %v5182_v53  ;;  %3737 = vmatprep.subr.bf16.mxu1 %v5185_v57 }
 0x181   :  { %3707 = vmatpush1.bf16.msra.mxu0 %v5188_v63  ;;  %3739 = vmatpush1.bf16.msra.mxu1 %v5192_v1 }
 0x182   :  { %3709 = vmatprep.subr.bf16.mxu0 %v5194_v2  ;;  %3741 = vmatprep.subr.bf16.mxu1 %v5197_v7 }
 0x185   :  { %3711 = vmatpush1.bf16.msra.mxu0 %v5200_v16  ;;  %3743 = vmatpush1.bf16.msra.mxu1 %v5204_v20 }
 0x186   :  { %3713 = vmatprep.subr.bf16.mxu0 %v5206_v21  ;;  %3745 = vmatprep.subr.bf16.mxu1 %v5212_v28 }
 0x189   :  { %3715 = vmatpush1.bf16.msra.mxu0 %v5215_v36  ;;  %3747 = vmatpush1.bf16.msra.mxu1 %v5219_v37 }
 0x18a   :  { %3717 = vmatprep.subr.bf16.mxu0 %v5221_v38  ;;  %3749 = vmatprep.subr.bf16.mxu1 %v5224_v43 }
 0x18d   :  { %3719 = vmatpush1.bf16.msra.mxu0 %v5227_v47  ;;  %3751 = vmatpush1.bf16.msra.mxu1 %v5231_v48 }
 0x18e   :  { %3753 = vmatprep.subr.bf16.mxu0 %v5137_v4  ;;  %3785 = vmatprep.subr.bf16.mxu1 %v5139_v8 }
 0x243   :  { %v422_v5 = vpop.f32.mrb[2].mxu0  ;;  %v493_v6 = vpop.f32.mrb[2].mxu1 }
 0x244   :  { %v424_v10 = vpop.f32.mrb[3].mxu0  ;;  %v495_v11 = vpop.f32.mrb[3].mxu1 }
 0x245   :  { %v502_v12 = vcombine.low %v422_v5, %v424_v10  ;;  %v503_v14 = vcombine.low %v493_v6, %v495_v11 }
 0x247   :  { %v510_v15 = vrot.slane %v502_v12, %v5275_v61  ;;  %v517_v19 = vrot.slane %v503_v14, %v5275_v61 }
 0x249   :  { %v518_v24 = vcombine.low %v510_v15, %v517_v19 }
 0x24b   :  { %v520_v25 = vadd.f32 %v518_v24, %v355_v23 }
 0x24d   :  { %v3515_v29 = vmul.f32 -1.442695, %v520_v25  ;;  %v528_v30 = vrot.slane %v520_v25, 2  ;;  %v539_v33 = vrot.slane %v520_v25, 6  ;;  %v536_v42 = vrot.slane %v520_v25, 4  ;;  %v555_v25 = vld [vmem:[#allocation4 + $0x10] sm:$0xff] }
 0x24f   :  { %4615 = vpow2.f32 %v3515_v29  ;;  %v3516_v32 = vmul.f32 -1.442695, %v528_v30  ;;  %v3517_v34 = vmul.f32 -1.442695, %v539_v33 }
 0x251   :  { %4617 = vpow2.f32 %v3516_v32 }
 0x252   :  { %4619 = vpow2.f32 %v3517_v34 }
 0x259   :  { %v4616_v41 = vpop.eup %4615 }
 0x25a   :  { %v524_v45 = vadd.f32 1.0, %v4616_v41 }
 0x25b   :  { %v4618_v46 = vpop.eup %4617 }
 0x25c   :  { %4621 = vrcp.f32 %v524_v45  ;;  %v533_v49 = vadd.f32 1.0, %v4618_v46  ;;  %v4620_v50 = vpop.eup %4619 }
 0x25d   :  { %4623 = vtanh.f32 %v536_v42  ;;  %v544_v58 = vadd.f32 1.0, %v4620_v50 }
 0x25e   :  { %4625 = vrcp.f32 %v533_v49 }
 0x25f   :  { %4627 = vrcp.f32 %v544_v58 }
 0x266   :  { %v4622_v54 = vpop.eup %4621 }
 0x267   :  { %v4624_v55 = vpop.eup %4623 }
 0x268   :  { %v4626_v56 = vpop.eup %4625  ;;  %v548_v62 = vmul.f32 %v4624_v55, %v4622_v54 }
 0x269   :  { %v547_v60 = vmul.f32 %v4626_v56, %v5279_v59  ;;  %v4628_v5 = vpop.eup %4627 }
 0x26b   :  { %v5319_v3 = vadd.f32 %v548_v62, %v547_v60 }
 0x26d   :  { %4629 = vtanh.f32 %v5319_v3 }
 0x277   :  { %v4630_v6 = vpop.eup %4629 }
 0x278   :  { %v551_v10 = vmul.f32 %v4630_v6, %v4628_v5 }
 0x27a   :  { %553 = vst [vmem:[#allocation10 + $0x2] sm:$0x3] %v551_v10  ;;  %621 = vmatmul.mubr.f32.vlgmr.msra.gmra.mrb[4].mxu0 %v551_v10  ;;  %692 = vmatmul.mubr.f32.vlgmr.msra.gmra.mrb[4].mxu1 %v551_v10 }
 0x27b   :  { %3755 = vmatpush1.bf16.msra.mxu0 %v5141_v9  ;;  %3787 = vmatpush1.bf16.msra.mxu1 %v5144_v13 }
 0x27c   :  { %3757 = vmatprep.subr.bf16.mxu0 %v5148_v17  ;;  %3789 = vmatprep.subr.bf16.mxu1 %v5150_v18 }
 0x27d   :  { %820 = vmatprep.mubr.f32.mxu0 %v5030_v0  ;;  %891 = vmatprep.mubr.f32.mxu1 %v5030_v0 }
 0x27f   :  { %3759 = vmatpush1.bf16.msra.mxu0 %v5153_v22  ;;  %3791 = vmatpush1.bf16.msra.mxu1 %v5157_v26 }
 0x280   :  { %3761 = vmatprep.subr.bf16.mxu0 %v5159_v27  ;;  %3793 = vmatprep.subr.bf16.mxu1 %v5161_v31 }
 0x283   :  { %3763 = vmatpush1.bf16.msra.mxu0 %v5164_v35  ;;  %3795 = vmatpush1.bf16.msra.mxu1 %v5168_v39 }
 0x284   :  { %3765 = vmatprep.subr.bf16.mxu0 %v5170_v40  ;;  %3797 = vmatprep.subr.bf16.mxu1 %v5173_v44 }
 0x287   :  { %3767 = vmatpush1.bf16.msra.mxu0 %v5176_v51  ;;  %3799 = vmatpush1.bf16.msra.mxu1 %v5180_v52 }
 0x288   :  { %3769 = vmatprep.subr.bf16.mxu0 %v5182_v53  ;;  %3801 = vmatprep.subr.bf16.mxu1 %v5185_v57 }
 0x28b   :  { %3771 = vmatpush1.bf16.msra.mxu0 %v5188_v63  ;;  %3803 = vmatpush1.bf16.msra.mxu1 %v5192_v1 }
 0x28c   :  { %3773 = vmatprep.subr.bf16.mxu0 %v5194_v2  ;;  %3805 = vmatprep.subr.bf16.mxu1 %v5197_v7 }
 0x28f   :  { %3775 = vmatpush1.bf16.msra.mxu0 %v5200_v16  ;;  %3807 = vmatpush1.bf16.msra.mxu1 %v5204_v20 }
 0x290   :  { %3777 = vmatprep.subr.bf16.mxu0 %v5206_v21  ;;  %3809 = vmatprep.subr.bf16.mxu1 %v5212_v28 }
 0x293   :  { %3779 = vmatpush1.bf16.msra.mxu0 %v5215_v36  ;;  %3811 = vmatpush1.bf16.msra.mxu1 %v5219_v37 }
 0x294   :  { %3781 = vmatprep.subr.bf16.mxu0 %v5221_v38  ;;  %3813 = vmatprep.subr.bf16.mxu1 %v5224_v43 }
 0x297   :  { %3783 = vmatpush1.bf16.msra.mxu0 %v5227_v47  ;;  %3815 = vmatpush1.bf16.msra.mxu1 %v5231_v48 }
 0x298   :  { %3817 = vmatprep.subr.bf16.mxu0 %v5137_v4  ;;  %3849 = vmatprep.subr.bf16.mxu1 %v5139_v8 }
 0x34d   :  { %v622_v59 = vpop.f32.mrb[4].mxu0  ;;  %v693_v11 = vpop.f32.mrb[4].mxu1 }
 0x34e   :  { %v624_v12 = vpop.f32.mrb[5].mxu0  ;;  %v695_v14 = vpop.f32.mrb[5].mxu1 }
 0x34f   :  { %v702_v15 = vcombine.low %v622_v59, %v624_v12  ;;  %v703_v19 = vcombine.low %v693_v11, %v695_v14 }
 0x351   :  { %v710_v23 = vrot.slane %v702_v15, %v5275_v61  ;;  %v717_v24 = vrot.slane %v703_v19, %v5275_v61 }
 0x353   :  { %v718_v29 = vcombine.low %v710_v23, %v717_v24 }
 0x355   :  { %v720_v30 = vadd.f32 %v718_v29, %v555_v25 }
 0x357   :  { %v3518_v32 = vmul.f32 -1.442695, %v720_v30  ;;  %v728_v33 = vrot.slane %v720_v30, 2  ;;  %v739_v41 = vrot.slane %v720_v30, 6  ;;  %v736_v46 = vrot.slane %v720_v30, 4  ;;  %v755_v30 = vld [vmem:[#allocation4 + $0x18] sm:$0xff] }
 0x359   :  { %4631 = vpow2.f32 %v3518_v32  ;;  %v3519_v34 = vmul.f32 -1.442695, %v728_v33  ;;  %v3520_v42 = vmul.f32 -1.442695, %v739_v41 }
 0x35b   :  { %4633 = vpow2.f32 %v3519_v34 }
 0x35c   :  { %4635 = vpow2.f32 %v3520_v42 }
 0x363   :  { %v4632_v45 = vpop.eup %4631 }
 0x364   :  { %v724_v49 = vadd.f32 1.0, %v4632_v45 }
 0x365   :  { %v4634_v50 = vpop.eup %4633 }
 0x366   :  { %4637 = vrcp.f32 %v724_v49  ;;  %v733_v54 = vadd.f32 1.0, %v4634_v50  ;;  %v4636_v55 = vpop.eup %4635 }
 0x367   :  { %4639 = vtanh.f32 %v736_v46  ;;  %v744_v62 = vadd.f32 1.0, %v4636_v55 }
 0x368   :  { %4641 = vrcp.f32 %v733_v54 }
 0x369   :  { %4643 = vrcp.f32 %v744_v62 }
 0x370   :  { %v4638_v56 = vpop.eup %4637 }
 0x371   :  { %v4640_v58 = vpop.eup %4639 }
 0x372   :  { %v4642_v60 = vpop.eup %4641  ;;  %v748_v6 = vmul.f32 %v4640_v58, %v4638_v56 }
 0x373   :  { %v747_v5 = vmul.f32 %v4642_v60, %v5319_v3  ;;  %v4644_v59 = vpop.eup %4643 }
 0x375   :  { %v5359_v10 = vadd.f32 %v748_v6, %v747_v5 }
 0x377   :  { %4645 = vtanh.f32 %v5359_v10 }
 0x381   :  { %v4646_v11 = vpop.eup %4645 }
 0x382   :  { %v751_v12 = vmul.f32 %v4646_v11, %v4644_v59 }
 0x384   :  { %753 = vst [vmem:[#allocation10 + $0x4] sm:$0x3] %v751_v12  ;;  %821 = vmatmul.mubr.f32.vlgmr.msra.gmra.mrb[6].mxu0 %v751_v12  ;;  %892 = vmatmul.mubr.f32.vlgmr.msra.gmra.mrb[6].mxu1 %v751_v12 }
 0x385   :  { %3819 = vmatpush1.bf16.msra.mxu0 %v5141_v9  ;;  %3851 = vmatpush1.bf16.msra.mxu1 %v5144_v13 }
 0x386   :  { %3821 = vmatprep.subr.bf16.mxu0 %v5148_v17  ;;  %3853 = vmatprep.subr.bf16.mxu1 %v5150_v18 }
 0x387   :  { %1020 = vmatprep.mubr.f32.mxu0 %v5030_v0  ;;  %1091 = vmatprep.mubr.f32.mxu1 %v5030_v0 }
 0x389   :  { %3823 = vmatpush1.bf16.msra.mxu0 %v5153_v22  ;;  %3855 = vmatpush1.bf16.msra.mxu1 %v5157_v26 }
 0x38a   :  { %3825 = vmatprep.subr.bf16.mxu0 %v5159_v27  ;;  %3857 = vmatprep.subr.bf16.mxu1 %v5161_v31 }
 0x38d   :  { %3827 = vmatpush1.bf16.msra.mxu0 %v5164_v35  ;;  %3859 = vmatpush1.bf16.msra.mxu1 %v5168_v39 }
 0x38e   :  { %3829 = vmatprep.subr.bf16.mxu0 %v5170_v40  ;;  %3861 = vmatprep.subr.bf16.mxu1 %v5173_v44 }
 0x391   :  { %3831 = vmatpush1.bf16.msra.mxu0 %v5176_v51  ;;  %3863 = vmatpush1.bf16.msra.mxu1 %v5180_v52 }
 0x392   :  { %3833 = vmatprep.subr.bf16.mxu0 %v5182_v53  ;;  %3865 = vmatprep.subr.bf16.mxu1 %v5185_v57 }
 0x395   :  { %3835 = vmatpush1.bf16.msra.mxu0 %v5188_v63  ;;  %3867 = vmatpush1.bf16.msra.mxu1 %v5192_v1 }
 0x396   :  { %3837 = vmatprep.subr.bf16.mxu0 %v5194_v2  ;;  %3869 = vmatprep.subr.bf16.mxu1 %v5197_v7 }
 0x399   :  { %3839 = vmatpush1.bf16.msra.mxu0 %v5200_v16  ;;  %3871 = vmatpush1.bf16.msra.mxu1 %v5204_v20 }
 0x39a   :  { %3841 = vmatprep.subr.bf16.mxu0 %v5206_v21  ;;  %3873 = vmatprep.subr.bf16.mxu1 %v5212_v28 }
 0x39d   :  { %3843 = vmatpush1.bf16.msra.mxu0 %v5215_v36  ;;  %3875 = vmatpush1.bf16.msra.mxu1 %v5219_v37 }
 0x39e   :  { %3845 = vmatprep.subr.bf16.mxu0 %v5221_v38  ;;  %3877 = vmatprep.subr.bf16.mxu1 %v5224_v43 }
 0x3a1   :  { %3847 = vmatpush1.bf16.msra.mxu0 %v5227_v47  ;;  %3879 = vmatpush1.bf16.msra.mxu1 %v5231_v48 }
 0x3a2   :  { %3881 = vmatprep.subr.bf16.mxu0 %v5137_v4  ;;  %3913 = vmatprep.subr.bf16.mxu1 %v5139_v8 }
 0x457   :  { %v822_v3 = vpop.f32.mrb[6].mxu0  ;;  %v893_v14 = vpop.f32.mrb[6].mxu1 }
 0x458   :  { %v824_v15 = vpop.f32.mrb[7].mxu0  ;;  %v895_v19 = vpop.f32.mrb[7].mxu1 }
 0x459   :  { %v902_v23 = vcombine.low %v822_v3, %v824_v15  ;;  %v903_v24 = vcombine.low %v893_v14, %v895_v19 }
 0x45b   :  { %v910_v25 = vrot.slane %v902_v23, %v5275_v61  ;;  %v917_v29 = vrot.slane %v903_v24, %v5275_v61 }
 0x45d   :  { %v918_v32 = vcombine.low %v910_v25, %v917_v29 }
 0x45f   :  { %v920_v33 = vadd.f32 %v918_v32, %v755_v30 }
 0x461   :  { %v3521_v34 = vmul.f32 -1.442695, %v920_v33  ;;  %v928_v41 = vrot.slane %v920_v33, 2  ;;  %v939_v45 = vrot.slane %v920_v33, 6  ;;  %v936_v50 = vrot.slane %v920_v33, 4  ;;  %v955_v33 = vld [vmem:[#allocation4 + $0x20] sm:$0xff] }
 0x463   :  { %4647 = vpow2.f32 %v3521_v34  ;;  %v3522_v42 = vmul.f32 -1.442695, %v928_v41  ;;  %v3523_v46 = vmul.f32 -1.442695, %v939_v45 }
 0x465   :  { %4649 = vpow2.f32 %v3522_v42 }
 0x466   :  { %4651 = vpow2.f32 %v3523_v46 }
 0x46d   :  { %v4648_v49 = vpop.eup %4647 }
 0x46e   :  { %v924_v54 = vadd.f32 1.0, %v4648_v49 }
 0x46f   :  { %v4650_v55 = vpop.eup %4649 }
 0x470   :  { %4653 = vrcp.f32 %v924_v54  ;;  %v933_v56 = vadd.f32 1.0, %v4650_v55  ;;  %v4652_v58 = vpop.eup %4651 }
 0x471   :  { %4655 = vtanh.f32 %v936_v50  ;;  %v944_v6 = vadd.f32 1.0, %v4652_v58 }
 0x472   :  { %4657 = vrcp.f32 %v933_v56 }
 0x473   :  { %4659 = vrcp.f32 %v944_v6 }
 0x47a   :  { %v4654_v60 = vpop.eup %4653 }
 0x47b   :  { %v4656_v62 = vpop.eup %4655 }
 0x47c   :  { %v4658_v5 = vpop.eup %4657  ;;  %v948_v11 = vmul.f32 %v4656_v62, %v4654_v60 }
 0x47d   :  { %v947_v59 = vmul.f32 %v4658_v5, %v5359_v10  ;;  %v4660_v3 = vpop.eup %4659 }
 0x47f   :  { %v5399_v12 = vadd.f32 %v948_v11, %v947_v59 }
 0x481   :  { %4661 = vtanh.f32 %v5399_v12 }
 0x48b   :  { %v4662_v14 = vpop.eup %4661 }
 0x48c   :  { %v951_v15 = vmul.f32 %v4662_v14, %v4660_v3 }
 0x48e   :  { %953 = vst [vmem:[#allocation10 + $0x6] sm:$0x3] %v951_v15  ;;  %1021 = vmatmul.mubr.f32.vlgmr.msra.gmra.mrb[8].mxu0 %v951_v15  ;;  %1092 = vmatmul.mubr.f32.vlgmr.msra.gmra.mrb[8].mxu1 %v951_v15 }
 0x48f   :  { %3883 = vmatpush1.bf16.msra.mxu0 %v5141_v9  ;;  %3915 = vmatpush1.bf16.msra.mxu1 %v5144_v13 }
 0x490   :  { %3885 = vmatprep.subr.bf16.mxu0 %v5148_v17  ;;  %3917 = vmatprep.subr.bf16.mxu1 %v5150_v18 }
 0x491   :  { %1220 = vmatprep.mubr.f32.mxu0 %v5030_v0  ;;  %1291 = vmatprep.mubr.f32.mxu1 %v5030_v0 }
 0x493   :  { %3887 = vmatpush1.bf16.msra.mxu0 %v5153_v22  ;;  %3919 = vmatpush1.bf16.msra.mxu1 %v5157_v26 }
 0x494   :  { %3889 = vmatprep.subr.bf16.mxu0 %v5159_v27  ;;  %3921 = vmatprep.subr.bf16.mxu1 %v5161_v31 }
 0x497   :  { %3891 = vmatpush1.bf16.msra.mxu0 %v5164_v35  ;;  %3923 = vmatpush1.bf16.msra.mxu1 %v5168_v39 }
 0x498   :  { %3893 = vmatprep.subr.bf16.mxu0 %v5170_v40  ;;  %3925 = vmatprep.subr.bf16.mxu1 %v5173_v44 }
 0x49b   :  { %3895 = vmatpush1.bf16.msra.mxu0 %v5176_v51  ;;  %3927 = vmatpush1.bf16.msra.mxu1 %v5180_v52 }
 0x49c   :  { %3897 = vmatprep.subr.bf16.mxu0 %v5182_v53  ;;  %3929 = vmatprep.subr.bf16.mxu1 %v5185_v57 }
 0x49f   :  { %3899 = vmatpush1.bf16.msra.mxu0 %v5188_v63  ;;  %3931 = vmatpush1.bf16.msra.mxu1 %v5192_v1 }
 0x4a0   :  { %3901 = vmatprep.subr.bf16.mxu0 %v5194_v2  ;;  %3933 = vmatprep.subr.bf16.mxu1 %v5197_v7 }
 0x4a3   :  { %3903 = vmatpush1.bf16.msra.mxu0 %v5200_v16  ;;  %3935 = vmatpush1.bf16.msra.mxu1 %v5204_v20 }
 0x4a4   :  { %3905 = vmatprep.subr.bf16.mxu0 %v5206_v21  ;;  %3937 = vmatprep.subr.bf16.mxu1 %v5212_v28 }
 0x4a7   :  { %3907 = vmatpush1.bf16.msra.mxu0 %v5215_v36  ;;  %3939 = vmatpush1.bf16.msra.mxu1 %v5219_v37 }
 0x4a8   :  { %3909 = vmatprep.subr.bf16.mxu0 %v5221_v38  ;;  %3941 = vmatprep.subr.bf16.mxu1 %v5224_v43 }
 0x4ab   :  { %3911 = vmatpush1.bf16.msra.mxu0 %v5227_v47  ;;  %3943 = vmatpush1.bf16.msra.mxu1 %v5231_v48 }
 0x4ac   :  { %3945 = vmatprep.subr.bf16.mxu0 %v5137_v4  ;;  %3977 = vmatprep.subr.bf16.mxu1 %v5139_v8 }
 0x561   :  { %v1022_v10 = vpop.f32.mrb[8].mxu0  ;;  %v1093_v19 = vpop.f32.mrb[8].mxu1 }
 0x562   :  { %v1024_v23 = vpop.f32.mrb[9].mxu0  ;;  %v1095_v24 = vpop.f32.mrb[9].mxu1 }
 0x563   :  { %v1102_v25 = vcombine.low %v1022_v10, %v1024_v23  ;;  %v1103_v29 = vcombine.low %v1093_v19, %v1095_v24 }
 0x565   :  { %v1110_v30 = vrot.slane %v1102_v25, %v5275_v61  ;;  %v1117_v32 = vrot.slane %v1103_v29, %v5275_v61 }
 0x567   :  { %v1118_v34 = vcombine.low %v1110_v30, %v1117_v32 }
 0x569   :  { %v1120_v41 = vadd.f32 %v1118_v34, %v955_v33 }
 0x56b   :  { %v3524_v42 = vmul.f32 -1.442695, %v1120_v41  ;;  %v1128_v45 = vrot.slane %v1120_v41, 2  ;;  %v1139_v49 = vrot.slane %v1120_v41, 6  ;;  %v1136_v55 = vrot.slane %v1120_v41, 4  ;;  %v1155_v41 = vld [vmem:[#allocation4 + $0x28] sm:$0xff] }
 0x56d   :  { %4663 = vpow2.f32 %v3524_v42  ;;  %v3525_v46 = vmul.f32 -1.442695, %v1128_v45  ;;  %v3526_v50 = vmul.f32 -1.442695, %v1139_v49 }
 0x56f   :  { %4665 = vpow2.f32 %v3525_v46 }
 0x570   :  { %4667 = vpow2.f32 %v3526_v50 }
 0x577   :  { %v4664_v54 = vpop.eup %4663 }
 0x578   :  { %v1124_v56 = vadd.f32 1.0, %v4664_v54 }
 0x579   :  { %v4666_v58 = vpop.eup %4665 }
 0x57a   :  { %4669 = vrcp.f32 %v1124_v56  ;;  %v1133_v60 = vadd.f32 1.0, %v4666_v58  ;;  %v4668_v62 = vpop.eup %4667 }
 0x57b   :  { %4671 = vtanh.f32 %v1136_v55  ;;  %v1144_v11 = vadd.f32 1.0, %v4668_v62 }
 0x57c   :  { %4673 = vrcp.f32 %v1133_v60 }
 0x57d   :  { %4675 = vrcp.f32 %v1144_v11 }
 0x584   :  { %v4670_v5 = vpop.eup %4669 }
 0x585   :  { %v4672_v6 = vpop.eup %4671 }
 0x586   :  { %v4674_v59 = vpop.eup %4673  ;;  %v1148_v14 = vmul.f32 %v4672_v6, %v4670_v5 }
 0x587   :  { %v1147_v3 = vmul.f32 %v4674_v59, %v5399_v12  ;;  %v4676_v10 = vpop.eup %4675 }
 0x589   :  { %v5439_v15 = vadd.f32 %v1148_v14, %v1147_v3 }
 0x58b   :  { %4677 = vtanh.f32 %v5439_v15 }
 0x595   :  { %v4678_v19 = vpop.eup %4677 }
 0x596   :  { %v1151_v23 = vmul.f32 %v4678_v19, %v4676_v10 }
 0x598   :  { %1153 = vst [vmem:[#allocation10 + $0x8] sm:$0x3] %v1151_v23  ;;  %1221 = vmatmul.mubr.f32.vlgmr.msra.gmra.mrb[10].mxu0 %v1151_v23  ;;  %1292 = vmatmul.mubr.f32.vlgmr.msra.gmra.mrb[10].mxu1 %v1151_v23 }
 0x599   :  { %3947 = vmatpush1.bf16.msra.mxu0 %v5141_v9  ;;  %3979 = vmatpush1.bf16.msra.mxu1 %v5144_v13 }
 0x59a   :  { %3949 = vmatprep.subr.bf16.mxu0 %v5148_v17  ;;  %3981 = vmatprep.subr.bf16.mxu1 %v5150_v18 }
 0x59b   :  { %1420 = vmatprep.mubr.f32.mxu0 %v5030_v0  ;;  %1491 = vmatprep.mubr.f32.mxu1 %v5030_v0 }
 0x59d   :  { %3951 = vmatpush1.bf16.msra.mxu0 %v5153_v22  ;;  %3983 = vmatpush1.bf16.msra.mxu1 %v5157_v26 }
 0x59e   :  { %3953 = vmatprep.subr.bf16.mxu0 %v5159_v27  ;;  %3985 = vmatprep.subr.bf16.mxu1 %v5161_v31 }
 0x5a1   :  { %3955 = vmatpush1.bf16.msra.mxu0 %v5164_v35  ;;  %3987 = vmatpush1.bf16.msra.mxu1 %v5168_v39 }
 0x5a2   :  { %3957 = vmatprep.subr.bf16.mxu0 %v5170_v40  ;;  %3989 = vmatprep.subr.bf16.mxu1 %v5173_v44 }
 0x5a5   :  { %3959 = vmatpush1.bf16.msra.mxu0 %v5176_v51  ;;  %3991 = vmatpush1.bf16.msra.mxu1 %v5180_v52 }
 0x5a6   :  { %3961 = vmatprep.subr.bf16.mxu0 %v5182_v53  ;;  %3993 = vmatprep.subr.bf16.mxu1 %v5185_v57 }
 0x5a9   :  { %3963 = vmatpush1.bf16.msra.mxu0 %v5188_v63  ;;  %3995 = vmatpush1.bf16.msra.mxu1 %v5192_v1 }
 0x5aa   :  { %3965 = vmatprep.subr.bf16.mxu0 %v5194_v2  ;;  %3997 = vmatprep.subr.bf16.mxu1 %v5197_v7 }
 0x5ad   :  { %3967 = vmatpush1.bf16.msra.mxu0 %v5200_v16  ;;  %3999 = vmatpush1.bf16.msra.mxu1 %v5204_v20 }
 0x5ae   :  { %3969 = vmatprep.subr.bf16.mxu0 %v5206_v21  ;;  %4001 = vmatprep.subr.bf16.mxu1 %v5212_v28 }
 0x5b1   :  { %3971 = vmatpush1.bf16.msra.mxu0 %v5215_v36  ;;  %4003 = vmatpush1.bf16.msra.mxu1 %v5219_v37 }
 0x5b2   :  { %3973 = vmatprep.subr.bf16.mxu0 %v5221_v38  ;;  %4005 = vmatprep.subr.bf16.mxu1 %v5224_v43 }
 0x5b5   :  { %3975 = vmatpush1.bf16.msra.mxu0 %v5227_v47  ;;  %4007 = vmatpush1.bf16.msra.mxu1 %v5231_v48 }
 0x5b6   :  { %4009 = vmatprep.subr.bf16.mxu0 %v5137_v4  ;;  %4041 = vmatprep.subr.bf16.mxu1 %v5139_v8 }
 0x66b   :  { %v1222_v12 = vpop.f32.mrb[10].mxu0  ;;  %v1293_v24 = vpop.f32.mrb[10].mxu1 }
 0x66c   :  { %v1224_v25 = vpop.f32.mrb[11].mxu0  ;;  %v1295_v29 = vpop.f32.mrb[11].mxu1 }
 0x66d   :  { %v1302_v30 = vcombine.low %v1222_v12, %v1224_v25  ;;  %v1303_v32 = vcombine.low %v1293_v24, %v1295_v29 }
 0x66f   :  { %v1310_v33 = vrot.slane %v1302_v30, %v5275_v61  ;;  %v1317_v34 = vrot.slane %v1303_v32, %v5275_v61 }
 0x671   :  { %v1318_v42 = vcombine.low %v1310_v33, %v1317_v34  ;;  %v1762_v33 = vld [vmem:[#allocation9 + $0x200] sm:$0xff] }
 0x672   :  { %v1766_v34 = vld [vmem:[#allocation9 + $0x220] sm:$0xff] }
 0x673   :  { %v1320_v45 = vadd.f32 %v1318_v42, %v1155_v41  ;;  %v1764_v41 = vld [vmem:[#allocation9 + $0x210] sm:$0xff] }
 0x674   :  { %v1768_v42 = vld [vmem:[#allocation9 + $0x230] sm:$0xff] }
 0x675   :  { %v3527_v46 = vmul.f32 -1.442695, %v1320_v45  ;;  %v1328_v49 = vrot.slane %v1320_v45, 2  ;;  %v1339_v4 = vrot.slane %v1320_v45, 6  ;;  %v1336_v55 = vrot.slane %v1320_v45, 4  ;;  %v1771_v45 = vld [vmem:[#allocation9 + $0x248] sm:$0xff] }
 0x677   :  { %4679 = vpow2.f32 %v3527_v46  ;;  %v3528_v50 = vmul.f32 -1.442695, %v1328_v49  ;;  %v3529_v8 = vmul.f32 -1.442695, %v1339_v4  ;;  %v1775_v46 = vld [vmem:[#allocation9 + $0x268] sm:$0xff]  ;;  %v1773_v49 = vld [vmem:[#allocation9 + $0x258] sm:$0xff] }
 0x679   :  { %4681 = vpow2.f32 %v3528_v50  ;;  %v1777_v50 = vld [vmem:[#allocation9 + $0x278] sm:$0xff] }
 0x67a   :  { %4683 = vpow2.f32 %v3529_v8 }
 0x681   :  { %v4680_v54 = vpop.eup %4679 }
 0x682   :  { %v1324_v56 = vadd.f32 1.0, %v4680_v54  ;;  %v5529_v54 = vpack.c.bf16 %v1766_v34, %v1762_v33 }
 0x683   :  { %v4682_v58 = vpop.eup %4681 }
 0x684   :  { %4685 = vrcp.f32 %v1324_v56  ;;  %v1333_v60 = vadd.f32 1.0, %v4682_v58  ;;  %v4684_v62 = vpop.eup %4683  ;;  %v1770_v56 = vld [vmem:[#allocation9 + $0x240] sm:$0xff] }
 0x685   :  { %4687 = vtanh.f32 %v1336_v55  ;;  %v1344_v11 = vadd.f32 1.0, %v4684_v62  ;;  %v5531_v55 = vpack.c.bf16 %v1768_v42, %v1764_v41  ;;  %v1774_v58 = vld [vmem:[#allocation9 + $0x260] sm:$0xff]  ;;  %v5533_v62 = vpack.c.bf16 %v1775_v46, %v1771_v45 }
 0x686   :  { %4689 = vrcp.f32 %v1333_v60  ;;  %v1802_v41 = vld [vmem:[#allocation9 + $0x340] sm:$0xff] }
 0x687   :  { %4691 = vrcp.f32 %v1344_v11  ;;  %v1779_v11 = vld [vmem:[#allocation9 + $0x288] sm:$0xff]  ;;  %v1806_v42 = vld [vmem:[#allocation9 + $0x360] sm:$0xff] }
 0x68e   :  { %v4686_v5 = vpop.eup %4685 }
 0x68f   :  { %v4688_v6 = vpop.eup %4687 }
 0x690   :  { %v4690_v59 = vpop.eup %4689  ;;  %v1348_v14 = vmul.f32 %v4688_v6, %v4686_v5  ;;  %v5535_v5 = vpack.c.bf16 %v1777_v50, %v1773_v49  ;;  %v1772_v6 = vld [vmem:[#allocation9 + $0x250] sm:$0xff] }
 0x691   :  { %v1347_v3 = vmul.f32 %v4690_v59, %v5439_v15  ;;  %v4692_v19 = vpop.eup %4691  ;;  %v1776_v59 = vld [vmem:[#allocation9 + $0x270] sm:$0xff] }
 0x692   :  { %v1804_v49 = vld [vmem:[#allocation9 + $0x350] sm:$0xff] }
 0x693   :  { %v5479_v10 = vadd.f32 %v1348_v14, %v1347_v3  ;;  %v1783_v3 = vld [vmem:[#allocation9 + $0x2a8] sm:$0xff]  ;;  %v1781_v14 = vld [vmem:[#allocation9 + $0x298] sm:$0xff]  ;;  %v1808_v50 = vld [vmem:[#allocation9 + $0x370] sm:$0xff] }
 0x695   :  { %4693 = vtanh.f32 %v5479_v10 }
 0x69f   :  { %v4694_v23 = vpop.eup %4693 }
 0x6a0   :  { %v1351_v12 = vmul.f32 %v4694_v23, %v4692_v19  ;;  %v5539_v19 = vpack.c.bf16 %v1774_v58, %v1770_v56  ;;  %v5541_v23 = vpack.c.bf16 %v1776_v59, %v1772_v6  ;;  %v1813_v56 = vld [vmem:[#allocation9 + $0x398] sm:$0xff]  ;;  %v5591_v6 = vpack.c.bf16 %v1808_v50, %v1804_v49  ;;  %v1810_v59 = vld [vmem:[#allocation9 + $0x380] sm:$0xff] }
 0x6a1   :  { %v1817_v58 = vld [vmem:[#allocation9 + $0x3b8] sm:$0xff] }
 0x6a2   :  { %1353 = vst [vmem:[#allocation10 + $0xa] sm:$0x3] %v1351_v12  ;;  %1421 = vmatmul.mubr.f32.vlgmr.msra.gmra.mrb[12].mxu0 %v1351_v12  ;;  %1492 = vmatmul.mubr.f32.vlgmr.msra.gmra.mrb[12].mxu1 %v1351_v12  ;;  %v1778_v12 = vld [vmem:[#allocation9 + $0x280] sm:$0xff] }
 0x6a3   :  { %4011 = vmatpush1.bf16.msra.mxu0 %v5141_v9  ;;  %4043 = vmatpush1.bf16.msra.mxu1 %v5144_v13  ;;  %v1763_v9 = vld [vmem:[#allocation9 + $0x208] sm:$0xff] }
 0x6a4   :  { %4013 = vmatprep.subr.bf16.mxu0 %v5148_v17  ;;  %4045 = vmatprep.subr.bf16.mxu1 %v5150_v18  ;;  %v1767_v13 = vld [vmem:[#allocation9 + $0x228] sm:$0xff]  ;;  %v1765_v17 = vld [vmem:[#allocation9 + $0x218] sm:$0xff] }
 0x6a5   :  { %1620 = vmatprep.mubr.f32.mxu0 %v5030_v0  ;;  %1691 = vmatprep.mubr.f32.mxu1 %v5030_v0  ;;  %v5514_v18 = vpack.c.bf16 %v1767_v13, %v1763_v9  ;;  %v1782_v9 = vld [vmem:[#allocation9 + $0x2a0] sm:$0xff]  ;;  %v5545_v13 = vpack.c.bf16 %v1783_v3, %v1779_v11 }
 0x6a6   :  { %v1814_v11 = vld [vmem:[#allocation9 + $0x3a0] sm:$0xff] }
 0x6a7   :  { %4015 = vmatpush1.bf16.msra.mxu0 %v5153_v22  ;;  %4047 = vmatpush1.bf16.msra.mxu1 %v5157_v26  ;;  %v1769_v22 = vld [vmem:[#allocation9 + $0x238] sm:$0xff] }
 0x6a8   :  { %4017 = vmatprep.subr.bf16.mxu0 %v5159_v27  ;;  %4049 = vmatprep.subr.bf16.mxu1 %v5161_v31  ;;  %v5516_v26 = vpack.c.bf16 %v1769_v22, %v1765_v17  ;;  %v83_v27 = vld [vmem:[%s5975_s3 + $0x2] sm:$0x3]  ;;  %v1780_v22 = vld [vmem:[#allocation9 + $0x290] sm:$0xff] }
 0x6a9   :  { %85 = vst [vmem:[#allocation2 + $0x2] sm:$0x3] %v83_v27  ;;  %v1784_v27 = vld [vmem:[#allocation9 + $0x2b0] sm:$0xff] }
 0x6ab   :  { %4019 = vmatpush1.bf16.msra.mxu0 %v5164_v35  ;;  %4051 = vmatpush1.bf16.msra.mxu1 %v5168_v39 }
 0x6ac   :  { %4021 = vmatprep.subr.bf16.mxu0 %v5170_v40  ;;  %4053 = vmatprep.subr.bf16.mxu1 %v5173_v44 }
 0x6af   :  { %4023 = vmatpush1.bf16.msra.mxu0 %v5176_v51  ;;  %4055 = vmatpush1.bf16.msra.mxu1 %v5180_v52 }
 0x6b0   :  { %4025 = vmatprep.subr.bf16.mxu0 %v5182_v53  ;;  %4057 = vmatprep.subr.bf16.mxu1 %v5185_v57  ;;  %v1355_v57 = vld [vmem:[#allocation4 + $0x30] sm:$0xff] }
 0x6b3   :  { %4027 = vmatpush1.bf16.msra.mxu0 %v5188_v63  ;;  %4059 = vmatpush1.bf16.msra.mxu1 %v5192_v1 }
 0x6b4   :  { %4029 = vmatprep.subr.bf16.mxu0 %v5194_v2  ;;  %4061 = vmatprep.subr.bf16.mxu1 %v5197_v7 }
 0x6b7   :  { %4031 = vmatpush1.bf16.msra.mxu0 %v5200_v16  ;;  %4063 = vmatpush1.bf16.msra.mxu1 %v5204_v20 }
 0x6b8   :  { %4033 = vmatprep.subr.bf16.mxu0 %v5206_v21  ;;  %4065 = vmatprep.subr.bf16.mxu1 %v5212_v28 }
 0x6bb   :  { %4035 = vmatpush1.bf16.msra.mxu0 %v5215_v36  ;;  %4067 = vmatpush1.bf16.msra.mxu1 %v5219_v37 }
 0x6bc   :  { %4037 = vmatprep.subr.bf16.mxu0 %v5221_v38  ;;  %4069 = vmatprep.subr.bf16.mxu1 %v5224_v43 }
 0x6bf   :  { %4039 = vmatpush1.bf16.msra.mxu0 %v5227_v47  ;;  %4071 = vmatpush1.bf16.msra.mxu1 %v5231_v48 }
 0x6c0   :  { %4073 = vmatprep.subr.bf16.mxu0 %v5514_v18  ;;  %4105 = vmatprep.subr.bf16.mxu1 %v5516_v26 }
 0x775   :  { %v1422_v31 = vpop.f32.mrb[12].mxu0  ;;  %v1493_v35 = vpop.f32.mrb[12].mxu1 }
 0x776   :  { %v1424_v39 = vpop.f32.mrb[13].mxu0  ;;  %v1495_v40 = vpop.f32.mrb[13].mxu1 }
 0x777   :  { %v1502_v44 = vcombine.low %v1422_v31, %v1424_v39  ;;  %v1503_v51 = vcombine.low %v1493_v35, %v1495_v40  ;;  %v1787_v31 = vld [vmem:[#allocation9 + $0x2c8] sm:$0xff]  ;;  %v1789_v39 = vld [vmem:[#allocation9 + $0x2d8] sm:$0xff] }
 0x778   :  { %v1791_v35 = vld [vmem:[#allocation9 + $0x2e8] sm:$0xff]  ;;  %v1793_v40 = vld [vmem:[#allocation9 + $0x2f8] sm:$0xff] }
 0x779   :  { %v1510_v52 = vrot.slane %v1502_v44, %v5275_v61  ;;  %v1517_v53 = vrot.slane %v1503_v51, %v5275_v61  ;;  %v5553_v44 = vpack.c.bf16 %v1782_v9, %v1778_v12  ;;  %v5555_v51 = vpack.c.bf16 %v1784_v27, %v1780_v22  ;;  %v1816_v12 = vld [vmem:[#allocation9 + $0x3b0] sm:$0xff]  ;;  %v1819_v9 = vld [vmem:[#allocation9 + $0x3c8] sm:$0xff]  ;;  %v1821_v27 = vld [vmem:[#allocation9 + $0x3d8] sm:$0xff] }
 0x77a   :  { %v1823_v22 = vld [vmem:[#allocation9 + $0x3e8] sm:$0xff] }
 0x77b   :  { %v1518_v63 = vcombine.low %v1510_v52, %v1517_v53  ;;  %v1786_v52 = vld [vmem:[#allocation9 + $0x2c0] sm:$0xff] }
 0x77c   :  { %v1790_v53 = vld [vmem:[#allocation9 + $0x2e0] sm:$0xff] }
 0x77d   :  { %v1520_v1 = vadd.f32 %v1518_v63, %v1355_v57  ;;  %v5559_v57 = vpack.c.bf16 %v1791_v35, %v1787_v31  ;;  %v5561_v63 = vpack.c.bf16 %v1793_v40, %v1789_v39  ;;  %v1825_v31 = vld [vmem:[#allocation9 + $0x3f8] sm:$0xff]  ;;  %v5601_v35 = vpack.c.bf16 %v1814_v11, %v1810_v59  ;;  %v1818_v40 = vld [vmem:[#allocation9 + $0x3c0] sm:$0xff] }
 0x77f   :  { %v3530_v2 = vmul.f32 -1.442695, %v1520_v1  ;;  %v1528_v7 = vrot.slane %v1520_v1, 2  ;;  %v1539_v20 = vrot.slane %v1520_v1, 6  ;;  %v1536_v36 = vrot.slane %v1520_v1, 4  ;;  %v1788_v1 = vld [vmem:[#allocation9 + $0x2d0] sm:$0xff] }
 0x781   :  { %4695 = vpow2.f32 %v3530_v2  ;;  %v3531_v16 = vmul.f32 -1.442695, %v1528_v7  ;;  %v3532_v21 = vmul.f32 -1.442695, %v1539_v20  ;;  %v1792_v2 = vld [vmem:[#allocation9 + $0x2f0] sm:$0xff]  ;;  %v1795_v7 = vld [vmem:[#allocation9 + $0x308] sm:$0xff] }
 0x782   :  { %v1797_v20 = vld [vmem:[#allocation9 + $0x318] sm:$0xff] }
 0x783   :  { %4697 = vpow2.f32 %v3531_v16  ;;  %v1799_v16 = vld [vmem:[#allocation9 + $0x328] sm:$0xff] }
 0x784   :  { %4699 = vpow2.f32 %v3532_v21  ;;  %v1801_v21 = vld [vmem:[#allocation9 + $0x338] sm:$0xff] }
 0x78b   :  { %v4696_v28 = vpop.eup %4695 }
 0x78c   :  { %v1524_v37 = vadd.f32 1.0, %v4696_v28  ;;  %v5565_v28 = vpack.c.bf16 %v1790_v53, %v1786_v52  ;;  %v5607_v52 = vpack.c.bf16 %v1823_v22, %v1819_v9  ;;  %v5609_v53 = vpack.c.bf16 %v1825_v31, %v1821_v27 }
 0x78d   :  { %v4698_v38 = vpop.eup %4697 }
 0x78e   :  { %4701 = vrcp.f32 %v1524_v37  ;;  %v1533_v43 = vadd.f32 1.0, %v4698_v38  ;;  %v4700_v47 = vpop.eup %4699  ;;  %v1794_v37 = vld [vmem:[#allocation9 + $0x300] sm:$0xff] }
 0x78f   :  { %4703 = vtanh.f32 %v1536_v36  ;;  %v1544_v25 = vadd.f32 1.0, %v4700_v47  ;;  %v5567_v36 = vpack.c.bf16 %v1792_v2, %v1788_v1  ;;  %v1798_v38 = vld [vmem:[#allocation9 + $0x320] sm:$0xff]  ;;  %v5573_v47 = vpack.c.bf16 %v1801_v21, %v1797_v20  ;;  %v1820_v2 = vld [vmem:[#allocation9 + $0x3d0] sm:$0xff]  ;;  %v1827_v21 = vld [vmem:[#allocation2 + $0x2] sm:$0x3] }
 0x790   :  { %4705 = vrcp.f32 %v1533_v43  ;;  %v5571_v43 = vpack.c.bf16 %v1799_v16, %v1795_v7  ;;  %v5577_v33 = vpack.c.bf16 %v1798_v38, %v1794_v37  ;;  %v1822_v1 = vld [vmem:[#allocation9 + $0x3e0] sm:$0xff]  ;;  %v1824_v7 = vld [vmem:[#allocation9 + $0x3f0] sm:$0xff]  ;;  %v87_v37 = vld [vmem:[%s5976_s4 + $0x2] sm:$0x3]  ;;  %s5032_s4 = smov [#allocation10]  }
 0x791   :  { %4707 = vrcp.f32 %v1544_v25  ;;  %v1807_v25 = vld [vmem:[#allocation9 + $0x368] sm:$0xff]  ;;  %v5613_v16 = vpack.c.bf16 %v1822_v1, %v1818_v40  ;;  %v5615_v20 = vpack.c.bf16 %v1824_v7, %v1820_v2  ;;  %89 = vst [vmem:[#allocation3 + $0x2] sm:$0x3] %v87_v37  ;;  %s3442_s13 = sshll.u32 %s5032_s4, 4  ;;  %s3443_s13 = int_to_ptr.vmem [resolvable:$true] %s3442_s13 }
 0x792   :  { %s4924_s29 = scalar_lea.vmem %s3443_s13, 256  ;;  %p4929_p3 = scmp.lt.s32.totalorder %s3443_s13, %s3443_s13 }
 0x793   :  { %p4925_p2 = scmp.ne.s32.totalorder %s3443_s13, %s4924_s29  ;;  %p4930_p4 = scmp.lt.s32.totalorder %s4924_s29, %s4924_s29 }
 0x795   :  { %p4931_p5 = por %p4930_p4, %p4929_p3 }
 0x797   :  { %p4932_p6 = pnand %p4931_p5, %p4925_p2 }
 0x798   :  { %v4702_v48 = vpop.eup %4701 }
 0x799   :  { %v4704_v15 = vpop.eup %4703 }
 0x79a   :  { %v4706_v24 = vpop.eup %4705  ;;  %v1548_v30 = vmul.f32 %v4704_v15, %v4702_v48  ;;  %v1796_v48 = vld [vmem:[#allocation9 + $0x310] sm:$0xff] }
 0x79b   :  { %v1547_v29 = vmul.f32 %v4706_v24, %v5479_v10  ;;  %v4708_v4 = vpop.eup %4707  ;;  %v1785_v10 = vld [vmem:[#allocation9 + $0x2b8] sm:$0xff]  ;;  %v1800_v15 = vld [vmem:[#allocation9 + $0x330] sm:$0xff]  ;;  %v1803_v24 = vld [vmem:[#allocation9 + $0x348] sm:$0xff] }
 0x79c   :  { %v5547_v17 = vpack.c.bf16 %v1785_v10, %v1781_v14  ;;  %v5579_v34 = vpack.c.bf16 %v1800_v15, %v1796_v48  ;;  %v5583_v45 = vpack.c.bf16 %v1807_v25, %v1803_v24  ;;  %v5597_v14 = vpack.c.bf16 %v1817_v58, %v1813_v56  ;;  %v1812_v10 = vld [vmem:[#allocation9 + $0x390] sm:$0xff] }
 0x79d   :  { %v5526_v32 = vadd.f32 %v1548_v30, %v1547_v29  ;;  %v1805_v29 = vld [vmem:[#allocation9 + $0x358] sm:$0xff]  ;;  %v5603_v39 = vpack.c.bf16 %v1816_v12, %v1812_v10 }
 0x79e   :  { %v1809_v30 = vld [vmem:[#allocation9 + $0x378] sm:$0xff] }
 0x79f   :  { %4709 = vtanh.f32 %v5526_v32  ;;  %v5585_v46 = vpack.c.bf16 %v1809_v30, %v1805_v29 }
 0x7a9   :  { %v4710_v8 = vpop.eup %4709 }
 0x7aa   :  { %v1551_v60 = vmul.f32 %v4710_v8, %v4708_v4  ;;  %v1811_v4 = vld [vmem:[#allocation9 + $0x388] sm:$0xff] }
 0x7ab   :  { %v1815_v8 = vld [vmem:[#allocation9 + $0x3a8] sm:$0xff] }
 0x7ac   :  { %1553 = vst [vmem:[#allocation10 + $0xc] sm:$0x3] %v1551_v60  ;;  %1621 = vmatmul.mubr.f32.vlgmr.msra.gmra.mrb[14].mxu0 %v1551_v60  ;;  %1692 = vmatmul.mubr.f32.vlgmr.msra.gmra.mrb[14].mxu1 %v1551_v60  ;;  %v5589_v60 = vpack.c.bf16 %v1806_v42, %v1802_v41  ;;  %v5595_v3 = vpack.c.bf16 %v1815_v8, %v1811_v4  ;;  %v1555_v42 = vld [vmem:[#allocation4 + $0x38] sm:$0xff] }
 0x7ad   :  { %4075 = vmatpush1.bf16.msra.mxu0 %v5529_v54  ;;  %4107 = vmatpush1.bf16.msra.mxu1 %v5531_v55 }
 0x7ae   :  { %4077 = vmatprep.subr.bf16.mxu0 %v5533_v62  ;;  %4109 = vmatprep.subr.bf16.mxu1 %v5535_v5 }
 0x7af   :  { %1896 = vmatprep.mubr.f32.mxu0 %v5030_v0  ;;  %1967 = vmatprep.mubr.f32.mxu1 %v5030_v0 }
 0x7b1   :  { %4079 = vmatpush1.bf16.msra.mxu0 %v5539_v19  ;;  %4111 = vmatpush1.bf16.msra.mxu1 %v5541_v23 }
 0x7b2   :  { %4081 = vmatprep.subr.bf16.mxu0 %v5545_v13  ;;  %4113 = vmatprep.subr.bf16.mxu1 %v5547_v17 }
 0x7b5   :  { %4083 = vmatpush1.bf16.msra.mxu0 %v5553_v44  ;;  %4115 = vmatpush1.bf16.msra.mxu1 %v5555_v51 }
 0x7b6   :  { %4085 = vmatprep.subr.bf16.mxu0 %v5559_v57  ;;  %4117 = vmatprep.subr.bf16.mxu1 %v5561_v63 }
 0x7b9   :  { %4087 = vmatpush1.bf16.msra.mxu0 %v5565_v28  ;;  %4119 = vmatpush1.bf16.msra.mxu1 %v5567_v36 }
 0x7ba   :  { %4089 = vmatprep.subr.bf16.mxu0 %v5571_v43  ;;  %4121 = vmatprep.subr.bf16.mxu1 %v5573_v47 }
 0x7bd   :  { %4091 = vmatpush1.bf16.msra.mxu0 %v5577_v33  ;;  %4123 = vmatpush1.bf16.msra.mxu1 %v5579_v34 }
 0x7be   :  { %4093 = vmatprep.subr.bf16.mxu0 %v5583_v45  ;;  %4125 = vmatprep.subr.bf16.mxu1 %v5585_v46 }
 0x7c1   :  { %4095 = vmatpush1.bf16.msra.mxu0 %v5589_v60  ;;  %4127 = vmatpush1.bf16.msra.mxu1 %v5591_v6 }
 0x7c2   :  { %4097 = vmatprep.subr.bf16.mxu0 %v5595_v3  ;;  %4129 = vmatprep.subr.bf16.mxu1 %v5597_v14 }
 0x7c5   :  { %4099 = vmatpush1.bf16.msra.mxu0 %v5601_v35  ;;  %4131 = vmatpush1.bf16.msra.mxu1 %v5603_v39 }
 0x7c6   :  { %4101 = vmatprep.subr.bf16.mxu0 %v5607_v52  ;;  %4133 = vmatprep.subr.bf16.mxu1 %v5609_v53 }
 0x7c9   :  { %4103 = vmatpush1.bf16.msra.mxu0 %v5613_v16  ;;  %4135 = vmatpush1.bf16.msra.mxu1 %v5615_v20 }
 0x7ca   :  { %4137 = vmatprep.subr.bf16.mxu0 %v5514_v18  ;;  %4169 = vmatprep.subr.bf16.mxu1 %v5516_v26 }
 0x7cc   :  { %1897 = vmatmul.mubr.f32.vlgmr.msra.gmra.mrb[16].mxu0 %v1827_v21  ;;  %1968 = vmatmul.mubr.f32.vlgmr.msra.gmra.mrb[16].mxu1 %v1827_v21 }
 0x7cd   :  { %4139 = vmatpush1.bf16.msra.mxu0 %v5529_v54  ;;  %4171 = vmatpush1.bf16.msra.mxu1 %v5531_v55 }
 0x7ce   :  { %4141 = vmatprep.subr.bf16.mxu0 %v5533_v62  ;;  %4173 = vmatprep.subr.bf16.mxu1 %v5535_v5 }
 0x7cf   :  { %2096 = vmatprep.mubr.f32.mxu0 %v5030_v0  ;;  %2167 = vmatprep.mubr.f32.mxu1 %v5030_v0 }
 0x7d1   :  { %4143 = vmatpush1.bf16.msra.mxu0 %v5539_v19  ;;  %4175 = vmatpush1.bf16.msra.mxu1 %v5541_v23 }
 0x7d2   :  { %4145 = vmatprep.subr.bf16.mxu0 %v5545_v13  ;;  %4177 = vmatprep.subr.bf16.mxu1 %v5547_v17 }
 0x7d5   :  { %4147 = vmatpush1.bf16.msra.mxu0 %v5553_v44  ;;  %4179 = vmatpush1.bf16.msra.mxu1 %v5555_v51 }
 0x7d6   :  { %4149 = vmatprep.subr.bf16.mxu0 %v5559_v57  ;;  %4181 = vmatprep.subr.bf16.mxu1 %v5561_v63 }
 0x7d9   :  { %4151 = vmatpush1.bf16.msra.mxu0 %v5565_v28  ;;  %4183 = vmatpush1.bf16.msra.mxu1 %v5567_v36 }
 0x7da   :  { %4153 = vmatprep.subr.bf16.mxu0 %v5571_v43  ;;  %4185 = vmatprep.subr.bf16.mxu1 %v5573_v47 }
 0x7dd   :  { %4155 = vmatpush1.bf16.msra.mxu0 %v5577_v33  ;;  %4187 = vmatpush1.bf16.msra.mxu1 %v5579_v34 }
 0x7de   :  { %4157 = vmatprep.subr.bf16.mxu0 %v5583_v45  ;;  %4189 = vmatprep.subr.bf16.mxu1 %v5585_v46 }
 0x7e1   :  { %4159 = vmatpush1.bf16.msra.mxu0 %v5589_v60  ;;  %4191 = vmatpush1.bf16.msra.mxu1 %v5591_v6 }
 0x7e2   :  { %4161 = vmatprep.subr.bf16.mxu0 %v5595_v3  ;;  %4193 = vmatprep.subr.bf16.mxu1 %v5597_v14 }
 0x7e5   :  { %4163 = vmatpush1.bf16.msra.mxu0 %v5601_v35  ;;  %4195 = vmatpush1.bf16.msra.mxu1 %v5603_v39 }
 0x7e6   :  { %4165 = vmatprep.subr.bf16.mxu0 %v5607_v52  ;;  %4197 = vmatprep.subr.bf16.mxu1 %v5609_v53 }
 0x7e9   :  { %4167 = vmatpush1.bf16.msra.mxu0 %v5613_v16  ;;  %4199 = vmatpush1.bf16.msra.mxu1 %v5615_v20 }
 0x7ea   :  { %4201 = vmatprep.subr.bf16.mxu0 %v5514_v18  ;;  %4233 = vmatprep.subr.bf16.mxu1 %v5516_v26 }
 0x87f   :  { %v1622_v38 = vpop.f32.mrb[14].mxu0  ;;  %v1693_v48 = vpop.f32.mrb[14].mxu1 }
 0x880   :  { %v1624_v15 = vpop.f32.mrb[15].mxu0  ;;  %v1695_v24 = vpop.f32.mrb[15].mxu1 }
 0x881   :  { %v1702_v25 = vcombine.low %v1622_v38, %v1624_v15  ;;  %v1703_v29 = vcombine.low %v1693_v48, %v1695_v24 }
 0x883   :  { %v1710_v30 = vrot.slane %v1702_v25, %v5275_v61  ;;  %v1717_v41 = vrot.slane %v1703_v29, %v5275_v61  ;;  %v1831_v29 = vld [vmem:[#allocation7 + $0x38] sm:$0xff] }
 0x885   :  { %v1718_v49 = vcombine.low %v1710_v30, %v1717_v41 }
 0x887   :  { %v1720_v50 = vadd.f32 %v1718_v49, %v1555_v42 }
 0x889   :  { %v3533_v4 = vmul.f32 -1.442695, %v1720_v50  ;;  %v1728_v8 = vrot.slane %v1720_v50, 2  ;;  %v1739_v58 = vrot.slane %v1720_v50, 6  ;;  %v1736_v10 = vrot.slane %v1720_v50, 4 }
 0x88b   :  { %4711 = vpow2.f32 %v3533_v4  ;;  %v3534_v56 = vmul.f32 -1.442695, %v1728_v8  ;;  %v3535_v59 = vmul.f32 -1.442695, %v1739_v58 }
 0x88d   :  { %4713 = vpow2.f32 %v3534_v56 }
 0x88e   :  { %4715 = vpow2.f32 %v3535_v59 }
 0x895   :  { %v4712_v11 = vpop.eup %4711 }
 0x896   :  { %v1724_v12 = vadd.f32 1.0, %v4712_v11 }
 0x897   :  { %v4714_v9 = vpop.eup %4713 }
 0x898   :  { %4717 = vrcp.f32 %v1724_v12  ;;  %v1733_v22 = vadd.f32 1.0, %v4714_v9  ;;  %v4716_v2 = vpop.eup %4715 }
 0x899   :  { %4719 = vtanh.f32 %v1736_v10  ;;  %v1744_v25 = vadd.f32 1.0, %v4716_v2  ;;  %v1829_v2 = vld [vmem:[#allocation3 + $0x2] sm:$0x3] }
 0x89a   :  { %4721 = vrcp.f32 %v1733_v22 }
 0x89b   :  { %4723 = vrcp.f32 %v1744_v25 }
 0x89f   :  { %v1898_v27 = vpop.f32.mrb[16].mxu0  ;;  %v1969_v31 = vpop.f32.mrb[16].mxu1 }
 0x8a0   :  { %v1900_v40 = vpop.f32.mrb[17].mxu0  ;;  %v1971_v1 = vpop.f32.mrb[17].mxu1 }
 0x8a1   :  { %v1978_v7 = vcombine.low %v1898_v27, %v1900_v40  ;;  %v1979_v21 = vcombine.low %v1969_v31, %v1971_v1 }
 0x8a2   :  { %v4718_v37 = vpop.eup %4717 }
 0x8a3   :  { %v4720_v38 = vpop.eup %4719  ;;  %v1986_v48 = vrot.slane %v1978_v7, %v5275_v61  ;;  %v1993_v15 = vrot.slane %v1979_v21, %v5275_v61 }
 0x8a4   :  { %v4722_v24 = vpop.eup %4721  ;;  %v1748_v41 = vmul.f32 %v4720_v38, %v4718_v37 }
 0x8a5   :  { %v1747_v30 = vmul.f32 %v4722_v24, %v5526_v32  ;;  %v1994_v42 = vcombine.low %v1986_v48, %v1993_v15  ;;  %v4724_v59 = vpop.eup %4723 }
 0x8a7   :  { %v1749_v49 = vadd.f32 %v1748_v41, %v1747_v30  ;;  %v1996_v50 = vadd.f32 %v1994_v42, %v1831_v29 }
 0x8a9   :  { %4725 = vtanh.f32 %v1749_v49  ;;  %1755 = vst [vmem:[#allocation3] sm:$0x3] %v1749_v49  ;;  %1760 = vst [vmem:[#allocation14] sm:$0x3] %v1749_v49  ;;  %v3536_v4 = vmul.f32 -1.442695, %v1996_v50 }
 0x8aa   :  { %v2004_v8 = vrot.slane %v1996_v50, 2  ;;  %v2015_v58 = vrot.slane %v1996_v50, 6  ;;  %v2012_v32 = vrot.slane %v1996_v50, 4 }
 0x8ab   :  { %4727 = vpow2.f32 %v3536_v4 }
 0x8ac   :  { %v3537_v56 = vmul.f32 -1.442695, %v2004_v8  ;;  %v3538_v10 = vmul.f32 -1.442695, %v2015_v58  ;;  %v2031_v58 = vld [vmem:[#allocation7 + $0x30] sm:$0xff] }
 0x8ae   :  { %4729 = vpow2.f32 %v3537_v56 }
 0x8af   :  { %4731 = vpow2.f32 %v3538_v10 }
 0x8b3   :  { %v4726_v11 = vpop.eup %4725 }
 0x8b4   :  { %v1751_v12 = vmul.f32 %v4726_v11, %v4724_v59 }
 0x8b5   :  { %v4728_v9 = vpop.eup %4727 }
 0x8b6   :  { %1754 = vst [vmem:[#allocation2] sm:$0x3] %v1751_v12  ;;  %1753 = vst [vmem:[#allocation10 + $0xe] sm:$0x3] %v1751_v12  ;;  %v2000_v22 = vadd.f32 1.0, %v4728_v9 }
 0x8b7   :  { %1759 = vst [vmem:[#allocation13] sm:$0x3] %v1751_v12 }
 0x8b8   :  { %v4730_v27 = vpop.eup %4729  ;;  %4733 = vrcp.f32 %v2000_v22 }
 0x8b9   :  { %v2009_v31 = vadd.f32 1.0, %v4730_v27  ;;  %4735 = vtanh.f32 %v2012_v32  ;;  %v4732_v40 = vpop.eup %4731 }
 0x8ba   :  { %v2020_v37 = vadd.f32 1.0, %v4732_v40 }
 0x8bb   :  { %4737 = vrcp.f32 %v2009_v31 }
 0x8bc   :  { %4739 = vrcp.f32 %v2020_v37 }
 0x8c2   :  { %v4734_v1 = vpop.eup %4733 }
 0x8c3   :  { %v4736_v7 = vpop.eup %4735 }
 0x8c4   :  { %v2024_v48 = vmul.f32 %v4736_v7, %v4734_v1 }
 0x8c5   :  { %v4738_v21 = vpop.eup %4737 }
 0x8c6   :  { %v2023_v38 = vmul.f32 %v4738_v21, %v1829_v2  ;;  %v4740_v24 = vpop.eup %4739 }
 0x8c8   :  { %v5665_v15 = vadd.f32 %v2024_v48, %v2023_v38 }
 0x8ca   :  { %4741 = vtanh.f32 %v5665_v15 }
 0x8d4   :  { %v4742_v25 = vpop.eup %4741 }
 0x8d5   :  { %v2027_v29 = vmul.f32 %v4742_v25, %v4740_v24 }
 0x8d7   :  { %2029 = vst [vmem:[#allocation11 + $0xe] sm:$0x3] %v2027_v29  ;;  %2097 = vmatmul.mubr.f32.vlgmr.msra.gmra.mrb[18].mxu0 %v2027_v29  ;;  %2168 = vmatmul.mubr.f32.vlgmr.msra.gmra.mrb[18].mxu1 %v2027_v29 }
 0x8d8   :  { %4203 = vmatpush1.bf16.msra.mxu0 %v5529_v54  ;;  %4235 = vmatpush1.bf16.msra.mxu1 %v5531_v55 }
 0x8d9   :  { %4205 = vmatprep.subr.bf16.mxu0 %v5533_v62  ;;  %4237 = vmatprep.subr.bf16.mxu1 %v5535_v5 }
 0x8da   :  { %2296 = vmatprep.mubr.f32.mxu0 %v5030_v0  ;;  %2367 = vmatprep.mubr.f32.mxu1 %v5030_v0 }
 0x8dc   :  { %4207 = vmatpush1.bf16.msra.mxu0 %v5539_v19  ;;  %4239 = vmatpush1.bf16.msra.mxu1 %v5541_v23 }
 0x8dd   :  { %4209 = vmatprep.subr.bf16.mxu0 %v5545_v13  ;;  %4241 = vmatprep.subr.bf16.mxu1 %v5547_v17 }
 0x8e0   :  { %4211 = vmatpush1.bf16.msra.mxu0 %v5553_v44  ;;  %4243 = vmatpush1.bf16.msra.mxu1 %v5555_v51 }
 0x8e1   :  { %4213 = vmatprep.subr.bf16.mxu0 %v5559_v57  ;;  %4245 = vmatprep.subr.bf16.mxu1 %v5561_v63 }
 0x8e4   :  { %4215 = vmatpush1.bf16.msra.mxu0 %v5565_v28  ;;  %4247 = vmatpush1.bf16.msra.mxu1 %v5567_v36 }
 0x8e5   :  { %4217 = vmatprep.subr.bf16.mxu0 %v5571_v43  ;;  %4249 = vmatprep.subr.bf16.mxu1 %v5573_v47 }
 0x8e8   :  { %4219 = vmatpush1.bf16.msra.mxu0 %v5577_v33  ;;  %4251 = vmatpush1.bf16.msra.mxu1 %v5579_v34 }
 0x8e9   :  { %4221 = vmatprep.subr.bf16.mxu0 %v5583_v45  ;;  %4253 = vmatprep.subr.bf16.mxu1 %v5585_v46 }
 0x8ec   :  { %4223 = vmatpush1.bf16.msra.mxu0 %v5589_v60  ;;  %4255 = vmatpush1.bf16.msra.mxu1 %v5591_v6 }
 0x8ed   :  { %4225 = vmatprep.subr.bf16.mxu0 %v5595_v3  ;;  %4257 = vmatprep.subr.bf16.mxu1 %v5597_v14 }
 0x8f0   :  { %4227 = vmatpush1.bf16.msra.mxu0 %v5601_v35  ;;  %4259 = vmatpush1.bf16.msra.mxu1 %v5603_v39 }
 0x8f1   :  { %4229 = vmatprep.subr.bf16.mxu0 %v5607_v52  ;;  %4261 = vmatprep.subr.bf16.mxu1 %v5609_v53 }
 0x8f4   :  { %4231 = vmatpush1.bf16.msra.mxu0 %v5613_v16  ;;  %4263 = vmatpush1.bf16.msra.mxu1 %v5615_v20 }
 0x8f5   :  { %4265 = vmatprep.subr.bf16.mxu0 %v5514_v18  ;;  %4297 = vmatprep.subr.bf16.mxu1 %v5516_v26 }
 0x9aa   :  { %v2098_v30 = vpop.f32.mrb[18].mxu0  ;;  %v2169_v41 = vpop.f32.mrb[18].mxu1 }
 0x9ab   :  { %v2100_v42 = vpop.f32.mrb[19].mxu0  ;;  %v2171_v49 = vpop.f32.mrb[19].mxu1 }
 0x9ac   :  { %v2178_v50 = vcombine.low %v2098_v30, %v2100_v42  ;;  %v2179_v4 = vcombine.low %v2169_v41, %v2171_v49 }
 0x9ae   :  { %v2186_v8 = vrot.slane %v2178_v50, %v5275_v61  ;;  %v2193_v56 = vrot.slane %v2179_v4, %v5275_v61 }
 0x9b0   :  { %v2194_v59 = vcombine.low %v2186_v8, %v2193_v56 }
 0x9b2   :  { %v2196_v11 = vadd.f32 %v2194_v59, %v2031_v58 }
 0x9b4   :  { %v3539_v10 = vmul.f32 -1.442695, %v2196_v11  ;;  %v2204_v12 = vrot.slane %v2196_v11, 2  ;;  %v2215_v32 = vrot.slane %v2196_v11, 6  ;;  %v2212_v31 = vrot.slane %v2196_v11, 4  ;;  %v2231_v11 = vld [vmem:[#allocation7 + $0x28] sm:$0xff] }
 0x9b6   :  { %4743 = vpow2.f32 %v3539_v10  ;;  %v3540_v9 = vmul.f32 -1.442695, %v2204_v12  ;;  %v3541_v22 = vmul.f32 -1.442695, %v2215_v32 }
 0x9b8   :  { %4745 = vpow2.f32 %v3540_v9 }
 0x9b9   :  { %4747 = vpow2.f32 %v3541_v22 }
 0x9c0   :  { %v4744_v27 = vpop.eup %4743 }
 0x9c1   :  { %v2200_v40 = vadd.f32 1.0, %v4744_v27 }
 0x9c2   :  { %v4746_v1 = vpop.eup %4745 }
 0x9c3   :  { %4749 = vrcp.f32 %v2200_v40  ;;  %v2209_v2 = vadd.f32 1.0, %v4746_v1  ;;  %v4748_v7 = vpop.eup %4747 }
 0x9c4   :  { %4751 = vtanh.f32 %v2212_v31  ;;  %v2220_v48 = vadd.f32 1.0, %v4748_v7 }
 0x9c5   :  { %4753 = vrcp.f32 %v2209_v2 }
 0x9c6   :  { %4755 = vrcp.f32 %v2220_v48 }
 0x9cd   :  { %v4750_v21 = vpop.eup %4749 }
 0x9ce   :  { %v4752_v37 = vpop.eup %4751 }
 0x9cf   :  { %v4754_v38 = vpop.eup %4753  ;;  %v2224_v25 = vmul.f32 %v4752_v37, %v4750_v21 }
 0x9d0   :  { %v2223_v24 = vmul.f32 %v4754_v38, %v5665_v15  ;;  %v4756_v30 = vpop.eup %4755 }
 0x9d2   :  { %v5705_v29 = vadd.f32 %v2224_v25, %v2223_v24 }
 0x9d4   :  { %4757 = vtanh.f32 %v5705_v29 }
 0x9de   :  { %v4758_v41 = vpop.eup %4757 }
 0x9df   :  { %v2227_v42 = vmul.f32 %v4758_v41, %v4756_v30 }
 0x9e1   :  { %2229 = vst [vmem:[#allocation11 + $0xc] sm:$0x3] %v2227_v42  ;;  %2297 = vmatmul.mubr.f32.vlgmr.msra.gmra.mrb[20].mxu0 %v2227_v42  ;;  %2368 = vmatmul.mubr.f32.vlgmr.msra.gmra.mrb[20].mxu1 %v2227_v42 }
 0x9e2   :  { %4267 = vmatpush1.bf16.msra.mxu0 %v5529_v54  ;;  %4299 = vmatpush1.bf16.msra.mxu1 %v5531_v55 }
 0x9e3   :  { %4269 = vmatprep.subr.bf16.mxu0 %v5533_v62  ;;  %4301 = vmatprep.subr.bf16.mxu1 %v5535_v5 }
 0x9e4   :  { %2496 = vmatprep.mubr.f32.mxu0 %v5030_v0  ;;  %2567 = vmatprep.mubr.f32.mxu1 %v5030_v0 }
 0x9e6   :  { %4271 = vmatpush1.bf16.msra.mxu0 %v5539_v19  ;;  %4303 = vmatpush1.bf16.msra.mxu1 %v5541_v23 }
 0x9e7   :  { %4273 = vmatprep.subr.bf16.mxu0 %v5545_v13  ;;  %4305 = vmatprep.subr.bf16.mxu1 %v5547_v17 }
 0x9ea   :  { %4275 = vmatpush1.bf16.msra.mxu0 %v5553_v44  ;;  %4307 = vmatpush1.bf16.msra.mxu1 %v5555_v51 }
 0x9eb   :  { %4277 = vmatprep.subr.bf16.mxu0 %v5559_v57  ;;  %4309 = vmatprep.subr.bf16.mxu1 %v5561_v63 }
 0x9ee   :  { %4279 = vmatpush1.bf16.msra.mxu0 %v5565_v28  ;;  %4311 = vmatpush1.bf16.msra.mxu1 %v5567_v36 }
 0x9ef   :  { %4281 = vmatprep.subr.bf16.mxu0 %v5571_v43  ;;  %4313 = vmatprep.subr.bf16.mxu1 %v5573_v47 }
 0x9f2   :  { %4283 = vmatpush1.bf16.msra.mxu0 %v5577_v33  ;;  %4315 = vmatpush1.bf16.msra.mxu1 %v5579_v34 }
 0x9f3   :  { %4285 = vmatprep.subr.bf16.mxu0 %v5583_v45  ;;  %4317 = vmatprep.subr.bf16.mxu1 %v5585_v46 }
 0x9f6   :  { %4287 = vmatpush1.bf16.msra.mxu0 %v5589_v60  ;;  %4319 = vmatpush1.bf16.msra.mxu1 %v5591_v6 }
 0x9f7   :  { %4289 = vmatprep.subr.bf16.mxu0 %v5595_v3  ;;  %4321 = vmatprep.subr.bf16.mxu1 %v5597_v14 }
 0x9fa   :  { %4291 = vmatpush1.bf16.msra.mxu0 %v5601_v35  ;;  %4323 = vmatpush1.bf16.msra.mxu1 %v5603_v39 }
 0x9fb   :  { %4293 = vmatprep.subr.bf16.mxu0 %v5607_v52  ;;  %4325 = vmatprep.subr.bf16.mxu1 %v5609_v53 }
 0x9fe   :  { %4295 = vmatpush1.bf16.msra.mxu0 %v5613_v16  ;;  %4327 = vmatpush1.bf16.msra.mxu1 %v5615_v20 }
 0x9ff   :  { %4329 = vmatprep.subr.bf16.mxu0 %v5514_v18  ;;  %4361 = vmatprep.subr.bf16.mxu1 %v5516_v26 }
 0xab4   :  { %v2298_v15 = vpop.f32.mrb[20].mxu0  ;;  %v2369_v49 = vpop.f32.mrb[20].mxu1 }
 0xab5   :  { %v2300_v50 = vpop.f32.mrb[21].mxu0  ;;  %v2371_v4 = vpop.f32.mrb[21].mxu1 }
 0xab6   :  { %v2378_v8 = vcombine.low %v2298_v15, %v2300_v50  ;;  %v2379_v56 = vcombine.low %v2369_v49, %v2371_v4 }
 0xab8   :  { %v2386_v58 = vrot.slane %v2378_v8, %v5275_v61  ;;  %v2393_v59 = vrot.slane %v2379_v56, %v5275_v61 }
 0xaba   :  { %v2394_v10 = vcombine.low %v2386_v58, %v2393_v59 }
 0xabc   :  { %v2396_v12 = vadd.f32 %v2394_v10, %v2231_v11 }
 0xabe   :  { %v3542_v9 = vmul.f32 -1.442695, %v2396_v12  ;;  %v2404_v32 = vrot.slane %v2396_v12, 2  ;;  %v2415_v27 = vrot.slane %v2396_v12, 6  ;;  %v2412_v1 = vrot.slane %v2396_v12, 4  ;;  %v2431_v12 = vld [vmem:[#allocation7 + $0x20] sm:$0xff] }
 0xac0   :  { %4759 = vpow2.f32 %v3542_v9  ;;  %v3543_v22 = vmul.f32 -1.442695, %v2404_v32  ;;  %v3544_v31 = vmul.f32 -1.442695, %v2415_v27 }
 0xac2   :  { %4761 = vpow2.f32 %v3543_v22 }
 0xac3   :  { %4763 = vpow2.f32 %v3544_v31 }
 0xaca   :  { %v4760_v40 = vpop.eup %4759 }
 0xacb   :  { %v2400_v2 = vadd.f32 1.0, %v4760_v40 }
 0xacc   :  { %v4762_v7 = vpop.eup %4761 }
 0xacd   :  { %4765 = vrcp.f32 %v2400_v2  ;;  %v2409_v21 = vadd.f32 1.0, %v4762_v7  ;;  %v4764_v37 = vpop.eup %4763 }
 0xace   :  { %4767 = vtanh.f32 %v2412_v1  ;;  %v2420_v25 = vadd.f32 1.0, %v4764_v37 }
 0xacf   :  { %4769 = vrcp.f32 %v2409_v21 }
 0xad0   :  { %4771 = vrcp.f32 %v2420_v25 }
 0xad7   :  { %v4766_v38 = vpop.eup %4765 }
 0xad8   :  { %v4768_v48 = vpop.eup %4767 }
 0xad9   :  { %v4770_v24 = vpop.eup %4769  ;;  %v2424_v41 = vmul.f32 %v4768_v48, %v4766_v38 }
 0xada   :  { %v2423_v30 = vmul.f32 %v4770_v24, %v5705_v29  ;;  %v4772_v15 = vpop.eup %4771 }
 0xadc   :  { %v5745_v42 = vadd.f32 %v2424_v41, %v2423_v30 }
 0xade   :  { %4773 = vtanh.f32 %v5745_v42 }
 0xae8   :  { %v4774_v49 = vpop.eup %4773 }
 0xae9   :  { %v2427_v50 = vmul.f32 %v4774_v49, %v4772_v15 }
 0xaeb   :  { %2429 = vst [vmem:[#allocation11 + $0xa] sm:$0x3] %v2427_v50  ;;  %2497 = vmatmul.mubr.f32.vlgmr.msra.gmra.mrb[22].mxu0 %v2427_v50  ;;  %2568 = vmatmul.mubr.f32.vlgmr.msra.gmra.mrb[22].mxu1 %v2427_v50 }
 0xaec   :  { %4331 = vmatpush1.bf16.msra.mxu0 %v5529_v54  ;;  %4363 = vmatpush1.bf16.msra.mxu1 %v5531_v55 }
 0xaed   :  { %4333 = vmatprep.subr.bf16.mxu0 %v5533_v62  ;;  %4365 = vmatprep.subr.bf16.mxu1 %v5535_v5 }
 0xaee   :  { %2696 = vmatprep.mubr.f32.mxu0 %v5030_v0  ;;  %2767 = vmatprep.mubr.f32.mxu1 %v5030_v0 }
 0xaf0   :  { %4335 = vmatpush1.bf16.msra.mxu0 %v5539_v19  ;;  %4367 = vmatpush1.bf16.msra.mxu1 %v5541_v23 }
 0xaf1   :  { %4337 = vmatprep.subr.bf16.mxu0 %v5545_v13  ;;  %4369 = vmatprep.subr.bf16.mxu1 %v5547_v17 }
 0xaf4   :  { %4339 = vmatpush1.bf16.msra.mxu0 %v5553_v44  ;;  %4371 = vmatpush1.bf16.msra.mxu1 %v5555_v51 }
 0xaf5   :  { %4341 = vmatprep.subr.bf16.mxu0 %v5559_v57  ;;  %4373 = vmatprep.subr.bf16.mxu1 %v5561_v63 }
 0xaf8   :  { %4343 = vmatpush1.bf16.msra.mxu0 %v5565_v28  ;;  %4375 = vmatpush1.bf16.msra.mxu1 %v5567_v36 }
 0xaf9   :  { %4345 = vmatprep.subr.bf16.mxu0 %v5571_v43  ;;  %4377 = vmatprep.subr.bf16.mxu1 %v5573_v47 }
 0xafc   :  { %4347 = vmatpush1.bf16.msra.mxu0 %v5577_v33  ;;  %4379 = vmatpush1.bf16.msra.mxu1 %v5579_v34 }
 0xafd   :  { %4349 = vmatprep.subr.bf16.mxu0 %v5583_v45  ;;  %4381 = vmatprep.subr.bf16.mxu1 %v5585_v46 }
 0xb00   :  { %4351 = vmatpush1.bf16.msra.mxu0 %v5589_v60  ;;  %4383 = vmatpush1.bf16.msra.mxu1 %v5591_v6 }
 0xb01   :  { %4353 = vmatprep.subr.bf16.mxu0 %v5595_v3  ;;  %4385 = vmatprep.subr.bf16.mxu1 %v5597_v14 }
 0xb04   :  { %4355 = vmatpush1.bf16.msra.mxu0 %v5601_v35  ;;  %4387 = vmatpush1.bf16.msra.mxu1 %v5603_v39 }
 0xb05   :  { %4357 = vmatprep.subr.bf16.mxu0 %v5607_v52  ;;  %4389 = vmatprep.subr.bf16.mxu1 %v5609_v53 }
 0xb08   :  { %4359 = vmatpush1.bf16.msra.mxu0 %v5613_v16  ;;  %4391 = vmatpush1.bf16.msra.mxu1 %v5615_v20 }
 0xb09   :  { %4393 = vmatprep.subr.bf16.mxu0 %v5514_v18  ;;  %4425 = vmatprep.subr.bf16.mxu1 %v5516_v26 }
 0xbbe   :  { %v2498_v29 = vpop.f32.mrb[22].mxu0  ;;  %v2569_v4 = vpop.f32.mrb[22].mxu1 }
 0xbbf   :  { %v2500_v8 = vpop.f32.mrb[23].mxu0  ;;  %v2571_v56 = vpop.f32.mrb[23].mxu1 }
 0xbc0   :  { %v2578_v58 = vcombine.low %v2498_v29, %v2500_v8  ;;  %v2579_v59 = vcombine.low %v2569_v4, %v2571_v56 }
 0xbc2   :  { %v2586_v11 = vrot.slane %v2578_v58, %v5275_v61  ;;  %v2593_v10 = vrot.slane %v2579_v59, %v5275_v61 }
 0xbc4   :  { %v2594_v9 = vcombine.low %v2586_v11, %v2593_v10 }
 0xbc6   :  { %v2596_v32 = vadd.f32 %v2594_v9, %v2431_v12 }
 0xbc8   :  { %v3545_v22 = vmul.f32 -1.442695, %v2596_v32  ;;  %v2604_v27 = vrot.slane %v2596_v32, 2  ;;  %v2615_v40 = vrot.slane %v2596_v32, 6  ;;  %v2612_v7 = vrot.slane %v2596_v32, 4  ;;  %v2631_v32 = vld [vmem:[#allocation7 + $0x18] sm:$0xff] }
 0xbca   :  { %4775 = vpow2.f32 %v3545_v22  ;;  %v3546_v31 = vmul.f32 -1.442695, %v2604_v27  ;;  %v3547_v1 = vmul.f32 -1.442695, %v2615_v40 }
 0xbcc   :  { %4777 = vpow2.f32 %v3546_v31 }
 0xbcd   :  { %4779 = vpow2.f32 %v3547_v1 }
 0xbd4   :  { %v4776_v2 = vpop.eup %4775 }
 0xbd5   :  { %v2600_v21 = vadd.f32 1.0, %v4776_v2 }
 0xbd6   :  { %v4778_v37 = vpop.eup %4777 }
 0xbd7   :  { %4781 = vrcp.f32 %v2600_v21  ;;  %v2609_v38 = vadd.f32 1.0, %v4778_v37  ;;  %v4780_v48 = vpop.eup %4779 }
 0xbd8   :  { %4783 = vtanh.f32 %v2612_v7  ;;  %v2620_v41 = vadd.f32 1.0, %v4780_v48 }
 0xbd9   :  { %4785 = vrcp.f32 %v2609_v38 }
 0xbda   :  { %4787 = vrcp.f32 %v2620_v41 }
 0xbe1   :  { %v4782_v24 = vpop.eup %4781 }
 0xbe2   :  { %v4784_v25 = vpop.eup %4783 }
 0xbe3   :  { %v4786_v30 = vpop.eup %4785  ;;  %v2624_v49 = vmul.f32 %v4784_v25, %v4782_v24 }
 0xbe4   :  { %v2623_v15 = vmul.f32 %v4786_v30, %v5745_v42  ;;  %v4788_v29 = vpop.eup %4787 }
 0xbe6   :  { %v5785_v50 = vadd.f32 %v2624_v49, %v2623_v15 }
 0xbe8   :  { %4789 = vtanh.f32 %v5785_v50 }
 0xbf2   :  { %v4790_v4 = vpop.eup %4789 }
 0xbf3   :  { %v2627_v8 = vmul.f32 %v4790_v4, %v4788_v29 }
 0xbf5   :  { %2629 = vst [vmem:[#allocation11 + $0x8] sm:$0x3] %v2627_v8  ;;  %2697 = vmatmul.mubr.f32.vlgmr.msra.gmra.mrb[24].mxu0 %v2627_v8  ;;  %2768 = vmatmul.mubr.f32.vlgmr.msra.gmra.mrb[24].mxu1 %v2627_v8 }
 0xbf6   :  { %4395 = vmatpush1.bf16.msra.mxu0 %v5529_v54  ;;  %4427 = vmatpush1.bf16.msra.mxu1 %v5531_v55 }
 0xbf7   :  { %4397 = vmatprep.subr.bf16.mxu0 %v5533_v62  ;;  %4429 = vmatprep.subr.bf16.mxu1 %v5535_v5 }
 0xbf8   :  { %2896 = vmatprep.mubr.f32.mxu0 %v5030_v0  ;;  %2967 = vmatprep.mubr.f32.mxu1 %v5030_v0 }
 0xbfa   :  { %4399 = vmatpush1.bf16.msra.mxu0 %v5539_v19  ;;  %4431 = vmatpush1.bf16.msra.mxu1 %v5541_v23 }
 0xbfb   :  { %4401 = vmatprep.subr.bf16.mxu0 %v5545_v13  ;;  %4433 = vmatprep.subr.bf16.mxu1 %v5547_v17 }
 0xbfe   :  { %4403 = vmatpush1.bf16.msra.mxu0 %v5553_v44  ;;  %4435 = vmatpush1.bf16.msra.mxu1 %v5555_v51 }
 0xbff   :  { %4405 = vmatprep.subr.bf16.mxu0 %v5559_v57  ;;  %4437 = vmatprep.subr.bf16.mxu1 %v5561_v63 }
 0xc02   :  { %4407 = vmatpush1.bf16.msra.mxu0 %v5565_v28  ;;  %4439 = vmatpush1.bf16.msra.mxu1 %v5567_v36 }
 0xc03   :  { %4409 = vmatprep.subr.bf16.mxu0 %v5571_v43  ;;  %4441 = vmatprep.subr.bf16.mxu1 %v5573_v47 }
 0xc06   :  { %4411 = vmatpush1.bf16.msra.mxu0 %v5577_v33  ;;  %4443 = vmatpush1.bf16.msra.mxu1 %v5579_v34 }
 0xc07   :  { %4413 = vmatprep.subr.bf16.mxu0 %v5583_v45  ;;  %4445 = vmatprep.subr.bf16.mxu1 %v5585_v46 }
 0xc0a   :  { %4415 = vmatpush1.bf16.msra.mxu0 %v5589_v60  ;;  %4447 = vmatpush1.bf16.msra.mxu1 %v5591_v6 }
 0xc0b   :  { %4417 = vmatprep.subr.bf16.mxu0 %v5595_v3  ;;  %4449 = vmatprep.subr.bf16.mxu1 %v5597_v14 }
 0xc0e   :  { %4419 = vmatpush1.bf16.msra.mxu0 %v5601_v35  ;;  %4451 = vmatpush1.bf16.msra.mxu1 %v5603_v39 }
 0xc0f   :  { %4421 = vmatprep.subr.bf16.mxu0 %v5607_v52  ;;  %4453 = vmatprep.subr.bf16.mxu1 %v5609_v53 }
 0xc12   :  { %4423 = vmatpush1.bf16.msra.mxu0 %v5613_v16  ;;  %4455 = vmatpush1.bf16.msra.mxu1 %v5615_v20 }
 0xc13   :  { %4457 = vmatprep.subr.bf16.mxu0 %v5514_v18  ;;  %4489 = vmatprep.subr.bf16.mxu1 %v5516_v26 }
 0xcc8   :  { %v2698_v42 = vpop.f32.mrb[24].mxu0  ;;  %v2769_v56 = vpop.f32.mrb[24].mxu1 }
 0xcc9   :  { %v2700_v58 = vpop.f32.mrb[25].mxu0  ;;  %v2771_v59 = vpop.f32.mrb[25].mxu1 }
 0xcca   :  { %v2778_v11 = vcombine.low %v2698_v42, %v2700_v58  ;;  %v2779_v10 = vcombine.low %v2769_v56, %v2771_v59 }
 0xccc   :  { %v2786_v12 = vrot.slane %v2778_v11, %v5275_v61  ;;  %v2793_v9 = vrot.slane %v2779_v10, %v5275_v61 }
 0xcce   :  { %v2794_v22 = vcombine.low %v2786_v12, %v2793_v9 }
 0xcd0   :  { %v2796_v27 = vadd.f32 %v2794_v22, %v2631_v32 }
 0xcd2   :  { %v3548_v31 = vmul.f32 -1.442695, %v2796_v27  ;;  %v2804_v40 = vrot.slane %v2796_v27, 2  ;;  %v2815_v2 = vrot.slane %v2796_v27, 6  ;;  %v2812_v37 = vrot.slane %v2796_v27, 4  ;;  %v2831_v27 = vld [vmem:[#allocation7 + $0x10] sm:$0xff] }
 0xcd4   :  { %4791 = vpow2.f32 %v3548_v31  ;;  %v3549_v1 = vmul.f32 -1.442695, %v2804_v40  ;;  %v3550_v7 = vmul.f32 -1.442695, %v2815_v2 }
 0xcd6   :  { %4793 = vpow2.f32 %v3549_v1 }
 0xcd7   :  { %4795 = vpow2.f32 %v3550_v7 }
 0xcde   :  { %v4792_v21 = vpop.eup %4791 }
 0xcdf   :  { %v2800_v38 = vadd.f32 1.0, %v4792_v21 }
 0xce0   :  { %v4794_v48 = vpop.eup %4793 }
 0xce1   :  { %4797 = vrcp.f32 %v2800_v38  ;;  %v2809_v24 = vadd.f32 1.0, %v4794_v48  ;;  %v4796_v25 = vpop.eup %4795 }
 0xce2   :  { %4799 = vtanh.f32 %v2812_v37  ;;  %v2820_v49 = vadd.f32 1.0, %v4796_v25 }
 0xce3   :  { %4801 = vrcp.f32 %v2809_v24 }
 0xce4   :  { %4803 = vrcp.f32 %v2820_v49 }
 0xceb   :  { %v4798_v30 = vpop.eup %4797 }
 0xcec   :  { %v4800_v41 = vpop.eup %4799 }
 0xced   :  { %v4802_v15 = vpop.eup %4801  ;;  %v2824_v4 = vmul.f32 %v4800_v41, %v4798_v30 }
 0xcee   :  { %v2823_v29 = vmul.f32 %v4802_v15, %v5785_v50  ;;  %v4804_v42 = vpop.eup %4803 }
 0xcf0   :  { %v5825_v8 = vadd.f32 %v2824_v4, %v2823_v29 }
 0xcf2   :  { %4805 = vtanh.f32 %v5825_v8 }
 0xcfc   :  { %v4806_v56 = vpop.eup %4805 }
 0xcfd   :  { %v2827_v58 = vmul.f32 %v4806_v56, %v4804_v42 }
 0xcff   :  { %2829 = vst [vmem:[#allocation11 + $0x6] sm:$0x3] %v2827_v58  ;;  %2897 = vmatmul.mubr.f32.vlgmr.msra.gmra.mrb[26].mxu0 %v2827_v58  ;;  %2968 = vmatmul.mubr.f32.vlgmr.msra.gmra.mrb[26].mxu1 %v2827_v58 }
 0xd00   :  { %4459 = vmatpush1.bf16.msra.mxu0 %v5529_v54  ;;  %4491 = vmatpush1.bf16.msra.mxu1 %v5531_v55 }
 0xd01   :  { %4461 = vmatprep.subr.bf16.mxu0 %v5533_v62  ;;  %4493 = vmatprep.subr.bf16.mxu1 %v5535_v5 }
 0xd02   :  { %3096 = vmatprep.mubr.f32.mxu0 %v5030_v0  ;;  %3167 = vmatprep.mubr.f32.mxu1 %v5030_v0 }
 0xd04   :  { %4463 = vmatpush1.bf16.msra.mxu0 %v5539_v19  ;;  %4495 = vmatpush1.bf16.msra.mxu1 %v5541_v23 }
 0xd05   :  { %4465 = vmatprep.subr.bf16.mxu0 %v5545_v13  ;;  %4497 = vmatprep.subr.bf16.mxu1 %v5547_v17 }
 0xd08   :  { %4467 = vmatpush1.bf16.msra.mxu0 %v5553_v44  ;;  %4499 = vmatpush1.bf16.msra.mxu1 %v5555_v51 }
 0xd09   :  { %4469 = vmatprep.subr.bf16.mxu0 %v5559_v57  ;;  %4501 = vmatprep.subr.bf16.mxu1 %v5561_v63 }
 0xd0c   :  { %4471 = vmatpush1.bf16.msra.mxu0 %v5565_v28  ;;  %4503 = vmatpush1.bf16.msra.mxu1 %v5567_v36 }
 0xd0d   :  { %4473 = vmatprep.subr.bf16.mxu0 %v5571_v43  ;;  %4505 = vmatprep.subr.bf16.mxu1 %v5573_v47 }
 0xd10   :  { %4475 = vmatpush1.bf16.msra.mxu0 %v5577_v33  ;;  %4507 = vmatpush1.bf16.msra.mxu1 %v5579_v34 }
 0xd11   :  { %4477 = vmatprep.subr.bf16.mxu0 %v5583_v45  ;;  %4509 = vmatprep.subr.bf16.mxu1 %v5585_v46 }
 0xd14   :  { %4479 = vmatpush1.bf16.msra.mxu0 %v5589_v60  ;;  %4511 = vmatpush1.bf16.msra.mxu1 %v5591_v6 }
 0xd15   :  { %4481 = vmatprep.subr.bf16.mxu0 %v5595_v3  ;;  %4513 = vmatprep.subr.bf16.mxu1 %v5597_v14 }
 0xd18   :  { %4483 = vmatpush1.bf16.msra.mxu0 %v5601_v35  ;;  %4515 = vmatpush1.bf16.msra.mxu1 %v5603_v39 }
 0xd19   :  { %4485 = vmatprep.subr.bf16.mxu0 %v5607_v52  ;;  %4517 = vmatprep.subr.bf16.mxu1 %v5609_v53 }
 0xd1c   :  { %4487 = vmatpush1.bf16.msra.mxu0 %v5613_v16  ;;  %4519 = vmatpush1.bf16.msra.mxu1 %v5615_v20 }
 0xd1d   :  { %4521 = vmatprep.subr.bf16.mxu0 %v5514_v18  ;;  %4553 = vmatprep.subr.bf16.mxu1 %v5516_v26 }
 0xdd2   :  { %v2898_v50 = vpop.f32.mrb[26].mxu0  ;;  %v2969_v59 = vpop.f32.mrb[26].mxu1 }
 0xdd3   :  { %v2900_v11 = vpop.f32.mrb[27].mxu0  ;;  %v2971_v10 = vpop.f32.mrb[27].mxu1 }
 0xdd4   :  { %v2978_v12 = vcombine.low %v2898_v50, %v2900_v11  ;;  %v2979_v9 = vcombine.low %v2969_v59, %v2971_v10 }
 0xdd6   :  { %v2986_v32 = vrot.slane %v2978_v12, %v5275_v61  ;;  %v2993_v22 = vrot.slane %v2979_v9, %v5275_v61 }
 0xdd8   :  { %v2994_v31 = vcombine.low %v2986_v32, %v2993_v22 }
 0xdda   :  { %v2996_v40 = vadd.f32 %v2994_v31, %v2831_v27 }
 0xddc   :  { %v3551_v1 = vmul.f32 -1.442695, %v2996_v40  ;;  %v3004_v2 = vrot.slane %v2996_v40, 2  ;;  %v3015_v18 = vrot.slane %v2996_v40, 6  ;;  %v3012_v37 = vrot.slane %v2996_v40, 4 }
 0xdde   :  { %4807 = vpow2.f32 %v3551_v1  ;;  %v3552_v7 = vmul.f32 -1.442695, %v3004_v2  ;;  %v3553_v26 = vmul.f32 -1.442695, %v3015_v18 }
 0xde0   :  { %4809 = vpow2.f32 %v3552_v7 }
 0xde1   :  { %4811 = vpow2.f32 %v3553_v26 }
 0xde8   :  { %v4808_v21 = vpop.eup %4807 }
 0xde9   :  { %v3000_v38 = vadd.f32 1.0, %v4808_v21 }
 0xdea   :  { %v4810_v48 = vpop.eup %4809 }
 0xdeb   :  { %4813 = vrcp.f32 %v3000_v38  ;;  %v3009_v24 = vadd.f32 1.0, %v4810_v48  ;;  %v4812_v25 = vpop.eup %4811 }
 0xdec   :  { %4815 = vtanh.f32 %v3012_v37  ;;  %v3020_v49 = vadd.f32 1.0, %v4812_v25 }
 0xded   :  { %4817 = vrcp.f32 %v3009_v24 }
 0xdee   :  { %4819 = vrcp.f32 %v3020_v49 }
 0xdf5   :  { %v4814_v30 = vpop.eup %4813 }
 0xdf6   :  { %v4816_v41 = vpop.eup %4815 }
 0xdf7   :  { %v4818_v15 = vpop.eup %4817  ;;  %v3024_v4 = vmul.f32 %v4816_v41, %v4814_v30 }
 0xdf8   :  { %v3023_v29 = vmul.f32 %v4818_v15, %v5825_v8  ;;  %v4820_v56 = vpop.eup %4819 }
 0xdfa   :  { %v5865_v42 = vadd.f32 %v3024_v4, %v3023_v29 }
 0xdfc   :  { %4821 = vtanh.f32 %v5865_v42 }
 0xe06   :  { %v4822_v58 = vpop.eup %4821 }
 0xe07   :  { %v3027_v50 = vmul.f32 %v4822_v58, %v4820_v56 }
 0xe09   :  { %3029 = vst [vmem:[#allocation11 + $0x4] sm:$0x3] %v3027_v50  ;;  %3097 = vmatmul.mubr.f32.vlgmr.msra.gmra.mrb[28].mxu0 %v3027_v50  ;;  %3168 = vmatmul.mubr.f32.vlgmr.msra.gmra.mrb[28].mxu1 %v3027_v50 }
 0xe0a   :  { %4523 = vmatpush1.bf16.msra.mxu0 %v5529_v54  ;;  %4555 = vmatpush1.bf16.msra.mxu1 %v5531_v55 }
 0xe0b   :  { %4525 = vmatprep.subr.bf16.mxu0 %v5533_v62  ;;  %4557 = vmatprep.subr.bf16.mxu1 %v5535_v5 }
 0xe0c   :  { %3295 = vmatprep.mubr.f32.mxu0 %v5030_v0  ;;  %3366 = vmatprep.mubr.f32.mxu1 %v5030_v0 }
 0xe0e   :  { %4527 = vmatpush1.bf16.msra.mxu0 %v5539_v19  ;;  %4559 = vmatpush1.bf16.msra.mxu1 %v5541_v23 }
 0xe0f   :  { %4529 = vmatprep.subr.bf16.mxu0 %v5545_v13  ;;  %4561 = vmatprep.subr.bf16.mxu1 %v5547_v17  ;;  %v3031_v17 = vld [vmem:[#allocation7 + $0x8] sm:$0xff] }
 0xe12   :  { %4531 = vmatpush1.bf16.msra.mxu0 %v5553_v44  ;;  %4563 = vmatpush1.bf16.msra.mxu1 %v5555_v51 }
 0xe13   :  { %4533 = vmatprep.subr.bf16.mxu0 %v5559_v57  ;;  %4565 = vmatprep.subr.bf16.mxu1 %v5561_v63 }
 0xe16   :  { %4535 = vmatpush1.bf16.msra.mxu0 %v5565_v28  ;;  %4567 = vmatpush1.bf16.msra.mxu1 %v5567_v36 }
 0xe17   :  { %4537 = vmatprep.subr.bf16.mxu0 %v5571_v43  ;;  %4569 = vmatprep.subr.bf16.mxu1 %v5573_v47 }
 0xe1a   :  { %4539 = vmatpush1.bf16.msra.mxu0 %v5577_v33  ;;  %4571 = vmatpush1.bf16.msra.mxu1 %v5579_v34 }
 0xe1b   :  { %4541 = vmatprep.subr.bf16.mxu0 %v5583_v45  ;;  %4573 = vmatprep.subr.bf16.mxu1 %v5585_v46 }
 0xe1e   :  { %4543 = vmatpush1.bf16.msra.mxu0 %v5589_v60  ;;  %4575 = vmatpush1.bf16.msra.mxu1 %v5591_v6 }
 0xe1f   :  { %4545 = vmatprep.subr.bf16.mxu0 %v5595_v3  ;;  %4577 = vmatprep.subr.bf16.mxu1 %v5597_v14 }
 0xe22   :  { %4547 = vmatpush1.bf16.msra.mxu0 %v5601_v35  ;;  %4579 = vmatpush1.bf16.msra.mxu1 %v5603_v39 }
 0xe23   :  { %4549 = vmatprep.subr.bf16.mxu0 %v5607_v52  ;;  %4581 = vmatprep.subr.bf16.mxu1 %v5609_v53 }
 0xe26   :  { %4551 = vmatpush1.bf16.msra.mxu0 %v5613_v16  ;;  %4583 = vmatpush1.bf16.msra.mxu1 %v5615_v20 }
 0xedc   :  { %v3098_v0 = vpop.f32.mrb[28].mxu0  ;;  %v3169_v54 = vpop.f32.mrb[28].mxu1 }
 0xedd   :  { %v3100_v55 = vpop.f32.mrb[29].mxu0  ;;  %v3171_v62 = vpop.f32.mrb[29].mxu1 }
 0xede   :  { %v3178_v5 = vcombine.low %v3098_v0, %v3100_v55  ;;  %v3179_v19 = vcombine.low %v3169_v54, %v3171_v62 }
 0xee0   :  { %v3186_v23 = vrot.slane %v3178_v5, %v5275_v61  ;;  %v3193_v13 = vrot.slane %v3179_v19, %v5275_v61 }
 0xee2   :  { %v3194_v44 = vcombine.low %v3186_v23, %v3193_v13 }
 0xee4   :  { %v3196_v51 = vadd.f32 %v3194_v44, %v3031_v17 }
 0xee6   :  { %v3554_v57 = vmul.f32 -1.442695, %v3196_v51  ;;  %v3204_v63 = vrot.slane %v3196_v51, 2  ;;  %v3215_v36 = vrot.slane %v3196_v51, 6  ;;  %v3212_v33 = vrot.slane %v3196_v51, 4 }
 0xee8   :  { %4823 = vpow2.f32 %v3554_v57  ;;  %v3555_v28 = vmul.f32 -1.442695, %v3204_v63  ;;  %v3556_v43 = vmul.f32 -1.442695, %v3215_v36 }
 0xeea   :  { %4825 = vpow2.f32 %v3555_v28 }
 0xeeb   :  { %4827 = vpow2.f32 %v3556_v43 }
 0xef2   :  { %v4824_v47 = vpop.eup %4823 }
 0xef3   :  { %v3200_v34 = vadd.f32 1.0, %v4824_v47 }
 0xef4   :  { %v4826_v45 = vpop.eup %4825 }
 0xef5   :  { %4829 = vrcp.f32 %v3200_v34  ;;  %v3209_v46 = vadd.f32 1.0, %v4826_v45  ;;  %v4828_v60 = vpop.eup %4827 }
 0xef6   :  { %4831 = vtanh.f32 %v3212_v33  ;;  %v3220_v35 = vadd.f32 1.0, %v4828_v60 }
 0xef7   :  { %4833 = vrcp.f32 %v3209_v46 }
 0xef8   :  { %4835 = vrcp.f32 %v3220_v35 }
 0xeff   :  { %v4830_v6 = vpop.eup %4829 }
 0xf00   :  { %v4832_v3 = vpop.eup %4831 }
 0xf01   :  { %v4834_v14 = vpop.eup %4833  ;;  %v3224_v52 = vmul.f32 %v4832_v3, %v4830_v6 }
 0xf02   :  { %v3223_v39 = vmul.f32 %v4834_v14, %v5865_v42  ;;  %v4836_v16 = vpop.eup %4835 }
 0xf04   :  { %v3225_v53 = vadd.f32 %v3224_v52, %v3223_v39 }
 0xf06   :  { %4837 = vtanh.f32 %v3225_v53 }
 0xf10   :  { %v4838_v20 = vpop.eup %4837 }
 0xf11   :  { %v3227_v8 = vmul.f32 %v4838_v20, %v4836_v16 }
 0xf13   :  { %3229 = vst [vmem:[#allocation11 + $0x2] sm:$0x3] %v3227_v8  ;;  %3296 = vmatmul.mubr.f32.vlgmr.msra.gmra.mrb[30].mxu0 %v3227_v8  ;;  %3367 = vmatmul.mubr.f32.vlgmr.msra.gmra.mrb[30].mxu1 %v3227_v8 }
 0xf14   :  { %4935 = shalt.err (!%p4932_p6)
}
 0xf15   :  { %s4936_s15 = scalar_lea.hbm %s5977_s5, 256 }
 0xf16   :  { %p4937_p7 = scmp.ne.s32.totalorder %s5977_s5, %s4936_s15  ;;  %p4940_p8 = scmp.lt.u32.totalorder %s4936_s15, %s5977_s5 }
 0xf18   :  { %p4942_p9 = pnand %p4940_p8, %p4937_p7 }
 0xf1a   :  { %4945 = shalt.err (!%p4942_p9)
}
 0xf1b   :  { %s5033_s20 = smov 2   ;;  %v3230_v31 = vld [vmem:[#allocation7] sm:$0xff] }
 0xf1c   :  { %3448 = dma.vmem_to_hbm [thread:$0]  %s3443_s13, 256, %s5977_s5, [#allocation6], %s5029_s11, %s5029_s11, %s5033_s20  }
 0xf1d   :  { %s5034_s5 = smov [#allocation14]  }
 0xf1e   :  { %s3482_s25 = sshll.u32 %s5034_s5, 4  ;;  %s3483_s25 = int_to_ptr.vmem [resolvable:$true] %s3482_s25 }
 0xf1f   :  { %s4946_s26 = scalar_lea.vmem %s3483_s25, 64  ;;  %p4951_p11 = scmp.lt.s32.totalorder %s3483_s25, %s3483_s25 }
 0xf20   :  { %p4947_p10 = scmp.ne.s32.totalorder %s3483_s25, %s4946_s26  ;;  %p4952_p12 = scmp.lt.s32.totalorder %s4946_s26, %s4946_s26 }
 0xf22   :  { %p4953_p13 = por %p4952_p12, %p4951_p11 }
 0xf24   :  { %p4954_p0 = pnand %p4953_p13, %p4947_p10 }
 0xfe6   :  { %v3297_v59 = vpop.f32.mrb[30].mxu0  ;;  %v3368_v11 = vpop.f32.mrb[30].mxu1 }
 0xfe7   :  { %v3299_v10 = vpop.f32.mrb[31].mxu0  ;;  %v3370_v12 = vpop.f32.mrb[31].mxu1 }
 0xfe8   :  { %v3377_v9 = vcombine.low %v3297_v59, %v3299_v10  ;;  %v3378_v32 = vcombine.low %v3368_v11, %v3370_v12 }
 0xfea   :  { %v3385_v22 = vrot.slane %v3377_v9, %v5275_v61  ;;  %v3392_v27 = vrot.slane %v3378_v32, %v5275_v61 }
 0xfec   :  { %v3393_v40 = vcombine.low %v3385_v22, %v3392_v27 }
 0xfee   :  { %v3395_v1 = vadd.f32 %v3393_v40, %v3230_v31 }
 0xff0   :  { %v3557_v2 = vmul.f32 -1.442695, %v3395_v1  ;;  %v3403_v7 = vrot.slane %v3395_v1, 2  ;;  %v3414_v26 = vrot.slane %v3395_v1, 6  ;;  %v3411_v38 = vrot.slane %v3395_v1, 4 }
 0xff2   :  { %4839 = vpow2.f32 %v3557_v2  ;;  %v3558_v18 = vmul.f32 -1.442695, %v3403_v7  ;;  %v3559_v21 = vmul.f32 -1.442695, %v3414_v26 }
 0xff4   :  { %4841 = vpow2.f32 %v3558_v18 }
 0xff5   :  { %4843 = vpow2.f32 %v3559_v21 }
 0xffc   :  { %v4840_v37 = vpop.eup %4839 }
 0xffd   :  { %v3399_v48 = vadd.f32 1.0, %v4840_v37 }
 0xffe   :  { %v4842_v24 = vpop.eup %4841 }
 0xfff   :  { %4845 = vrcp.f32 %v3399_v48  ;;  %v3408_v25 = vadd.f32 1.0, %v4842_v24  ;;  %v4844_v61 = vpop.eup %4843 }
0x1000   :  { %4847 = vtanh.f32 %v3411_v38  ;;  %v3419_v49 = vadd.f32 1.0, %v4844_v61 }
0x1001   :  { %4849 = vrcp.f32 %v3408_v25 }
0x1002   :  { %4851 = vrcp.f32 %v3419_v49 }
0x1009   :  { %v4846_v30 = vpop.eup %4845 }
0x100a   :  { %v4848_v41 = vpop.eup %4847 }
0x100b   :  { %v4850_v15 = vpop.eup %4849  ;;  %v3423_v4 = vmul.f32 %v4848_v41, %v4846_v30 }
0x100c   :  { %v3422_v29 = vmul.f32 %v4850_v15, %v3225_v53 }
0x100e   :  { %v3424_v42 = vadd.f32 %v3423_v4, %v3422_v29 }
0x1010   :  { %4853 = vtanh.f32 %v3424_v42  ;;  %3429 = vst [vmem:[#allocation3 + $0x2] sm:$0x3] %v3424_v42  ;;  %3436 = vst [vmem:[#allocation14 + $0x2] sm:$0x3] %v3424_v42 }
0x1011   :  { %4957 = shalt.err (!%p4954_p0)
}
0x1012   :  { %s4958_s22 = scalar_lea.hbm %s5980_s8, 64 }
0x1013   :  { %p4959_p1 = scmp.ne.s32.totalorder %s5980_s8, %s4958_s22  ;;  %p4962_p2 = scmp.lt.u32.totalorder %s4958_s22, %s5980_s8 }
0x1015   :  { %p4964_p3 = pnand %p4962_p2, %p4959_p1 }
0x1017   :  { %4967 = shalt.err (!%p4964_p3)
}
0x1018   :  { %3488 = dma.vmem_to_hbm [thread:$0]  %s3483_s25, 64, %s5980_s8, [#allocation15], %s5029_s11, %s5029_s11, %s5033_s20   ;;  %v4852_v56 = vpop.eup %4851 }
0x1019   :  { %s5035_s3 = smov [#allocation11]   ;;  %s5036_s4 = smov [#allocation13]  }
0x101a   :  { %s3458_s12 = sshll.u32 %s5035_s3, 4  ;;  %s3470_s13 = sshll.u32 %s5036_s4, 4  ;;  %v4854_v58 = vpop.eup %4853  ;;  %s3459_s12 = int_to_ptr.vmem [resolvable:$true] %s3458_s12  ;;  %s5935_s13 = int_to_ptr.vmem [resolvable:$true] %s3470_s13 }
0x101b   :  { %v3426_v50 = vmul.f32 %v4854_v58, %v4852_v56  ;;  %s4968_s29 = scalar_lea.vmem %s3459_s12, 256  ;;  %p4973_p5 = scmp.lt.s32.totalorder %s3459_s12, %s3459_s12 }
0x101c   :  { %p4969_p4 = scmp.ne.s32.totalorder %s3459_s12, %s4968_s29  ;;  %p4974_p6 = scmp.lt.s32.totalorder %s4968_s29, %s4968_s29 }
0x101d   :  { %3428 = vst [vmem:[#allocation2 + $0x2] sm:$0x3] %v3426_v50  ;;  %3427 = vst [vmem:[#allocation11] sm:$0x3] %v3426_v50 }
0x101e   :  { %3434 = vst [vmem:[#allocation13 + $0x2] sm:$0x3] %v3426_v50  ;;  %p4975_p7 = por %p4974_p6, %p4973_p5 }
0x1020   :  { %p4976_p8 = pnand %p4975_p7, %p4969_p4 }
0x1022   :  { %4979 = shalt.err (!%p4976_p8)
}
0x1023   :  { %s4980_s14 = scalar_lea.hbm %s5978_s6, 256 }
0x1024   :  { %p4981_p9 = scmp.ne.s32.totalorder %s5978_s6, %s4980_s14  ;;  %p4984_p10 = scmp.lt.u32.totalorder %s4980_s14, %s5978_s6 }
0x1026   :  { %p4986_p11 = pnand %p4984_p10, %p4981_p9 }
0x1028   :  { %4989 = shalt.err (!%p4986_p11)
}
0x1029   :  { %3464 = dma.vmem_to_hbm [thread:$0]  %s3459_s12, 256, %s5978_s6, [#allocation12], %s5029_s11, %s5029_s11, %s5033_s20  }
0x102a   :  { %s4990_s1 = scalar_lea.vmem %s5935_s13, 64  ;;  %p4995_p13 = scmp.lt.s32.totalorder %s5935_s13, %s5935_s13 }
0x102b   :  { %p4991_p12 = scmp.ne.s32.totalorder %s5935_s13, %s4990_s1  ;;  %p4996_p0 = scmp.lt.s32.totalorder %s4990_s1, %s4990_s1 }
0x102d   :  { %p4997_p1 = por %p4996_p0, %p4995_p13 }
0x102f   :  { %p4998_p2 = pnand %p4997_p1, %p4991_p12 }
0x1031   :  { %5001 = shalt.err (!%p4998_p2)
}
0x1032   :  { %s5002_s26 = scalar_lea.hbm %s5979_s7, 64 }
0x1033   :  { %p5003_p3 = scmp.ne.s32.totalorder %s5979_s7, %s5002_s26  ;;  %p5006_p4 = scmp.lt.u32.totalorder %s5002_s26, %s5979_s7 }
0x1035   :  { %p5008_p5 = pnand %p5006_p4, %p5003_p3 }
0x1037   :  { %5011 = shalt.err (!%p5008_p5)
}
0x1038   :  { %3476 = dma.vmem_to_hbm [thread:$0]  %s5935_s13, 64, %s5979_s7, [#allocation12], %s5029_s11, %s5029_s11, %s5033_s20  }
0x1039   :  { %5016 = dma.done.wait [#allocation6], 256  }
0x103a   :  { %5017 = vsyncadd [#allocation6], 4294967040 }
0x103b   :  { %5018 = dma.done.wait [#allocation12], 320  }
0x103c   :  { %5019 = vsyncadd [#allocation12], 4294966976 }
0x103d   :  { %5020 = dma.done.wait [#allocation15], 64  }
0x103e   :  { %5021 = vsyncadd [#allocation15], 4294967232 }
0x103f   :  { %3501 = vsyncpa [#allocation5], 1 }
0x1040   :  { %3502 = vsyncpa [#allocation8], 1 }
0x1041   :  { %3503 = vsyncpa [#allocation6], 1 }
0x1042   :  { %3504 = vsyncpa [#allocation12], 1 }
0x1043   :  { %3505 = vsyncpa [#allocation15], 1 }

</bundles_post_ra>
